<compile_context>
chip_gen: v7x
topology: tpu7x:2x2x1
jax: 0.10.0
libtpu: 0.0.40
codegen_flags: <defaults>
</compile_context>

<pallas_src>
import jax
import jax.numpy as jnp
from jax import lax
from jax.experimental import pallas as pl
from jax.experimental.pallas import tpu as pltpu


# --------------------------------------------------------------------------
# Kernel
# --------------------------------------------------------------------------
def _make_window_attn_kernel(num_heads, head_dim, scale):
    """Fused qkv + multi-head window attention + output projection."""
    C = num_heads * head_dim

    def kernel(x_ref, wqkv_ref, wproj_ref, bproj_ref, o_ref):
        # x_ref:     (gb, S, C)   block of `gb` windows, S tokens each
        # wqkv_ref:  (C, 3C)      columns ordered [q | k | v], each head-major
        # wproj_ref: (C, C)
        # bproj_ref: (1, C)
        # o_ref:     (gb, S, C)
        g, S, _ = x_ref.shape
        x = x_ref[...]
        op_dtype = x.dtype                      # MXU operand dtype (bf16 stays bf16)
        dn = (((1,), (0,)), ((), ()))           # (rows, C) @ (C, cols)

        # ---- (1) single batched qkv projection -----------------------------
        x2 = x.reshape(g * S, C)                # layout-preserving when S % 8 == 0
        qkv = lax.dot_general(x2, wqkv_ref[...], dn,
                              preferred_element_type=jnp.float32)   # (g*S, 3C) f32

        # ---- (2) fold the softmax scale into q (S*C elems, not S*S scores) --
        q = (qkv[:, 0 * C:1 * C] * scale).astype(op_dtype).reshape(g, S, C)
        k = qkv[:, 1 * C:2 * C].astype(op_dtype).reshape(g, S, C)
        v = qkv[:, 2 * C:3 * C].astype(op_dtype).reshape(g, S, C)

        # ---- per-head attention (the S x S matmuls are inherently per-head) --
        # TODO(synk): switch to a head-batched einsum over a collapsed
        # (gb*num_heads) batch axis once the (gb,S,nh,hd) reshape+transpose
        # relayout is verified cheap for head_dim < 128.
        head_outs = []
        for h in range(num_heads):
            lo, hi = h * head_dim, (h + 1) * head_dim
            qh, kh, vh = q[:, :, lo:hi], k[:, :, lo:hi], v[:, :, lo:hi]

            s = jnp.einsum('gqd,gkd->gqk', qh, kh,
                           preferred_element_type=jnp.float32)      # (gb, S, S)
            s = s - jnp.max(s, axis=-1, keepdims=True)
            p = jnp.exp(s)
            l = jnp.sum(p, axis=-1, keepdims=True)                  # (gb, S, 1)

            oh = jnp.einsum('gqk,gkd->gqd', p.astype(vh.dtype), vh,
                            preferred_element_type=jnp.float32)     # (gb, S, hd)
            # ---- (3) deferred softmax normalization on the (S, hd) output ---
            # (4x fewer elements than dividing p; use approx=True once outputs
            #  are bf16 and the extra EUP precision is irrelevant)
            oh = oh * pl.reciprocal(l)
            head_outs.append(oh.astype(op_dtype))

        # ---- (4) merge heads on lanes + ONE (gb*S, C) @ (C, C) projection ----
        o = jnp.concatenate(head_outs, axis=-1).reshape(g * S, C)
        out = lax.dot_general(o, wproj_ref[...], dn,
                              preferred_element_type=jnp.float32)
        out = out + bproj_ref[...]
        o_ref[...] = out.reshape(g, S, C).astype(o_ref.dtype)

    return kernel


# --------------------------------------------------------------------------
# VMEM budgeting / block sizing
# --------------------------------------------------------------------------
def _round_up(x, m):
    return (x + m - 1) // m * m


def _tile_bytes(rows, cols, itemsize):
    """Conservative VMEM footprint of a 2-D slab under (8, 128) tiling."""
    return _round_up(max(rows, 1), 8) * _round_up(max(cols, 1), 128) * itemsize


def _per_window_vmem_bytes(S, C, num_heads, head_dim, x_itemsize, out_itemsize):
    """Per-window VMEM estimate; intermediates are f32 regardless of x dtype."""
    f32 = 4
    b = 0
    b += 2 * _tile_bytes(S, C, x_itemsize)          # x block (double-buffered)
    b += 2 * _tile_bytes(S, C, out_itemsize)        # out block (double-buffered)
    b += _tile_bytes(S, 3 * C, f32)                 # qkv
    b += 3 * _tile_bytes(S, C, f32)                 # q, k, v
    b += num_heads * _tile_bytes(S, head_dim, f32)  # per-head outputs (all live)
    b += 2 * (2 * _tile_bytes(S, S, f32)            # ~2 heads' scores/probs live
              + _tile_bytes(S, 1, f32))
    b += 2 * _tile_bytes(S, C, f32)                 # merged heads + proj output
    return b


def _fixed_vmem_bytes(C, w_itemsize):
    # Weights/bias have constant index_maps but Pallas still double-buffers.
    return 2 * (_tile_bytes(C, 3 * C, w_itemsize)
                + _tile_bytes(C, C, w_itemsize)
                + _tile_bytes(1, C, w_itemsize))


def _tensorcores_per_chip():
    """1 for single-TC v5e/v6e; 2 otherwise (v7x) so 'parallel' shards evenly."""
    try:
        kind = jax.devices()[0].device_kind.lower()
    except Exception:
        return 2
    if "v5" in kind or "v6" in kind:
        return 1
    return 2


def _vmem_budget_and_limit():
    """Block-sizing budget and Mosaic scoped-VMEM limit for this chip."""
    cap = None
    try:
        cap = int(pltpu.get_tpu_info().vmem_capacity_bytes)
    except Exception:
        cap = None
    if not cap or cap <= 0:
        cap = 64 * 1024 * 1024                      # conservative: v7x physical
    budget = int(cap * 0.55)                        # ~35 MiB v7x, ~70 MiB v5e/v6e
    limit = min(int(cap * 0.75), 100 * 1024 * 1024)
    return budget, limit


def _pick_windows_per_block(G, per_window_bytes, fixed_bytes, budget, min_steps):
    """Largest divisor of G that fits the VMEM budget; on multi-TC chips keep
    >= min_steps grid steps and prefer an even split for load balance."""
    avail = max(budget - fixed_bytes, per_window_bytes)
    cap = max(1, min(G, avail // max(per_window_bytes, 1)))
    if min_steps > 1:
        cap = min(cap, max(1, G // min_steps))
    divisors = [d for d in range(1, cap + 1) if G % d == 0]
    if min_steps > 1:
        balanced = [d for d in divisors if (G // d) % min_steps == 0]
        if balanced:
            return max(balanced)
    return max(divisors)


# --------------------------------------------------------------------------
# Wrapper
# --------------------------------------------------------------------------
def attention_forward(x, t, H, W, wqkv, wproj, bproj, *, num_heads, ws):
    """x: (B*t, N, C) with N = H*W.
    wqkv:  (C, 3C) == torch qkv.weight^T, columns ordered [q | k | v], head-major
           (exactly torch's reshape(..., 3, nh, hd) column layout).
    wproj: (C, C)  == torch proj.weight^T.   bproj: (C,) == torch proj.bias.
    Returns (B*t, N, C), matching Attention.forward (eval mode)."""
    BT, N, C = x.shape
    assert BT % t == 0 and N == H * W and C % num_heads == 0
    B = BT // t
    head_dim = C // num_heads
    scale = head_dim ** (-0.5)
    hg = -(-H // ws)
    wg = -(-W // ws)
    Hp, Wp = hg * ws, wg * ws
    S = t * ws * ws
    G = B * hg * wg

    # --- window partition (layout plumbing, plain JAX) ---
    a = x.reshape(B, t, H, W, C)
    if Hp > H or Wp > W:
        a = jnp.pad(a, ((0, 0), (0, 0), (0, Hp - H), (0, Wp - W), (0, 0)))
    a = a.reshape(B, t, hg, ws, wg, ws, C).transpose(0, 2, 4, 1, 3, 5, 6)
    x_win = a.reshape(G, S, C)

    budget, vmem_limit = _vmem_budget_and_limit()
    min_steps = _tensorcores_per_chip()
    x_isz = jnp.dtype(x.dtype).itemsize
    gb = _pick_windows_per_block(
        G,
        _per_window_vmem_bytes(S, C, num_heads, head_dim, x_isz, x_isz),
        _fixed_vmem_bytes(C, jnp.dtype(wqkv.dtype).itemsize),
        budget, min_steps)
    grid = (G // gb,)

    kernel = _make_window_attn_kernel(num_heads, head_dim, scale)

    out_win = pl.pallas_call(
        kernel,
        out_shape=jax.ShapeDtypeStruct((G, S, C), x.dtype),
        grid_spec=pltpu.PrefetchScalarGridSpec(
            num_scalar_prefetch=0,
            grid=grid,
            in_specs=[
                pl.BlockSpec((gb, S, C), lambda i: (i, 0, 0)),
                # Grid-invariant weights/bias: constant index_map -> DMA'd once.
                pl.BlockSpec((C, 3 * C), lambda i: (0, 0)),
                pl.BlockSpec((C, C), lambda i: (0, 0)),
                pl.BlockSpec((1, C), lambda i: (0, 0)),
            ],
            out_specs=pl.BlockSpec((gb, S, C), lambda i: (i, 0, 0)),
        ),
        compiler_params=pltpu.CompilerParams(
            dimension_semantics=("parallel",),
            vmem_limit_bytes=vmem_limit,
        ),
    )(x_win, wqkv, wproj, bproj.reshape(1, C))

    # --- window reverse + crop (layout plumbing, plain JAX) ---
    o = out_win.reshape(B, hg, wg, t, ws, ws, C).transpose(0, 3, 1, 4, 2, 5, 6)
    o = o.reshape(B, t, Hp, Wp, C)
    if Hp > H or Wp > W:
        o = o[:, :, :H, :W, :]
    return o.reshape(BT, N, C)


# --------------------------------------------------------------------------
# Pure-JAX reference (mirror of the PyTorch forward, eval mode)
# --------------------------------------------------------------------------
def attention_reference(x, t, H, W, wqkv_flat, wproj, bproj, *, num_heads, ws):
    BT, N, C = x.shape
    B = BT // t
    hd = C // num_heads
    scale = hd ** (-0.5)
    hg = -(-H // ws)
    wg = -(-W // ws)
    Hp, Wp = hg * ws, wg * ws
    a = x.reshape(B, t, H, W, C)
    if Hp > H or Wp > W:
        a = jnp.pad(a, ((0, 0), (0, 0), (0, Hp - H), (0, Wp - W), (0, 0)))
    a = a.reshape(B, t, hg, ws, wg, ws, C).transpose(0, 2, 4, 1, 3, 5, 6)
    a = a.reshape(B, hg * wg, t * ws * ws, C)
    qkv = a @ wqkv_flat                                                 # (B, G', S, 3C)
    qkv = qkv.reshape(B, hg * wg, t * ws * ws, 3, num_heads, hd)
    qkv = qkv.transpose(3, 0, 1, 4, 2, 5)                               # (3, B, G', nh, S, hd)
    q, k, v = qkv[0], qkv[1], qkv[2]
    attn = (q @ jnp.swapaxes(k, -1, -2)) * scale
    attn = jax.nn.softmax(attn, axis=-1)
    o = attn @ v                                                        # (B, G', nh, S, hd)
    o = jnp.swapaxes(o, 2, 3).reshape(B, hg * wg, t * ws * ws, C)
    o = o.reshape(B, hg, wg, t, ws, ws, C).transpose(0, 3, 1, 4, 2, 5, 6)
    o = o.reshape(B, t, Hp, Wp, C)
    if Hp > H or Wp > W:
        o = o[:, :, :H, :W, :]
    o = o.reshape(B, t * H * W, C)
    o = o @ wproj + bproj
    return o.reshape(BT, N, C)


if __name__ == "__main__":
    # Small shapes consistent with the module; H not divisible by ws exercises
    # the padding + crop path.
    B, t, H, W, C = 2, 2, 9, 8, 32
    num_heads, ws = 4, 4
    BT, N = B * t, H * W

    key = jax.random.PRNGKey(0)
    kx, kq, kp, kb = jax.random.split(key, 4)

    x = jax.random.normal(kx, (BT, N, C), dtype=jnp.float32)
    # Synthetic parameters (qkv_bias=False, as in the module default).
    # wqkv columns ordered exactly like torch's qkv.reshape(..., 3, nh, hd).
    wqkv = jax.random.normal(kq, (C, 3 * C), dtype=jnp.float32) * 0.1
    wproj = jax.random.normal(kp, (C, C), dtype=jnp.float32) * 0.1
    bproj = jax.random.normal(kb, (C,), dtype=jnp.float32) * 0.1

    out = attention_forward(x, t, H, W, wqkv, wproj, bproj,
                            num_heads=num_heads, ws=ws)
    out = jax.block_until_ready(out)
    assert out.shape == (BT, N, C)

    with jax.default_matmul_precision("highest"):
        ref = attention_reference(x, t, H, W, wqkv, wproj, bproj,
                                  num_heads=num_heads, ws=ws)
    ref = jax.block_until_ready(ref)

    # Tolerance covers MXU default-precision vs "highest" reference; any
    # semantic error (scale / head order / softmax axis / padding) is >> 1e-2.
    err = float(jnp.max(jnp.abs(out - ref)))
    assert jnp.allclose(out, ref, atol=2e-3, rtol=2e-3), err

    print("KERNEL_OK")
</pallas_src>

<mosaic_0001>
module attributes {stable_mosaic.version = 11 : i64} {
  func.func @kernel(%arg0: i32, %arg1: memref<6x32x32xf32, #tpu.memory_space<vmem>>, %arg2: memref<32x96xf32, #tpu.memory_space<vmem>>, %arg3: memref<32x32xf32, #tpu.memory_space<vmem>>, %arg4: memref<1x32xf32, #tpu.memory_space<vmem>>, %arg5: memref<6x32x32xf32, #tpu.memory_space<vmem>>) attributes {dimension_semantics = [#tpu.dimension_semantics<parallel>], iteration_bounds = array<i64: 2>, scalar_prefetch = 0 : i64, scratch_operands = 0 : i64, tpu.core_type = #tpu.core_type<tc>, window_params = [{transform_indices = @transform_0, window_bounds = array<i64: 6, 32, 32>}, {pipeline_mode = #tpu.pipeline_mode<synchronous>, transform_indices = @transform_1, window_bounds = array<i64: 32, 96>}, {pipeline_mode = #tpu.pipeline_mode<synchronous>, transform_indices = @transform_2, window_bounds = array<i64: 32, 32>}, {pipeline_mode = #tpu.pipeline_mode<synchronous>, transform_indices = @transform_3, window_bounds = array<i64: 1, 32>}, {transform_indices = @transform_4, window_bounds = array<i64: 6, 32, 32>}]} {
    %c0 = arith.constant 0 : index
    %c0_0 = arith.constant 0 : index
    %c0_1 = arith.constant 0 : index
    %0 = vector.load %arg1[%c0, %c0_0, %c0_1] : memref<6x32x32xf32, #tpu.memory_space<vmem>>, vector<6x32x32xf32>
    %1 = vector.shape_cast %0 : vector<6x32x32xf32> to vector<192x32xf32>
    %c0_2 = arith.constant 0 : index
    %c0_3 = arith.constant 0 : index
    %2 = vector.load %arg2[%c0_2, %c0_3] : memref<32x96xf32, #tpu.memory_space<vmem>>, vector<32x96xf32>
    %cst = arith.constant dense<0.000000e+00> : vector<192x96xf32>
    %3 = tpu.matmul %1, %2, %cst {dimension_numbers = #tpu.dot_dimension_numbers<[1], [0], [0], [1], [0, 0, 1, 1], [], []>} : vector<192x32xf32>, vector<32x96xf32>, vector<192x96xf32> -> vector<192x96xf32>
    %4 = vector.extract_strided_slice %3 {offsets = [0, 0], sizes = [192, 32], strides = [1, 1]} : vector<192x96xf32> to vector<192x32xf32>
    %cst_4 = arith.constant 0.353553385 : f32
    %5 = vector.broadcast %cst_4 : f32 to vector<192x32xf32>
    %6 = arith.mulf %4, %5 : vector<192x32xf32>
    %7 = vector.shape_cast %6 : vector<192x32xf32> to vector<6x32x32xf32>
    %8 = vector.extract_strided_slice %3 {offsets = [0, 32], sizes = [192, 32], strides = [1, 1]} : vector<192x96xf32> to vector<192x32xf32>
    %9 = vector.shape_cast %8 : vector<192x32xf32> to vector<6x32x32xf32>
    %10 = vector.extract_strided_slice %3 {offsets = [0, 64], sizes = [192, 32], strides = [1, 1]} : vector<192x96xf32> to vector<192x32xf32>
    %11 = vector.shape_cast %10 : vector<192x32xf32> to vector<6x32x32xf32>
    %12 = vector.extract_strided_slice %7 {offsets = [0, 0, 0], sizes = [6, 32, 8], strides = [1, 1, 1]} : vector<6x32x32xf32> to vector<6x32x8xf32>
    %13 = vector.extract_strided_slice %9 {offsets = [0, 0, 0], sizes = [6, 32, 8], strides = [1, 1, 1]} : vector<6x32x32xf32> to vector<6x32x8xf32>
    %14 = vector.extract_strided_slice %11 {offsets = [0, 0, 0], sizes = [6, 32, 8], strides = [1, 1, 1]} : vector<6x32x32xf32> to vector<6x32x8xf32>
    "tpu.trace_start"() <{level = 10 : i32, message = "gqd,gkd->gqk"}> : () -> ()
    %cst_5 = arith.constant dense<0.000000e+00> : vector<6x32x32xf32>
    %15 = tpu.matmul %12, %13, %cst_5 {dimension_numbers = #tpu.dot_dimension_numbers<[2], [2], [1], [1], [0, 0, 0, 1, 1, 1], [0], [0]>} : vector<6x32x8xf32>, vector<6x32x8xf32>, vector<6x32x32xf32> -> vector<6x32x32xf32>
    "tpu.trace_stop"() : () -> ()
    %cst_6 = arith.constant dense<0xFF800000> : vector<6x32xf32>
    %16 = vector.multi_reduction <maximumf>, %15, %cst_6 [2] : vector<6x32x32xf32> to vector<6x32xf32>
    %17 = vector.shape_cast %16 : vector<6x32xf32> to vector<6x32x1xf32>
    %18 = vector.broadcast %17 : vector<6x32x1xf32> to vector<6x32x32xf32>
    %19 = arith.subf %15, %18 : vector<6x32x32xf32>
    %20 = math.exp %19 : vector<6x32x32xf32>
    %cst_7 = arith.constant dense<0.000000e+00> : vector<6x32xf32>
    %21 = vector.multi_reduction <add>, %20, %cst_7 [2] : vector<6x32x32xf32> to vector<6x32xf32>
    %22 = vector.shape_cast %21 : vector<6x32xf32> to vector<6x32x1xf32>
    "tpu.trace_start"() <{level = 10 : i32, message = "gqk,gkd->gqd"}> : () -> ()
    %cst_8 = arith.constant dense<0.000000e+00> : vector<6x32x8xf32>
    %23 = tpu.matmul %20, %14, %cst_8 {dimension_numbers = #tpu.dot_dimension_numbers<[2], [1], [1], [2], [0, 0, 0, 1, 1, 2], [0], [0]>} : vector<6x32x32xf32>, vector<6x32x8xf32>, vector<6x32x8xf32> -> vector<6x32x8xf32>
    "tpu.trace_stop"() : () -> ()
    %24 = tpu.reciprocal %22 : vector<6x32x1xf32> -> vector<6x32x1xf32>
    %25 = vector.broadcast %24 : vector<6x32x1xf32> to vector<6x32x8xf32>
    %26 = arith.mulf %23, %25 : vector<6x32x8xf32>
    %27 = vector.extract_strided_slice %7 {offsets = [0, 0, 8], sizes = [6, 32, 8], strides = [1, 1, 1]} : vector<6x32x32xf32> to vector<6x32x8xf32>
    %28 = vector.extract_strided_slice %9 {offsets = [0, 0, 8], sizes = [6, 32, 8], strides = [1, 1, 1]} : vector<6x32x32xf32> to vector<6x32x8xf32>
    %29 = vector.extract_strided_slice %11 {offsets = [0, 0, 8], sizes = [6, 32, 8], strides = [1, 1, 1]} : vector<6x32x32xf32> to vector<6x32x8xf32>
    "tpu.trace_start"() <{level = 10 : i32, message = "gqd,gkd->gqk"}> : () -> ()
    %cst_9 = arith.constant dense<0.000000e+00> : vector<6x32x32xf32>
    %30 = tpu.matmul %27, %28, %cst_9 {dimension_numbers = #tpu.dot_dimension_numbers<[2], [2], [1], [1], [0, 0, 0, 1, 1, 1], [0], [0]>} : vector<6x32x8xf32>, vector<6x32x8xf32>, vector<6x32x32xf32> -> vector<6x32x32xf32>
    "tpu.trace_stop"() : () -> ()
    %cst_10 = arith.constant dense<0xFF800000> : vector<6x32xf32>
    %31 = vector.multi_reduction <maximumf>, %30, %cst_10 [2] : vector<6x32x32xf32> to vector<6x32xf32>
    %32 = vector.shape_cast %31 : vector<6x32xf32> to vector<6x32x1xf32>
    %33 = vector.broadcast %32 : vector<6x32x1xf32> to vector<6x32x32xf32>
    %34 = arith.subf %30, %33 : vector<6x32x32xf32>
    %35 = math.exp %34 : vector<6x32x32xf32>
    %cst_11 = arith.constant dense<0.000000e+00> : vector<6x32xf32>
    %36 = vector.multi_reduction <add>, %35, %cst_11 [2] : vector<6x32x32xf32> to vector<6x32xf32>
    %37 = vector.shape_cast %36 : vector<6x32xf32> to vector<6x32x1xf32>
    "tpu.trace_start"() <{level = 10 : i32, message = "gqk,gkd->gqd"}> : () -> ()
    %cst_12 = arith.constant dense<0.000000e+00> : vector<6x32x8xf32>
    %38 = tpu.matmul %35, %29, %cst_12 {dimension_numbers = #tpu.dot_dimension_numbers<[2], [1], [1], [2], [0, 0, 0, 1, 1, 2], [0], [0]>} : vector<6x32x32xf32>, vector<6x32x8xf32>, vector<6x32x8xf32> -> vector<6x32x8xf32>
    "tpu.trace_stop"() : () -> ()
    %39 = tpu.reciprocal %37 : vector<6x32x1xf32> -> vector<6x32x1xf32>
    %40 = vector.broadcast %39 : vector<6x32x1xf32> to vector<6x32x8xf32>
    %41 = arith.mulf %38, %40 : vector<6x32x8xf32>
    %42 = vector.extract_strided_slice %7 {offsets = [0, 0, 16], sizes = [6, 32, 8], strides = [1, 1, 1]} : vector<6x32x32xf32> to vector<6x32x8xf32>
    %43 = vector.extract_strided_slice %9 {offsets = [0, 0, 16], sizes = [6, 32, 8], strides = [1, 1, 1]} : vector<6x32x32xf32> to vector<6x32x8xf32>
    %44 = vector.extract_strided_slice %11 {offsets = [0, 0, 16], sizes = [6, 32, 8], strides = [1, 1, 1]} : vector<6x32x32xf32> to vector<6x32x8xf32>
    "tpu.trace_start"() <{level = 10 : i32, message = "gqd,gkd->gqk"}> : () -> ()
    %cst_13 = arith.constant dense<0.000000e+00> : vector<6x32x32xf32>
    %45 = tpu.matmul %42, %43, %cst_13 {dimension_numbers = #tpu.dot_dimension_numbers<[2], [2], [1], [1], [0, 0, 0, 1, 1, 1], [0], [0]>} : vector<6x32x8xf32>, vector<6x32x8xf32>, vector<6x32x32xf32> -> vector<6x32x32xf32>
    "tpu.trace_stop"() : () -> ()
    %cst_14 = arith.constant dense<0xFF800000> : vector<6x32xf32>
    %46 = vector.multi_reduction <maximumf>, %45, %cst_14 [2] : vector<6x32x32xf32> to vector<6x32xf32>
    %47 = vector.shape_cast %46 : vector<6x32xf32> to vector<6x32x1xf32>
    %48 = vector.broadcast %47 : vector<6x32x1xf32> to vector<6x32x32xf32>
    %49 = arith.subf %45, %48 : vector<6x32x32xf32>
    %50 = math.exp %49 : vector<6x32x32xf32>
    %cst_15 = arith.constant dense<0.000000e+00> : vector<6x32xf32>
    %51 = vector.multi_reduction <add>, %50, %cst_15 [2] : vector<6x32x32xf32> to vector<6x32xf32>
    %52 = vector.shape_cast %51 : vector<6x32xf32> to vector<6x32x1xf32>
    "tpu.trace_start"() <{level = 10 : i32, message = "gqk,gkd->gqd"}> : () -> ()
    %cst_16 = arith.constant dense<0.000000e+00> : vector<6x32x8xf32>
    %53 = tpu.matmul %50, %44, %cst_16 {dimension_numbers = #tpu.dot_dimension_numbers<[2], [1], [1], [2], [0, 0, 0, 1, 1, 2], [0], [0]>} : vector<6x32x32xf32>, vector<6x32x8xf32>, vector<6x32x8xf32> -> vector<6x32x8xf32>
    "tpu.trace_stop"() : () -> ()
    %54 = tpu.reciprocal %52 : vector<6x32x1xf32> -> vector<6x32x1xf32>
    %55 = vector.broadcast %54 : vector<6x32x1xf32> to vector<6x32x8xf32>
    %56 = arith.mulf %53, %55 : vector<6x32x8xf32>
    %57 = vector.extract_strided_slice %7 {offsets = [0, 0, 24], sizes = [6, 32, 8], strides = [1, 1, 1]} : vector<6x32x32xf32> to vector<6x32x8xf32>
    %58 = vector.extract_strided_slice %9 {offsets = [0, 0, 24], sizes = [6, 32, 8], strides = [1, 1, 1]} : vector<6x32x32xf32> to vector<6x32x8xf32>
    %59 = vector.extract_strided_slice %11 {offsets = [0, 0, 24], sizes = [6, 32, 8], strides = [1, 1, 1]} : vector<6x32x32xf32> to vector<6x32x8xf32>
    "tpu.trace_start"() <{level = 10 : i32, message = "gqd,gkd->gqk"}> : () -> ()
    %cst_17 = arith.constant dense<0.000000e+00> : vector<6x32x32xf32>
    %60 = tpu.matmul %57, %58, %cst_17 {dimension_numbers = #tpu.dot_dimension_numbers<[2], [2], [1], [1], [0, 0, 0, 1, 1, 1], [0], [0]>} : vector<6x32x8xf32>, vector<6x32x8xf32>, vector<6x32x32xf32> -> vector<6x32x32xf32>
    "tpu.trace_stop"() : () -> ()
    %cst_18 = arith.constant dense<0xFF800000> : vector<6x32xf32>
    %61 = vector.multi_reduction <maximumf>, %60, %cst_18 [2] : vector<6x32x32xf32> to vector<6x32xf32>
    %62 = vector.shape_cast %61 : vector<6x32xf32> to vector<6x32x1xf32>
    %63 = vector.broadcast %62 : vector<6x32x1xf32> to vector<6x32x32xf32>
    %64 = arith.subf %60, %63 : vector<6x32x32xf32>
    %65 = math.exp %64 : vector<6x32x32xf32>
    %cst_19 = arith.constant dense<0.000000e+00> : vector<6x32xf32>
    %66 = vector.multi_reduction <add>, %65, %cst_19 [2] : vector<6x32x32xf32> to vector<6x32xf32>
    %67 = vector.shape_cast %66 : vector<6x32xf32> to vector<6x32x1xf32>
    "tpu.trace_start"() <{level = 10 : i32, message = "gqk,gkd->gqd"}> : () -> ()
    %cst_20 = arith.constant dense<0.000000e+00> : vector<6x32x8xf32>
    %68 = tpu.matmul %65, %59, %cst_20 {dimension_numbers = #tpu.dot_dimension_numbers<[2], [1], [1], [2], [0, 0, 0, 1, 1, 2], [0], [0]>} : vector<6x32x32xf32>, vector<6x32x8xf32>, vector<6x32x8xf32> -> vector<6x32x8xf32>
    "tpu.trace_stop"() : () -> ()
    %69 = tpu.reciprocal %67 : vector<6x32x1xf32> -> vector<6x32x1xf32>
    %70 = vector.broadcast %69 : vector<6x32x1xf32> to vector<6x32x8xf32>
    %71 = arith.mulf %68, %70 : vector<6x32x8xf32>
    %72 = tpu.concatenate %26, %41, %56, %71 in 2 : vector<6x32x8xf32>, vector<6x32x8xf32>, vector<6x32x8xf32>, vector<6x32x8xf32> -> vector<6x32x32xf32>
    %73 = vector.shape_cast %72 : vector<6x32x32xf32> to vector<192x32xf32>
    %c0_21 = arith.constant 0 : index
    %c0_22 = arith.constant 0 : index
    %74 = vector.load %arg3[%c0_21, %c0_22] : memref<32x32xf32, #tpu.memory_space<vmem>>, vector<32x32xf32>
    %cst_23 = arith.constant dense<0.000000e+00> : vector<192x32xf32>
    %75 = tpu.matmul %73, %74, %cst_23 {dimension_numbers = #tpu.dot_dimension_numbers<[1], [0], [0], [1], [0, 0, 1, 1], [], []>} : vector<192x32xf32>, vector<32x32xf32>, vector<192x32xf32> -> vector<192x32xf32>
    %c0_24 = arith.constant 0 : index
    %c0_25 = arith.constant 0 : index
    %76 = vector.load %arg4[%c0_24, %c0_25] : memref<1x32xf32, #tpu.memory_space<vmem>>, vector<1x32xf32>
    %77 = vector.broadcast %76 : vector<1x32xf32> to vector<192x32xf32>
    %78 = arith.addf %75, %77 : vector<192x32xf32>
    %79 = vector.shape_cast %78 : vector<192x32xf32> to vector<6x32x32xf32>
    %c0_26 = arith.constant 0 : index
    %c0_27 = arith.constant 0 : index
    %c0_28 = arith.constant 0 : index
    %80 = vector.load %arg5[%c0_26, %c0_27, %c0_28] : memref<6x32x32xf32, #tpu.memory_space<vmem>>, vector<6x32x32xf32>
    tpu.vector_store %arg5[%c0_26, %c0_27, %c0_28], %79 {strides = array<i32>} : memref<6x32x32xf32, #tpu.memory_space<vmem>>, vector<6x32x32xf32>,
    return
  }
  func.func @transform_0(%arg0: i32) -> (i32, i32, i32) {
    %c0_i32 = arith.constant 0 : i32
    %c0_i32_0 = arith.constant 0 : i32
    %c0_i32_1 = arith.constant 0 : i32
    return %arg0, %c0_i32, %c0_i32_0 : i32, i32, i32
  }
  func.func @transform_1(%arg0: i32) -> (i32, i32) {
    %c0_i32 = arith.constant 0 : i32
    %c0_i32_0 = arith.constant 0 : i32
    %c0_i32_1 = arith.constant 0 : i32
    return %c0_i32, %c0_i32_0 : i32, i32
  }
  func.func @transform_2(%arg0: i32) -> (i32, i32) {
    %c0_i32 = arith.constant 0 : i32
    %c0_i32_0 = arith.constant 0 : i32
    %c0_i32_1 = arith.constant 0 : i32
    return %c0_i32, %c0_i32_0 : i32, i32
  }
  func.func @transform_3(%arg0: i32) -> (i32, i32) {
    %c0_i32 = arith.constant 0 : i32
    %c0_i32_0 = arith.constant 0 : i32
    %c0_i32_1 = arith.constant 0 : i32
    return %c0_i32, %c0_i32_0 : i32, i32
  }
  func.func @transform_4(%arg0: i32) -> (i32, i32, i32) {
    %c0_i32 = arith.constant 0 : i32
    %c0_i32_0 = arith.constant 0 : i32
    %c0_i32_1 = arith.constant 0 : i32
    return %arg0, %c0_i32, %c0_i32_0 : i32, i32, i32
  }
}

</mosaic_0001>

<bundles_post_ra>
// kernel: tpu_custom_call.1
= control target key start
LH: loop header
LB: loop body
LE: loop exit
PB: predicated region body
PF: predicated region fallthrough
CT: control target
= control target key end

     0   :  { %9 = vsyncpa [#allocation3], 0  ;;  %s14176_s0 = inlined_call_operand.hbm [shape: f32[12,32,32], index: 0, kind: input, shape index: {}]   ;;  %s14177_s1 = inlined_call_operand.hbm [shape: f32[32,96], index: 1, kind: input, shape index: {}]   ;;  %s14178_s2 = inlined_call_operand.hbm [shape: f32[32,32], index: 2, kind: input, shape index: {}]   ;;  %s14179_s3 = inlined_call_operand.vmem [shape: f32[1,32], index: 3, kind: input, shape index: {}]   ;;  %s14180_s4 = inlined_call_operand.hbm [shape: f32[12,32,32], index: 4, kind: output, shape index: {}]  }
   0x1   :  { %11 = vsyncpa [#allocation3 + $0x1], 0 }
   0x2   :  { %12 = vsyncpa [#allocation6], 0 }
   0x3   :  { %13 = vsyncpa [#allocation4], 0 }
   0x4   :  { %15 = vsyncpa [#allocation4 + $0x1], 0  ;;  %s11011_s15 = smov 0   ;;  %s11013_s16 = smov 0  }
   0x5   :  { %s11015_s17 = smov 0   ;;  %s11017_s18 = smov 0  }
   0x6 LB: > { %s11032_s19 = sadd.s32 4294967295, %s10963_s18   ;;  %s7800_s20 = sadd.s32 4294967294, %s10963_s18   ;;  %s10963_s18 = sphi %s11017_s18, %s14695_s18   ;;  %s10959_s17 = sphi %s11015_s17, %s14694_s17   ;;  %s10955_s16 = sphi %s11013_s16, %s14693_s16   ;;  %s10951_s15 = sphi %s11011_s15, %s14692_s15  }
   0x7   : > { %p41_p0 = scmp.ne.s32.totalorder %s10955_s16, %s10951_s15  ;;  %p14181_p1 = scmp.eq.s32.totalorder %s11032_s19, 0 }
   0x8   : > { %p134_p3 = scmp.eq.s32.totalorder %s7800_s20, 1  ;;  %p7801_p5 = scmp.ge.s32.totalorder %s10963_s18, 1 }
   0x9   : > { %p11041_p4 = por %p14181_p1, %p41_p0  ;;  %p141_p7 = scmp.lt.s32.totalorder %s10963_s18, 3 }
   0xa   : > { %p11046_p6 = por %p134_p3, %p41_p0  ;;  %s10965_s24 = smov [#allocation5]  }
   0xb   : > { %s14303_s21 = scalar_select %p11041_p4, 1, 0 }
   0xc   : > { %s14304_s22 = scalar_select %p11046_p6, 1, 0 }
   0xd   : > { %p11051_p8 = pnand %p7801_p5, %p141_p7  ;;  %s153_s25 = sshll.u32 %s10965_s24, 4  ;;  %s11055_s25 = int_to_ptr.vmem [resolvable:$true] %s153_s25 }
   0xe   : > { %s10966_s27 = smov [#allocation7]   ;;  %s10807_s5 = scalar_lea.hbm %s14177_s1, 512 }
   0xf   : > { %p9871_p9 = pneg %p11051_p8  ;;  %s166_s28 = sshll.u32 %s10966_s27, 4  ;;  %s11066_s28 = int_to_ptr.vmem [resolvable:$true] %s166_s28 }
  0x10   : > { %p10808_p12 = scmp.ne.s32.totalorder %s14177_s1, %s10807_s5  ;;  %p10814_p5 = scmp.lt.u32.totalorder %s10807_s5, %s14177_s1 }
  0x11   : > { %p11062_p11 = pnand %p9871_p9, %p14181_p1 }
  0x13   : > { %p10809_p13 = pneg %p11062_p11 }
  0x15   : > { %p10810_p0 = pnand %p10809_p13, %p10808_p12 }
  0x17   : > { %p10811_p3 = pneg %p10810_p0 }
  0x19   : > { %p10816_p7 = pnand %p10814_p5, %p10811_p3 }
  0x1b   : > { %10819 = shalt.err (!%p10816_p7)
}
  0x1c   : > { %s10820_s10 = scalar_lea.vmem %s11055_s25, 512  ;;  %p10828_p2 = scmp.lt.s32.totalorder %s11055_s25, %s11055_s25 }
  0x1d   : > { %p10821_p9 = scmp.ne.s32.totalorder %s11055_s25, %s10820_s10  ;;  %p10829_p12 = scmp.lt.s32.totalorder %s10820_s10, %s10820_s10 }
  0x1f   : > { %p10823_p10 = pnand %p10821_p9, %p10809_p13  ;;  %p10830_p0 = por %p10829_p12, %p10828_p2 }
  0x21   : > { %p10824_p1 = pneg %p10823_p10 }
  0x23   : > { %p10831_p6 = pnand %p10830_p0, %p10824_p1 }
  0x25   : > { %10834 = shalt.err (!%p10831_p6)
}
  0x26   : > { %s10967_s11 = smov 128   ;;  %s10968_s12 = smov 8  }
  0x27   : > { %9874 = dma.hbm_to_vmem [thread:$0]  (!%p11062_p11), %s14177_s1, 512, %s11055_s25, [#allocation6], %s10967_s11, %s10967_s11, %s10968_s12  }
  0x28   : > { %s10835_s27 = scalar_lea.hbm %s14178_s2, 512 }
  0x29   : > { %p10836_p1 = scmp.ne.s32.totalorder %s14178_s2, %s10835_s27  ;;  %p10842_p10 = scmp.lt.u32.totalorder %s10835_s27, %s14178_s2 }
  0x2b   : > { %p10838_p2 = pnand %p10836_p1, %p10809_p13 }
  0x2d   : > { %p10839_p6 = pneg %p10838_p2 }
  0x2f   : > { %p10844_p3 = pnand %p10842_p10, %p10839_p6 }
  0x31   : > { %10847 = shalt.err (!%p10844_p3)
}
  0x32   : > { %s10848_s25 = scalar_lea.vmem %s11066_s28, 512  ;;  %p10856_p12 = scmp.lt.s32.totalorder %s11066_s28, %s11066_s28 }
  0x33   : > { %p10849_p5 = scmp.ne.s32.totalorder %s11066_s28, %s10848_s25  ;;  %p10857_p0 = scmp.lt.s32.totalorder %s10848_s25, %s10848_s25 }
  0x35   : > { %p10851_p7 = pnand %p10849_p5, %p10809_p13  ;;  %p10858_p1 = por %p10857_p0, %p10856_p12 }
  0x37   : > { %p10852_p9 = pneg %p10851_p7 }
  0x39   : > { %p10859_p2 = pnand %p10858_p1, %p10852_p9 }
  0x3b   : > { %10862 = shalt.err (!%p10859_p2)
}
  0x3c   : > { %9877 = dma.hbm_to_vmem [thread:$0]  (!%p11062_p11), %s14178_s2, 512, %s11066_s28, [#allocation6], %s10967_s11, %s10967_s11, %s10968_s12  }
  0x3d   : > { %s11127_s26 = sadd.s32 1, %s10963_s18   ;;  %s28_s9 = sadd.s32 1, %s10959_s17 }
  0x3e   : > { %s25_s10 = ssub.s32 %s10963_s18, %s11127_s26  ;;  %p35_p13 = scmp.ne.s32.totalorder %s10959_s17, %s10955_s16 }
  0x3f   : > { %p26_p6 = scmp.eq.s32.totalorder %s25_s10, 0  ;;  %p36_p10 = scmp.eq.s32.totalorder %s10963_s18, 0 }
  0x40   : > { %p14307_p3 = scmp.eq.s32.totalorder %s11032_s19, 1  ;;  %p9888_p7 = scmp.lt.s32.totalorder %s10963_s18, 2 }
  0x41   : > { %s11143_s14 = scalar_select %p26_p6, %s10959_s17, %s28_s9  }
  0x42   : > { %p11137_p5 = por %p14307_p3, %p35_p13  ;;  %p37_p9 = por %p36_p10, %p35_p13 }
  0x43   : > { %s183_s20 = sand.u32 1, %s10959_s17   ;;  %s8155_s28 = smul.u32 3072, %s10963_s18 }
  0x44   : > { %s14308_s13 = scalar_select %p11137_p5, 1, 0 }
  0x45   : > { %s9857_s24 = smul.u32 192, %s183_s20  ;;  %p11147_p11 = pnand %p9888_p7, %p37_p9 }
  0x46   : > { %s11154_s5 = scalar_lea.hbm %s14176_s0, %s8155_s28  ;;  %s11158_s7 = scalar_lea.sflag [#allocation3], %s183_s20 }
  0x47   : > { %s187_s6 = scalar_lea.vmem [#allocation2], %s9857_s24  ;;  %s10863_s8 = scalar_lea.hbm %s11154_s5, 3072 }
  0x48   : > { %s195_s25 = sshll.u32 %s187_s6, 4  ;;  %p10864_p12 = scmp.ne.s32.totalorder %s11154_s5, %s10863_s8  ;;  %s11156_s25 = int_to_ptr.vmem [resolvable:$true] %s195_s25 }
  0x49   : > { %p10865_p0 = pneg %p11147_p11  ;;  %s10868_s28 = scalar_lea.hbm %s14176_s0, 6144 }
  0x4a   : > { %p10869_p13 = scmp.lt.u32.totalorder %s11154_s5, %s14176_s0  ;;  %p10870_p6 = scmp.lt.u32.totalorder %s10868_s28, %s10863_s8 }
  0x4b   : > { %p10866_p1 = pnand %p10865_p0, %p10864_p12  ;;  %p10872_p3 = scmp.lt.u32.totalorder %s10863_s8, %s11154_s5 }
  0x4c   : > { %p10871_p10 = por %p10870_p6, %p10869_p13 }
  0x4d   : > { %p10867_p2 = pneg %p10866_p1 }
  0x4e   : > { %p10873_p7 = por %p10872_p3, %p10871_p10 }
  0x50   : > { %p10874_p9 = pnand %p10873_p7, %p10867_p2 }
  0x52   : > { %10877 = shalt.err (!%p10874_p9)
}
  0x53   : > { %s10878_s20 = scalar_lea.vmem %s11156_s25, 3072  ;;  %s10969_s24 = smov [#allocation2]  }
  0x54   : > { %p10879_p12 = scmp.ne.s32.totalorder %s11156_s25, %s10878_s20  ;;  %s10883_s6 = sshll.u32 %s10969_s24, 4  ;;  %s10884_s6 = int_to_ptr.vmem [resolvable:$false] %s10883_s6 }
  0x55   : > { %s10885_s9 = scalar_lea.vmem %s10884_s6, 6144  ;;  %p10886_p4 = scmp.lt.s32.totalorder %s11156_s25, %s10884_s6 }
  0x56   : > { %p10881_p1 = pnand %p10879_p12, %p10865_p0  ;;  %p10887_p13 = scmp.lt.s32.totalorder %s10885_s9, %s10878_s20 }
  0x58   : > { %p10882_p5 = pneg %p10881_p1  ;;  %p10888_p6 = por %p10887_p13, %p10886_p4 }
  0x5a   : > { %p10889_p10 = pnand %p10888_p6, %p10882_p5 }
  0x5c   : > { %10892 = shalt.err (!%p10889_p10)
}
  0x5d   : > { %9881 = dma.hbm_to_vmem [thread:$0]  (!%p11147_p11), %s11154_s5, 3072, %s11156_s25, %s11158_s7, %s10967_s11, %s10967_s11, %s10968_s12  }
  0x5e   : > { %207 = sbr.rel (%p11051_p8) target bundleno = 2937 (0xb79), region = 36 }
  0x65   : > { %s11192_s8 = sand.u32 1, %s10955_s16   ;;  %p14310_p4 = scmp.ne.s32.totalorder %s14303_s21, 0 }
  0x66   : > { %s9858_s10 = smul.u32 192, %s11192_s8  ;;  %s210_s28 = scalar_lea.sflag [#allocation3], %s11192_s8 }
  0x68   : > { %s11198_s27 = scalar_lea.vmem [#allocation2], %s9858_s10 }
  0x69   : > { %10938 = dma.done.wait (%p14310_p4), %s210_s28, 3072  }
  0x6a   : > { %10940 = vsyncadd (%p14310_p4), %s210_s28, 4294964224  ;;  %p14311_p5 = scmp.eq.s32.totalorder %s11032_s19, 0 }
  0x6c   : > { %10942 = dma.done.wait (%p14311_p5), [#allocation6], 1024   ;;  %p14312_p8 = pmov %p14311_p5 }
  0x6d   : > { %vm276_vm0 = vcmask 261120   ;;  %v272_v0 = vld [vmem:[#allocation5] sm:$0xff]  ;;  %v273_v1 = vld [vmem:[#allocation5 + $0x8] sm:$0xff]  ;;  %v274_v2 = vld [vmem:[#allocation5 + $0x10] sm:$0xff]  ;;  %vm570_vm1 = vcmask 64512   ;;  %s10970_s21 = smov 96  }
  0x6e   : > { %10944 = vsyncadd (%p14312_p8), [#allocation6], 4294966272  ;;  %v9357_v3 = vpack.c.bf16 %v273_v1, %v272_v0  ;;  %v275_v4 = vld [vmem:[#allocation5 + $0x18] sm:$0xff]  ;;  %v248_v5 = vld [vmem:[%s11198_s27] sm:$0xff]  ;;  %s10971_s23 = smov 64   ;;  %s10972_s11 = smov 88  }
  0x6f   : > { %v9361_v6 = vpack.c.bf16 %v275_v4, %v274_v2  ;;  %8605 = vmatprep.mubr.msk.f32.mxu0 %vm276_vm0, %v248_v5  ;;  %v249_v7 = vld [vmem:[%s11198_s27 + $0x8] sm:$0xff]  ;;  %v250_v8 = vld [vmem:[%s11198_s27 + $0x10] sm:$0xff]  ;;  %v251_v9 = vld [vmem:[%s11198_s27 + $0x18] sm:$0xff]  ;;  %s10973_s12 = smov 120   ;;  %s10974_s5 = smov 56   ;;  %vm7351_vm3 = vcmask 130048  }
  0x70   : > { %9358 = vmatprep.subr.bf16.mxu0 %v9357_v3  ;;  %v252_v10 = vld [vmem:[%s11198_s27 + $0x20] sm:$0xff]  ;;  %v253_v11 = vld [vmem:[%s11198_s27 + $0x28] sm:$0xff]  ;;  %v254_v12 = vld [vmem:[%s11198_s27 + $0x30] sm:$0xff]  ;;  %s10975_s25 = smov 80   ;;  %s10976_s7 = smov 112   ;;  %vm7376_vm4 = vcmask 195584  }
  0x71   : > { %9360 = vmatpush3.bf16.msra.mxu0 %v9357_v3  ;;  %v255_v13 = vld [vmem:[%s11198_s27 + $0x38] sm:$0xff]  ;;  %v256_v14 = vld [vmem:[%s11198_s27 + $0x40] sm:$0xff]  ;;  %v257_v15 = vld [vmem:[%s11198_s27 + $0x48] sm:$0xff]  ;;  %s10977_s29 = smov 48   ;;  %s10978_s30 = smov 72  }
  0x72   : > { %9362 = vmatprep.subr.bf16.mxu0 %v9361_v6  ;;  %v258_v16 = vld [vmem:[%s11198_s27 + $0x50] sm:$0xff]  ;;  %v259_v17 = vld [vmem:[%s11198_s27 + $0x58] sm:$0xff]  ;;  %v260_v18 = vld [vmem:[%s11198_s27 + $0x60] sm:$0xff]  ;;  %s10979_s20 = smov 104   ;;  %s10980_s24 = smov 40  }
  0x73   : > { %v261_v19 = vld [vmem:[%s11198_s27 + $0x68] sm:$0xff]  ;;  %v262_v20 = vld [vmem:[%s11198_s27 + $0x70] sm:$0xff]  ;;  %v263_v21 = vld [vmem:[%s11198_s27 + $0x78] sm:$0xff]  ;;  %s10981_s6 = smov 8   ;;  %s10982_s9 = smov 16  }
  0x74   : > { %v264_v22 = vld [vmem:[%s11198_s27 + $0x80] sm:$0xff]  ;;  %v265_v23 = vld [vmem:[%s11198_s27 + $0x88] sm:$0xff]  ;;  %v266_v24 = vld [vmem:[%s11198_s27 + $0x90] sm:$0xff]  ;;  %s10983_s28 = smov 24   ;;  %p14689_p0 = scmp.ne.s32.totalorder %s14308_s13, 0 }
  0x75   : > { %9364 = vmatpush3.bf16.msra.mxu0 %v9361_v6  ;;  %v267_v25 = vld [vmem:[%s11198_s27 + $0x98] sm:$0xff]  ;;  %v268_v26 = vld [vmem:[%s11198_s27 + $0xa0] sm:$0xff]  ;;  %v269_v27 = vld [vmem:[%s11198_s27 + $0xa8] sm:$0xff] }
  0x76   : > { %v270_v28 = vld [vmem:[%s11198_s27 + $0xb0] sm:$0xff]  ;;  %v271_v29 = vld [vmem:[%s11198_s27 + $0xb8] sm:$0xff]  ;;  %vm11411_vm2 = vmpackc.low %vm570_vm1, %vm570_vm1 }
  0x78   : > { %8606 = vmatmul.mubr.msk.f32.vlgmr.msra.gmra.mrb[0].mxu0 %vm276_vm0, %v249_v7 }
  0x79   : > { %8608 = vmatprep.mubr.msk.f32.mxu0 %vm276_vm0, %v250_v8  ;;  %v14319_v8 = vmov 0 }
  0x7a   : > { %v14320_v8 = vsel %vm11411_vm2, 4294967295, %v14319_v8 }
  0x7b   : > { %14321 = vst [vmem:[#allocation18_spill] sm:$0xff] %v14320_v8 }
  0x7c   : > { %8609 = vmatmul.mubr.msk.f32.gmra.mrb[2].mxu0 %vm276_vm0, %v251_v9 }
  0x7d   : > { %8611 = vmatprep.mubr.msk.f32.mxu0 %vm276_vm0, %v252_v10 }
  0x80   : > { %8612 = vmatmul.mubr.msk.f32.gmra.mrb[4].mxu0 %vm276_vm0, %v253_v11 }
  0x81   : > { %8614 = vmatprep.mubr.msk.f32.mxu0 %vm276_vm0, %v254_v12 }
  0x84   : > { %8615 = vmatmul.mubr.msk.f32.gmra.mrb[6].mxu0 %vm276_vm0, %v255_v13 }
  0x85   : > { %8617 = vmatprep.mubr.msk.f32.mxu0 %vm276_vm0, %v256_v14 }
  0x88   : > { %8618 = vmatmul.mubr.msk.f32.gmra.mrb[8].mxu0 %vm276_vm0, %v257_v15 }
  0x89   : > { %8620 = vmatprep.mubr.msk.f32.mxu0 %vm276_vm0, %v258_v16 }
  0x8c   : > { %8621 = vmatmul.mubr.msk.f32.gmra.mrb[10].mxu0 %vm276_vm0, %v259_v17 }
  0x8d   : > { %8623 = vmatprep.mubr.msk.f32.mxu0 %vm276_vm0, %v260_v18 }
  0x90   : > { %8624 = vmatmul.mubr.msk.f32.gmra.mrb[12].mxu0 %vm276_vm0, %v261_v19 }
  0x91   : > { %8626 = vmatprep.mubr.msk.f32.mxu0 %vm276_vm0, %v262_v20 }
  0x94   : > { %8627 = vmatmul.mubr.msk.f32.gmra.mrb[14].mxu0 %vm276_vm0, %v263_v21 }
  0x95   : > { %8629 = vmatprep.mubr.msk.f32.mxu0 %vm276_vm0, %v264_v22 }
  0x98   : > { %8630 = vmatmul.mubr.msk.f32.gmra.mrb[16].mxu0 %vm276_vm0, %v265_v23 }
  0x99   : > { %8632 = vmatprep.mubr.msk.f32.mxu0 %vm276_vm0, %v266_v24 }
  0x9c   : > { %8633 = vmatmul.mubr.msk.f32.gmra.mrb[18].mxu0 %vm276_vm0, %v267_v25 }
  0x9d   : > { %8635 = vmatprep.mubr.msk.f32.mxu0 %vm276_vm0, %v268_v26 }
  0xa0   : > { %8636 = vmatmul.mubr.msk.f32.gmra.mrb[20].mxu0 %vm276_vm0, %v269_v27 }
  0xa1   : > { %8638 = vmatprep.mubr.msk.f32.mxu0 %vm276_vm0, %v270_v28 }
  0xa4   : > { %8639 = vmatmul.mubr.msk.f32.gmra.mrb[22].mxu0 %vm276_vm0, %v271_v29 }
 0x14b   : > { %v11256_v30 = vpop.f32.mrb[0].mxu0 }
 0x14c   : > { %v415_v31 = vpop.f32.mrb[1].mxu0  ;;  %v11392_v4 = vmul.f32 0.35355338, %v11256_v30 }
 0x14d   : > { %v11259_v32 = vpack.i.bf16 %v11256_v30, %v415_v31  ;;  %v11261_v33 = vmul.f32 0.35355338, %v415_v31 }
 0x14e   : > { %14318 = vst [vmem:[#allocation17_spill] sm:$0xff] %v11392_v4 }
 0x14f   : > { %14313 = vst [vmem:[#allocation12_spill] sm:$0xff] %v11261_v33  ;;  %9944 = vrot.lane.b32.xlu0 %v11259_v32, %s10970_s21  ;;  %v11265_v34 = vpop.f32.mrb[2].mxu0  ;;  %8649 = vmatprep.mubr.msk.f32.mxu1 %vm570_vm1, %v11261_v33 }
 0x150   : > { %v11269_v35 = vpop.f32.mrb[3].mxu0  ;;  %v11437_v24 = vmul.f32 0.35355338, %v11265_v34 }
 0x151   : > { %v11273_v36 = vpack.i.bf16 %v11265_v34, %v11269_v35  ;;  %v11426_v22 = vmul.f32 0.35355338, %v11269_v35 }
 0x152   : > { %14323 = vst [vmem:[#allocation20_spill] sm:$0xff] %v11437_v24 }
 0x153   : > { %9949 = vrot.lane.b32.xlu0 %v11273_v36, %s10970_s21  ;;  %v11277_v37 = vpop.f32.mrb[4].mxu0  ;;  %14322 = vst [vmem:[#allocation19_spill] sm:$0xff] %v11426_v22 }
 0x154   : > { %v11279_v38 = vpop.f32.mrb[5].mxu0 }
 0x155   : > { %v11283_v39 = vpack.i.bf16 %v11277_v37, %v11279_v38  ;;  %v11440_v27 = vmul.f32 0.35355338, %v11279_v38 }
 0x157   : > { %9954 = vrot.lane.b32.xlu1 %v11283_v39, %s10970_s21  ;;  %v11287_v40 = vpop.f32.mrb[6].mxu0  ;;  %14324 = vst [vmem:[#allocation21_spill] sm:$0xff] %v11440_v27 }
 0x158   : > { %v11289_v41 = vpop.f32.mrb[7].mxu0 }
 0x159   : > { %v11293_v42 = vpack.i.bf16 %v11287_v40, %v11289_v41 }
 0x15b   : > { %9959 = vrot.lane.b32.xlu1 %v11293_v42, %s10970_s21  ;;  %v11297_v43 = vpop.f32.mrb[8].mxu0 }
 0x15c   : > { %v11299_v44 = vpop.f32.mrb[9].mxu0 }
 0x15d   : > { %v11303_v45 = vpack.i.bf16 %v11297_v43, %v11299_v44 }
 0x15f   : > { %14314 = vst [vmem:[#allocation13_spill] sm:$0xff] %v11303_v45  ;;  %9964 = vrot.lane.b32.xlu0 %v11303_v45, %s10970_s21  ;;  %v11307_v46 = vpop.f32.mrb[10].mxu0 }
 0x160   : > { %v11309_v47 = vpop.f32.mrb[11].mxu0 }
 0x161   : > { %v11313_v48 = vpack.i.bf16 %v11307_v46, %v11309_v47 }
 0x163   : > { %14315 = vst [vmem:[#allocation14_spill] sm:$0xff] %v11313_v48  ;;  %9969 = vrot.lane.b32.xlu1 %v11313_v48, %s10970_s21  ;;  %v11317_v49 = vpop.f32.mrb[12].mxu0 }
 0x164   : > { %v475_v50 = vpop.f32.mrb[13].mxu0 }
 0x165   : > { %v11320_v51 = vpack.i.bf16 %v11317_v49, %v475_v50  ;;  %v11322_v52 = vmul.f32 0.35355338, %v475_v50 }
 0x167   : > { %14316 = vst [vmem:[#allocation15_spill] sm:$0xff] %v11322_v52  ;;  %9974 = vrot.lane.b32.xlu0 %v11320_v51, %s10970_s21  ;;  %8691 = vmatprep.mubr.msk.f32.mxu0 %vm570_vm1, %v11322_v52  ;;  %v11328_v53 = vpop.f32.mrb[14].mxu0 }
 0x168   : > { %v11330_v54 = vpop.f32.mrb[15].mxu0 }
 0x169   : > { %v11334_v55 = vpack.i.bf16 %v11328_v53, %v11330_v54 }
 0x16b   : > { %9979 = vrot.lane.b32.xlu1 %v11334_v55, %s10970_s21  ;;  %v11338_v56 = vpop.f32.mrb[16].mxu0 }
 0x16c   : > { %v11340_v57 = vpop.f32.mrb[17].mxu0 }
 0x16d   : > { %v11344_v58 = vpack.i.bf16 %v11338_v56, %v11340_v57 }
 0x16f   : > { %v11346_v59 = vpop.f32.mrb[18].mxu0  ;;  %9984 = vrot.lane.b32.xlu0 %v11344_v58, %s10970_s21 }
 0x170   : > { %v11350_v60 = vpop.f32.mrb[19].mxu0 }
 0x171   : > { %v11354_v61 = vpack.i.bf16 %v11346_v59, %v11350_v60 }
 0x173   : > { %14317 = vst [vmem:[#allocation16_spill] sm:$0xff] %v11354_v61  ;;  %v11356_v62 = vpop.f32.mrb[20].mxu0  ;;  %9989 = vrot.lane.b32.xlu1 %v11354_v61, %s10970_s21 }
 0x174   : > { %v11360_v63 = vpop.f32.mrb[21].mxu0 }
 0x175   : > { %v11364_v0 = vpack.i.bf16 %v11356_v62, %v11360_v63 }
 0x177   : > { %9994 = vrot.lane.b32.xlu0 %v11364_v0, %s10970_s21  ;;  %v11368_v1 = vpop.f32.mrb[22].mxu0 }
 0x178   : > { %v11370_v2 = vpop.f32.mrb[23].mxu0 }
 0x179   : > { %v11374_v3 = vpack.i.bf16 %v11368_v1, %v11370_v2 }
 0x17b   : > { %10009 = vrot.lane.b32.xlu0 %v11273_v36, %s10971_s23  ;;  %9999 = vrot.lane.b32.xlu1 %v11374_v3, %s10970_s21 }
 0x17f   : > { %10019 = vrot.lane.b32.xlu0 %v11303_v45, %s10971_s23  ;;  %10004 = vrot.lane.b32.xlu1 %v11259_v32, %s10971_s23 }
 0x183   : > { %10029 = vrot.lane.b32.xlu0 %v11313_v48, %s10971_s23  ;;  %10014 = vrot.lane.b32.xlu1 %v11283_v39, %s10971_s23 }
 0x187   : > { %10039 = vrot.lane.b32.xlu0 %v11344_v58, %s10971_s23  ;;  %10024 = vrot.lane.b32.xlu1 %v11293_v42, %s10971_s23 }
 0x18b   : > { %10069 = vrot.lane.b32.xlu0 %v11283_v39, %s10972_s11  ;;  %10034 = vrot.lane.b32.xlu1 %v11320_v51, %s10971_s23 }
 0x18f   : > { %10079 = vrot.lane.b32.xlu0 %v11303_v45, %s10972_s11  ;;  %10044 = vrot.lane.b32.xlu1 %v11334_v55, %s10971_s23 }
 0x193   : > { %2181 = vrot.lane.b32.xlu0 %v11392_v4, %s10973_s12  ;;  %10049 = vrot.lane.b32.xlu1 %v11354_v61, %s10971_s23 }
 0x197   : > { %10054 = vrot.lane.b32.xlu1 %v11364_v0, %s10971_s23  ;;  %10089 = vrot.lane.b32.xlu0 %v11374_v3, %s10971_s23  ;;  %s14052_s23 = scalar_lea.vmem [#allocation8], %s9858_s10  ;;  %s8156_s10 = smul.u32 3072, %s11032_s19 }
 0x198   : > { %s7694_s19 = scalar_lea.sflag [#allocation4], %s11192_s8 }
 0x19b   : > { %10059 = vrot.lane.b32.xlu1 %v11259_v32, %s10972_s11 }
 0x19f   : > { %10064 = vrot.lane.b32.xlu1 %v11273_v36, %s10972_s11 }
 0x1a3   : > { %10074 = vrot.lane.b32.xlu1 %v11293_v42, %s10972_s11 }
 0x1a7   : > { %2179 = vrot.lane.b32.xlu1 %v11261_v33, %s10973_s12 }
 0x1ab   : > { %10084 = vrot.lane.b32.xlu1 %v11313_v48, %s10972_s11 }
 0x1c1   : > { %v9945_v5 = vpop.permute.xlu0 %9944 }
 0x1c2   : > { %v9947_v6 = vunpack.i.h.bf16 %v9945_v5  ;;  %v9946_v7 = vunpack.i.l.bf16 %v9945_v5 }
 0x1c4   : > { %v9365_v9 = vpack.c.bf16 %v9947_v6, %v9946_v7 }
 0x1c5   : > { %v9950_v10 = vpop.permute.xlu0 %9949 }
 0x1c6   : > { %v9952_v11 = vunpack.i.h.bf16 %v9950_v10  ;;  %v9951_v12 = vunpack.i.l.bf16 %v9950_v10  ;;  %9367 = vmatprep.subr.msk.bf16.mxu1 %vm11411_vm2, %v9365_v9 }
 0x1c7   : > { %9370 = vmatpush3.bf16.xpose.msk.msra.mxu1 %vm11411_vm2, %v9365_v9 }
 0x1c8   : > { %v9371_v13 = vpack.c.bf16 %v9952_v11, %v9951_v12  ;;  %v11457_v11 = vmul.f32 0.35355338, %v11277_v37  ;;  %v11460_v12 = vmul.f32 0.35355338, %v11289_v41  ;;  %v11473_v37 = vmul.f32 0.35355338, %v11287_v40 }
 0x1c9   : > { %v9955_v14 = vpop.permute.xlu1 %9954 }
 0x1ca   : > { %v9957_v15 = vunpack.i.h.bf16 %v9955_v14  ;;  %v9956_v16 = vunpack.i.l.bf16 %v9955_v14  ;;  %9373 = vmatprep.subr.msk.bf16.mxu1 %vm11411_vm2, %v9371_v13  ;;  %14325 = vst [vmem:[#allocation22_spill] sm:$0xff] %v11457_v11  ;;  %14326 = vst [vmem:[#allocation23_spill] sm:$0xff] %v11460_v12 }
 0x1cc   : > { %v9377_v17 = vpack.c.bf16 %v9957_v15, %v9956_v16  ;;  %v11476_v15 = vmul.f32 0.35355338, %v11299_v44  ;;  %v11488_v44 = vmul.f32 0.35355338, %v11330_v54 }
 0x1cd   : > { %v9960_v18 = vpop.permute.xlu1 %9959 }
 0x1ce   : > { %v9962_v19 = vunpack.i.h.bf16 %v9960_v18  ;;  %v9961_v20 = vunpack.i.l.bf16 %v9960_v18  ;;  %14327 = vst [vmem:[#allocation24_spill] sm:$0xff] %v11476_v15 }
 0x1cf   : > { %9376 = vmatpush3.bf16.xpose.msk.msra.mxu1 %vm11411_vm2, %v9371_v13 }
 0x1d0   : > { %9379 = vmatprep.subr.msk.bf16.mxu1 %vm11411_vm2, %v9377_v17  ;;  %v9383_v23 = vpack.c.bf16 %v9962_v19, %v9961_v20 }
 0x1d1   : > { %v9965_v21 = vpop.permute.xlu0 %9964 }
 0x1d2   : > { %v9967_v28 = vunpack.i.h.bf16 %v9965_v21  ;;  %v9966_v29 = vunpack.i.l.bf16 %v9965_v21 }
 0x1d4   : > { %v9389_v5 = vpack.c.bf16 %v9967_v28, %v9966_v29  ;;  %v11499_v29 = vmul.f32 0.35355338, %v11328_v53  ;;  %v11513_v53 = vmul.f32 0.35355338, %v11297_v43  ;;  %v11527_v43 = vmul.f32 0.35355338, %v11307_v46 }
 0x1d5   : > { %v9970_v25 = vpop.permute.xlu1 %9969 }
 0x1d6   : > { %8650 = vmatmul.mubr.msk.f32.vlgmr.msra.gmra.mrb[0].mxu1 %vm570_vm1, %v11392_v4  ;;  %v9972_v7 = vunpack.i.h.bf16 %v9970_v25  ;;  %v9971_v9 = vunpack.i.l.bf16 %v9970_v25  ;;  %14328 = vst [vmem:[#allocation25_spill] sm:$0xff] %v11499_v29  ;;  %14329 = vst [vmem:[#allocation26_spill] sm:$0xff] %v11513_v53 }
 0x1d7   : > { %8652 = vmatprep.mubr.msk.f32.mxu1 %vm570_vm1, %v11426_v22  ;;  %9382 = vmatpush3.bf16.xpose.msk.msra.mxu1 %vm11411_vm2, %v9377_v17 }
 0x1d8   : > { %9385 = vmatprep.subr.msk.bf16.mxu1 %vm11411_vm2, %v9383_v23  ;;  %v9395_v13 = vpack.c.bf16 %v9972_v7, %v9971_v9 }
 0x1d9   : > { %v9975_v26 = vpop.permute.xlu0 %9974 }
 0x1da   : > { %v9977_v30 = vunpack.i.h.bf16 %v9975_v26  ;;  %v9976_v31 = vunpack.i.l.bf16 %v9975_v26  ;;  %8653 = vmatmul.mubr.msk.f32.gmra.mrb[2].mxu1 %vm570_vm1, %v11437_v24 }
 0x1db   : > { %8663 = vmatprep.mubr.msk.f32.mxu1 %vm570_vm1, %v11440_v27 }
 0x1dc   : > { %v9401_v35 = vpack.c.bf16 %v9977_v30, %v9976_v31  ;;  %v11504_v31 = vmul.f32 0.35355338, %v11360_v63 }
 0x1dd   : > { %v9980_v50 = vpop.permute.xlu1 %9979 }
 0x1de   : > { %9403 = vmatprep.subr.msk.bf16.mxu0 %vm11411_vm2, %v9401_v35  ;;  %v9982_v34 = vunpack.i.h.bf16 %v9980_v50  ;;  %v9981_v6 = vunpack.i.l.bf16 %v9980_v50  ;;  %v11516_v50 = vmul.f32 0.35355338, %v11309_v47 }
 0x1df   : > { %9388 = vmatpush3.bf16.xpose.msk.msra.mxu1 %vm11411_vm2, %v9383_v23  ;;  %9406 = vmatpush3.bf16.xpose.msk.msra.mxu0 %vm11411_vm2, %v9401_v35  ;;  %v11483_v23 = vmul.f32 0.35355338, %v11317_v49 }
 0x1e0   : > { %9391 = vmatprep.subr.msk.bf16.mxu1 %vm11411_vm2, %v9389_v5  ;;  %v9407_v38 = vpack.c.bf16 %v9982_v34, %v9981_v6  ;;  %14330 = vst [vmem:[#allocation27_spill] sm:$0xff] %v11516_v50 }
 0x1e1   : > { %v9985_v10 = vpop.permute.xlu0 %9984 }
 0x1e2   : > { %9409 = vmatprep.subr.msk.bf16.mxu0 %vm11411_vm2, %v9407_v38  ;;  %v9987_v18 = vunpack.i.h.bf16 %v9985_v10  ;;  %v9986_v19 = vunpack.i.l.bf16 %v9985_v10 }
 0x1e4   : > { %v9413_v26 = vpack.c.bf16 %v9987_v18, %v9986_v19 }
 0x1e5   : > { %v9990_v14 = vpop.permute.xlu1 %9989 }
 0x1e6   : > { %8664 = vmatmul.mubr.msk.f32.vlgmr.msra.gmra.mrb[4].mxu1 %vm570_vm1, %v11457_v11  ;;  %v9992_v54 = vunpack.i.h.bf16 %v9990_v14  ;;  %v9991_v30 = vunpack.i.l.bf16 %v9990_v14 }
 0x1e7   : > { %8666 = vmatprep.mubr.msk.f32.mxu1 %vm570_vm1, %v11460_v12  ;;  %9394 = vmatpush3.bf16.xpose.msk.msra.mxu1 %vm11411_vm2, %v9389_v5 }
 0x1e8   : > { %9412 = vmatpush3.bf16.xpose.msk.msra.mxu0 %vm11411_vm2, %v9407_v38  ;;  %9397 = vmatprep.subr.msk.bf16.mxu1 %vm11411_vm2, %v9395_v13  ;;  %v9419_v5 = vpack.c.bf16 %v9992_v54, %v9991_v30  ;;  %v11532_v38 = vmul.f32 0.35355338, %v11340_v57  ;;  %v11569_v54 = vmul.f32 0.35355338, %v11346_v59 }
 0x1e9   : > { %v9995_v41 = vpop.permute.xlu0 %9994 }
 0x1ea   : > { %v9997_v16 = vunpack.i.h.bf16 %v9995_v41  ;;  %v9996_v17 = vunpack.i.l.bf16 %v9995_v41  ;;  %8667 = vmatmul.mubr.msk.f32.gmra.mrb[6].mxu1 %vm570_vm1, %v11473_v37  ;;  %v11539_v41 = vmul.f32 0.35355338, %v11356_v62  ;;  %v11551_v62 = vmul.f32 0.35355338, %v11368_v1 }
 0x1eb   : > { %8677 = vmatprep.mubr.msk.f32.mxu1 %vm570_vm1, %v11476_v15 }
 0x1ec   : > { %v9425_v20 = vpack.c.bf16 %v9997_v16, %v9996_v17  ;;  %v11542_v16 = vmul.f32 0.35355338, %v11370_v2 }
 0x1ed   : > { %v10000_v21 = vpop.permute.xlu1 %9999  ;;  %v10010_v46 = vpop.permute.xlu0 %10009 }
 0x1ee   : > { %v10002_v40 = vunpack.i.h.bf16 %v10000_v21  ;;  %v10001_v25 = vunpack.i.l.bf16 %v10000_v21  ;;  %9427 = vmatprep.subr.msk.bf16.mxu0 %vm11411_vm2, %v9425_v20  ;;  %v10012_v2 = vunpack.i.h.bf16 %v10010_v46 }
 0x1ef   : > { %8692 = vmatmul.mubr.msk.f32.vlgmr.msra.gmra.mrb[24].mxu0 %vm570_vm1, %v11483_v23  ;;  %9400 = vmatpush3.bf16.xpose.msk.msra.mxu1 %vm11411_vm2, %v9395_v13 }
 0x1f0   : > { %v9431_v28 = vpack.c.bf16 %v10002_v40, %v10001_v25  ;;  %8694 = vmatprep.mubr.msk.f32.mxu0 %vm570_vm1, %v11488_v44  ;;  %9430 = vmatpush3.bf16.xpose.msk.msra.mxu0 %vm11411_vm2, %v9425_v20  ;;  %v10011_v20 = vunpack.i.l.bf16 %v10010_v46  ;;  %v11558_v25 = vmul.f32 0.35355338, %v11338_v56 }
 0x1f1   : > { %v10005_v49 = vpop.permute.xlu1 %10004  ;;  %9415 = vmatprep.subr.msk.bf16.mxu1 %vm11411_vm2, %v9413_v26  ;;  %v10020_v21 = vpop.permute.xlu0 %10019 }
 0x1f2   : > { %9433 = vmatprep.subr.msk.bf16.mxu0 %vm11411_vm2, %v9431_v28  ;;  %v10007_v7 = vunpack.i.h.bf16 %v10005_v49  ;;  %v10006_v9 = vunpack.i.l.bf16 %v10005_v49  ;;  %14331 = vst [vmem:[#allocation28_spill] sm:$0xff] %v11558_v25  ;;  %v10021_v1 = vunpack.i.l.bf16 %v10020_v21  ;;  %v9441_v49 = vpack.c.bf16 %v10012_v2, %v10011_v20 }
 0x1f3   : > { %8695 = vmatmul.mubr.msk.f32.gmra.mrb[26].mxu0 %vm570_vm1, %v11499_v29 }
 0x1f4   : > { %8719 = vmatprep.mubr.msk.f32.mxu0 %vm570_vm1, %v11504_v31  ;;  %v9437_v18 = vpack.c.bf16 %v10007_v7, %v10006_v9 }
 0x1f5   : > { %v10015_v35 = vpop.permute.xlu1 %10014 }
 0x1f6   : > { %v10017_v34 = vunpack.i.h.bf16 %v10015_v35  ;;  %v10016_v63 = vunpack.i.l.bf16 %v10015_v35  ;;  %8678 = vmatmul.mubr.msk.f32.vlgmr.msra.gmra.mrb[8].mxu1 %vm570_vm1, %v11513_v53 }
 0x1f7   : > { %8680 = vmatprep.mubr.msk.f32.mxu1 %vm570_vm1, %v11516_v50  ;;  %9418 = vmatpush3.bf16.xpose.msk.msra.mxu1 %vm11411_vm2, %v9413_v26  ;;  %v11562_v26 = vmul.f32 0.35355338, %v11350_v60 }
 0x1f8   : > { %9436 = vmatpush3.bf16.xpose.msk.msra.mxu0 %vm11411_vm2, %v9431_v28  ;;  %v9445_v47 = vpack.c.bf16 %v10017_v34, %v10016_v63  ;;  %9421 = vmatprep.subr.msk.bf16.mxu1 %vm11411_vm2, %v9419_v5  ;;  %v10022_v28 = vunpack.i.h.bf16 %v10020_v21 }
 0x1f9   : > { %v10025_v6 = vpop.permute.xlu1 %10024 }
 0x1fa   : > { %8681 = vmatmul.mubr.msk.f32.gmra.mrb[10].mxu1 %vm570_vm1, %v11527_v43  ;;  %9446 = vmatprep.subr.bf16.mxu0 %v9445_v47  ;;  %v10027_v10 = vunpack.i.h.bf16 %v10025_v6  ;;  %v10026_v13 = vunpack.i.l.bf16 %v10025_v6  ;;  %v11573_v56 = vpack.c.bf16 %v10022_v28, %v10021_v1 }
 0x1fb   : > { %8705 = vmatprep.mubr.msk.f32.mxu1 %vm570_vm1, %v11532_v38 }
 0x1fc   : > { %v9449_v19 = vpack.c.bf16 %v10027_v10, %v10026_v13 }
 0x1fd   : > { %v10035_v14 = vpop.permute.xlu1 %10034 }
 0x1fe   : > { %v10037_v57 = vunpack.i.h.bf16 %v10035_v14  ;;  %v10036_v17 = vunpack.i.l.bf16 %v10035_v14 }
 0x1ff   : > { %8720 = vmatmul.mubr.msk.f32.vlgmr.msra.gmra.mrb[28].mxu0 %vm570_vm1, %v11539_v41  ;;  %9424 = vmatpush3.bf16.xpose.msk.msra.mxu1 %vm11411_vm2, %v9419_v5 }
 0x200   : > { %8722 = vmatprep.mubr.msk.f32.mxu0 %vm570_vm1, %v11542_v16  ;;  %9448 = vmatpush3.bf16.msra.mxu0 %v9445_v47  ;;  %v11555_v40 = vpack.c.bf16 %v10037_v57, %v10036_v17 }
 0x201   : > { %9438 = vmatprep.subr.bf16.mxu1 %v9437_v18  ;;  %9450 = vmatprep.subr.bf16.mxu0 %v9449_v19 }
 0x203   : > { %8723 = vmatmul.mubr.msk.f32.gmra.mrb[30].mxu0 %vm570_vm1, %v11551_v62 }
 0x204   : > { %9452 = vmatpush3.bf16.msra.mxu0 %v9449_v19 }
 0x205   : > { %9462 = vmatprep.subr.bf16.mxu0 %v11555_v40 }
 0x206   : > { %8706 = vmatmul.mubr.msk.f32.vlgmr.msra.gmra.mrb[12].mxu1 %vm570_vm1, %v11558_v25 }
 0x207   : > { %8708 = vmatprep.mubr.msk.f32.mxu1 %vm570_vm1, %v11562_v26  ;;  %9440 = vmatpush3.bf16.msra.mxu1 %v9437_v18 }
 0x208   : > { %9442 = vmatprep.subr.bf16.mxu1 %v9441_v49 }
 0x20a   : > { %8709 = vmatmul.mubr.msk.f32.gmra.mrb[14].mxu1 %vm570_vm1, %v11569_v54 }
 0x20b   : > { %9444 = vmatpush3.bf16.msra.mxu1 %v9441_v49 }
 0x20c   : > { %9454 = vmatprep.subr.bf16.mxu1 %v11573_v56 }
 0x2a9   : > { %v11576_v60 = vpop.f32.mrb[0].mxu1 }
 0x2aa   : > { %v11578_v30 = vpop.f32.mrb[1].mxu1  ;;  %v1264_v35 = vsel %vm276_vm0, %v11576_v60, -inf }
 0x2ab   : > { %1265 = vmax.xlane.f32.xlu1 %v1264_v35  ;;  %v1261_v59 = vsel %vm276_vm0, %v11578_v30, -inf }
 0x2ac   : > { %1262 = vmax.xlane.f32.xlu0 %v1261_v59 }
 0x2ad   : > { %v11584_v5 = vpop.f32.mrb[2].mxu1 }
 0x2ae   : > { %v11586_v34 = vpop.f32.mrb[3].mxu1  ;;  %v1270_v63 = vsel %vm276_vm0, %v11584_v5, -inf }
 0x2af   : > { %v1267_v47 = vsel %vm276_vm0, %v11586_v34, -inf }
 0x2b0   : > { %1271 = vmax.xlane.f32.xlu0 %v1270_v63 }
 0x2b4   : > { %1268 = vmax.xlane.f32.xlu0 %v1267_v47 }
 0x2b9   : > { %v11592_v6 = vpop.f32.mrb[4].mxu1 }
 0x2ba   : > { %v11594_v7 = vpop.f32.mrb[5].mxu1  ;;  %v1276_v9 = vsel %vm276_vm0, %v11592_v6, -inf }
 0x2bb   : > { %1277 = vmax.xlane.f32.xlu1 %v1276_v9  ;;  %v1273_v14 = vsel %vm276_vm0, %v11594_v7, -inf }
 0x2bd   : > { %v11598_v10 = vpop.f32.mrb[6].mxu1 }
 0x2be   : > { %v11600_v13 = vpop.f32.mrb[7].mxu1  ;;  %v1282_v46 = vsel %vm276_vm0, %v11598_v10, -inf }
 0x2bf   : > { %1283 = vmax.xlane.f32.xlu0 %v1282_v46  ;;  %1274 = vmax.xlane.f32.xlu1 %v1273_v14  ;;  %v1279_v17 = vsel %vm276_vm0, %v11600_v13, -inf }
 0x2c2   : > { %v11606_v57 = vpop.f32.mrb[24].mxu0 }
 0x2c3   : > { %v11610_v18 = vpop.f32.mrb[25].mxu0  ;;  %1280 = vmax.xlane.f32.xlu1 %v1279_v17  ;;  %v1300_v2 = vsel %vm276_vm0, %v11606_v57, -inf }
 0x2c4   : > { %v1297_v49 = vsel %vm276_vm0, %v11610_v18, -inf }
 0x2c6   : > { %v11612_v19 = vpop.f32.mrb[26].mxu0 }
 0x2c7   : > { %v11616_v20 = vpop.f32.mrb[27].mxu0  ;;  %1301 = vmax.xlane.f32.xlu1 %v1300_v2  ;;  %v1306_v21 = vsel %vm276_vm0, %v11612_v19, -inf }
 0x2c8   : > { %1307 = vmax.xlane.f32.xlu0 %v1306_v21  ;;  %v1303_v47 = vsel %vm276_vm0, %v11616_v20, -inf }
 0x2c9   : > { %v11620_v28 = vpop.f32.mrb[8].mxu1 }
 0x2ca   : > { %v11622_v1 = vpop.f32.mrb[9].mxu1  ;;  %v1288_v35 = vsel %vm276_vm0, %v11620_v28, -inf }
 0x2cb   : > { %1298 = vmax.xlane.f32.xlu1 %v1297_v49  ;;  %v1285_v9 = vsel %vm276_vm0, %v11622_v1, -inf }
 0x2cc   : > { %1289 = vmax.xlane.f32.xlu0 %v1288_v35 }
 0x2cd   : > { %v11628_v59 = vpop.f32.mrb[10].mxu1 }
 0x2ce   : > { %v11630_v63 = vpop.f32.mrb[11].mxu1  ;;  %v1294_v17 = vsel %vm276_vm0, %v11628_v59, -inf }
 0x2cf   : > { %1304 = vmax.xlane.f32.xlu1 %v1303_v47  ;;  %v1291_v35 = vsel %vm276_vm0, %v11630_v63, -inf }
 0x2d0   : > { %1286 = vmax.xlane.f32.xlu0 %v1285_v9 }
 0x2d2   : > { %v11636_v46 = vpop.f32.mrb[28].mxu0 }
 0x2d3   : > { %v11638_v14 = vpop.f32.mrb[29].mxu0 }
 0x2d4   : > { %1295 = vmax.xlane.f32.xlu0 %v1294_v17  ;;  %v1321_v2 = vsel %vm276_vm0, %v11638_v14, -inf  ;;  %v1324_v17 = vsel %vm276_vm0, %v11636_v46, -inf }
 0x2d5   : > { %1322 = vmax.xlane.f32.xlu1 %v1321_v2 }
 0x2d6   : > { %v11644_v21 = vpop.f32.mrb[30].mxu0 }
 0x2d7   : > { %14332 = vst [vmem:[#allocation29_spill] sm:$0xff] %v11644_v21  ;;  %v11646_v49 = vpop.f32.mrb[31].mxu0  ;;  %v1330_v48 = vsel %vm276_vm0, %v11644_v21, -inf }
 0x2d8   : > { %1292 = vmax.xlane.f32.xlu0 %v1291_v35  ;;  %v1327_v47 = vsel %vm276_vm0, %v11646_v49, -inf }
 0x2d9   : > { %1328 = vmax.xlane.f32.xlu1 %v1327_v47  ;;  %v11652_v9 = vpop.f32.mrb[12].mxu1 }
 0x2da   : > { %14333 = vst [vmem:[#allocation30_spill] sm:$0xff] %v11652_v9  ;;  %v11654_v4 = vpop.f32.mrb[13].mxu1  ;;  %v1312_v35 = vsel %vm276_vm0, %v11652_v9, -inf }
 0x2db   : > { %14334 = vst [vmem:[#allocation31_spill] sm:$0xff] %v11654_v4  ;;  %v1309_v47 = vsel %vm276_vm0, %v11654_v4, -inf }
 0x2dc   : > { %1325 = vmax.xlane.f32.xlu0 %v1324_v17  ;;  %v11672_v17 = vpop.permute.xlu1 %10044 }
 0x2dd   : > { %v11658_v2 = vpop.f32.mrb[14].mxu1 }
 0x2de   : > { %14335 = vst [vmem:[#allocation32_spill] sm:$0xff] %v11658_v2  ;;  %v11660_v33 = vpop.f32.mrb[15].mxu1 }
 0x2df   : > { %14336 = vst [vmem:[#allocation33_spill] sm:$0xff] %v11660_v33  ;;  %v1315_v8 = vsel %vm276_vm0, %v11660_v33, -inf }
 0x2e0   : > { %1331 = vmax.xlane.f32.xlu0 %v1330_v48  ;;  %v11676_v48 = vpop.permute.xlu1 %10049 }
 0x2e4   : > { %1313 = vmax.xlane.f32.xlu0 %v1312_v35  ;;  %v11678_v9 = vpop.permute.xlu1 %10054  ;;  %v10030_v35 = vpop.permute.xlu0 %10029 }
 0x2e8   : > { %1310 = vmax.xlane.f32.xlu0 %v1309_v47  ;;  %v11680_v21 = vpop.permute.xlu1 %10059  ;;  %v1318_v47 = vsel %vm276_vm0, %v11658_v2, -inf }
 0x2ea   : > { %2296 = vrot.lane.b32.xlu1 %v11440_v27, %s10973_s12  ;;  %v10040_v27 = vpop.permute.xlu0 %10039 }
 0x2ec   : > { %v11686_v4 = vpop.permute.xlu1 %10064 }
 0x2ee   : > { %v11688_v45 = vpop.permute.xlu0 %10069 }
 0x2f2   : > { %v11696_v33 = vpop.permute.xlu0 %10079 }
 0x2f3   : > { %14337 = vst [vmem:[#allocation34_spill] sm:$0xff] %v11696_v33 }
 0x2fe   : > { %10094 = vrot.lane.b32.xlu0 %v11320_v51, %s10972_s11 }
 0x30e   : > { %1316 = vmax.xlane.f32.xlu1 %v1315_v8  ;;  %v11694_v8 = vpop.permute.xlu1 %10074 }
 0x31d   : > { %1319 = vmax.xlane.f32.xlu0 %v1318_v47  ;;  %v11700_v47 = vpop.permute.xlu1 %2179 }
 0x31e   : > { %14338 = vst [vmem:[#allocation35_spill] sm:$0xff] %v11700_v47 }
 0x31f   : > { %2183 = vrot.lane.b32.xlu1 %v11426_v22, %s10973_s12  ;;  %v11702_v22 = vpop.permute.xlu0 %2181 }
 0x320   : > { %14339 = vst [vmem:[#allocation36_spill] sm:$0xff] %v11702_v22 }
 0x323   : > { %10099 = vrot.lane.b32.xlu1 %v11334_v55, %s10972_s11  ;;  %v11712_v2 = vpop.permute.xlu0 %10089 }
 0x327   : > { %2413 = vrot.lane.b32.xlu1 %v11476_v15, %s10973_s12  ;;  %v11710_v15 = vpop.permute.xlu1 %10084 }
 0x328   : > { %14340 = vst [vmem:[#allocation37_spill] sm:$0xff] %v11710_v15 }
 0x32b   : > { %2300 = vrot.lane.b32.xlu1 %v11460_v12, %s10973_s12 }
 0x32f   : > { %10109 = vrot.lane.b32.xlu1 %v11354_v61, %s10972_s11 }
 0x333   : > { %2298 = vrot.lane.b32.xlu0 %v11457_v11, %s10973_s12  ;;  %2530 = vrot.lane.b32.xlu1 %v11322_v52, %s10973_s12 }
 0x337   : > { %2185 = vrot.lane.b32.xlu0 %v11437_v24, %s10973_s12  ;;  %2417 = vrot.lane.b32.xlu1 %v11516_v50, %s10973_s12 }
 0x338   : > { %v1266_v12 = vpop.xlane.xlu1 %1265 }
 0x339   : > { %v1334_v22 = vsub.f32 %v11576_v60, %v1266_v12  ;;  %v1263_v47 = vpop.xlane.xlu0 %1262 }
 0x33a   : > { %v1333_v33 = vsub.f32 %v11578_v30, %v1263_v47 }
 0x33b   : > { %v1359_v11 = vmul.f32 1.442695, %v1334_v22  ;;  %10104 = vrot.lane.b32.xlu0 %v11344_v58, %s10972_s11  ;;  %10119 = vrot.lane.b32.xlu1 %v11374_v3, %s10972_s11 }
 0x33c   : > { %v1357_v52 = vmul.f32 1.442695, %v1333_v33 }
 0x33d   : > { %v1272_v15 = vpop.xlane.xlu0 %1271 }
 0x33e   : > { %10423 = vpow2.f32 %v1357_v52  ;;  %v1336_v24 = vsub.f32 %v11584_v5, %v1272_v15  ;;  %v10032_v52 = vunpack.i.h.bf16 %v10030_v35  ;;  %v10042_v5 = vunpack.i.h.bf16 %v10040_v27 }
 0x33f   : > { %10425 = vpow2.f32 %v1359_v11  ;;  %2415 = vrot.lane.b32.xlu0 %v11513_v53, %s10973_s12  ;;  %2649 = vrot.lane.b32.xlu1 %v11558_v25, %s10973_s12  ;;  %v10031_v11 = vunpack.i.l.bf16 %v10030_v35 }
 0x340   : > { %v1363_v60 = vmul.f32 1.442695, %v1336_v24 }
 0x341   : > { %v1269_v12 = vpop.xlane.xlu0 %1268  ;;  %v9457_v35 = vpack.c.bf16 %v10032_v52, %v10031_v11 }
 0x342   : > { %v1335_v22 = vsub.f32 %v11586_v34, %v1269_v12  ;;  %v10041_v34 = vunpack.i.l.bf16 %v10040_v27 }
 0x343   : > { %2302 = vrot.lane.b32.xlu0 %v11473_v37, %s10973_s12  ;;  %2536 = vrot.lane.b32.xlu1 %v11499_v29, %s10973_s12 }
 0x344   : > { %v1361_v33 = vmul.f32 1.442695, %v1335_v22  ;;  %v11753_v27 = vpack.c.bf16 %v10042_v5, %v10041_v34 }
 0x346   : > { %10427 = vpow2.f32 %v1361_v33 }
 0x347   : > { %10429 = vpow2.f32 %v1363_v60  ;;  %10114 = vrot.lane.b32.xlu0 %v11364_v0, %s10972_s11  ;;  %2766 = vrot.lane.b32.xlu1 %v11539_v41, %s10973_s12  ;;  %s7708_s11 = sshll.u32 %s14052_s23, 4  ;;  %s14127_s11 = int_to_ptr.vmem [resolvable:$true] %s7708_s11 }
 0x348   : > { %v11738_v15 = vpop.eup %10423  ;;  %v1278_v24 = vpop.xlane.xlu1 %1277 }
 0x349   : > { %14341 = vst [vmem:[#allocation38_spill] sm:$0xff] %v11738_v15  ;;  %v11740_v30 = vpop.eup %10425  ;;  %8733 = vmatprep.mubr.msk.f32.mxu1 %vm276_vm0, %v11738_v15  ;;  %v1338_v47 = vsub.f32 %v11592_v6, %v1278_v24 }
 0x34a   : > { %14342 = vst [vmem:[#allocation39_spill] sm:$0xff] %v11740_v30  ;;  %8734 = vmatmul.mubr.msk.f32.vlgmr.msra.gmra.mrb[16].mxu1 %vm276_vm0, %v11740_v30 }
 0x34b   : > { %9456 = vmatpush3.bf16.msra.mxu1 %v11573_v56  ;;  %2532 = vrot.lane.b32.xlu0 %v11483_v23, %s10973_s12  ;;  %v1367_v33 = vmul.f32 1.442695, %v1338_v47 }
 0x34c   : > { %2653 = vrot.lane.b32.xlu1 %v11569_v54, %s10973_s12  ;;  %9458 = vmatprep.subr.bf16.mxu1 %v9457_v35  ;;  %v1284_v12 = vpop.xlane.xlu0 %1283  ;;  %v1275_v22 = vpop.xlane.xlu1 %1274 }
 0x34d   : > { %v1337_v60 = vsub.f32 %v11594_v7, %v1275_v22  ;;  %v1340_v52 = vsub.f32 %v11598_v10, %v1284_v12  ;;  %v10047_v22 = vunpack.i.h.bf16 %v11672_v17 }
 0x34f   : > { %v1365_v11 = vmul.f32 1.442695, %v1337_v60  ;;  %9460 = vmatpush3.bf16.msra.mxu1 %v9457_v35  ;;  %2419 = vrot.lane.b32.xlu0 %v11527_v43, %s10973_s12  ;;  %v1371_v10 = vmul.f32 1.442695, %v1340_v52  ;;  %v10046_v60 = vunpack.i.l.bf16 %v11672_v17 }
 0x350   : > { %v11758_v56 = vpop.eup %10427  ;;  %2770 = vrot.lane.b32.xlu1 %v11551_v62, %s10973_s12  ;;  %9470 = vmatprep.subr.bf16.mxu1 %v11753_v27  ;;  %v1281_v6 = vpop.xlane.xlu1 %1280 }
 0x351   : > { %14343 = vst [vmem:[#allocation40_spill] sm:$0xff] %v11758_v56  ;;  %v11763_v24 = vpop.eup %10429  ;;  %v1339_v7 = vsub.f32 %v11600_v13, %v1281_v6  ;;  %8736 = vmatprep.mubr.msk.f32.mxu1 %vm276_vm0, %v11758_v56  ;;  %10431 = vpow2.f32 %v1365_v11 }
 0x352   : > { %14344 = vst [vmem:[#allocation41_spill] sm:$0xff] %v11763_v24  ;;  %8737 = vmatmul.mubr.msk.f32.gmra.mrb[18].mxu1 %vm276_vm0, %v11763_v24  ;;  %10433 = vpow2.f32 %v1367_v33 }
 0x353   : > { %v1369_v5 = vmul.f32 1.442695, %v1339_v7  ;;  %2647 = vrot.lane.b32.xlu0 %v11532_v38, %s10973_s12 }
 0x354   : > { %10124 = vrot.lane.b32.xlu1 %v11259_v32, %s10974_s5  ;;  %v1302_v34 = vpop.xlane.xlu1 %1301 }
 0x355   : > { %10435 = vpow2.f32 %v1369_v5  ;;  %v1308_v13 = vpop.xlane.xlu0 %1307  ;;  %v1346_v35 = vsub.f32 %v11606_v57, %v1302_v34  ;;  %v10057_v34 = vunpack.i.h.bf16 %v11678_v9 }
 0x356   : > { %10437 = vpow2.f32 %v1371_v10  ;;  %v1348_v47 = vsub.f32 %v11612_v19, %v1308_v13  ;;  %v10056_v13 = vunpack.i.l.bf16 %v11678_v9 }
 0x357   : > { %2534 = vrot.lane.b32.xlu0 %v11488_v44, %s10973_s12  ;;  %v1383_v11 = vmul.f32 1.442695, %v1346_v35 }
 0x358   : > { %10134 = vrot.lane.b32.xlu1 %v11283_v39, %s10974_s5  ;;  %v1299_v12 = vpop.xlane.xlu1 %1298  ;;  %v1387_v19 = vmul.f32 1.442695, %v1348_v47 }
 0x359   : > { %v1345_v33 = vsub.f32 %v11610_v18, %v1299_v12  ;;  %v1290_v52 = vpop.xlane.xlu0 %1289 }
 0x35a   : > { %v1342_v57 = vsub.f32 %v11620_v28, %v1290_v52  ;;  %v9465_v28 = vpack.c.bf16 %v10047_v22, %v10046_v60 }
 0x35b   : > { %v1381_v6 = vmul.f32 1.442695, %v1345_v33  ;;  %2764 = vrot.lane.b32.xlu0 %v11504_v31, %s10973_s12  ;;  %v11786_v7 = vpop.eup %10431 }
 0x35c   : > { %14345 = vst [vmem:[#allocation42_spill] sm:$0xff] %v11786_v7  ;;  %10144 = vrot.lane.b32.xlu1 %v11293_v42, %s10974_s5  ;;  %v1305_v10 = vpop.xlane.xlu1 %1304  ;;  %v11790_v5 = vpop.eup %10433  ;;  %8747 = vmatprep.mubr.msk.f32.mxu0 %vm276_vm0, %v11786_v7  ;;  %v1375_v12 = vmul.f32 1.442695, %v1342_v57 }
 0x35d   : > { %14346 = vst [vmem:[#allocation43_spill] sm:$0xff] %v11790_v5  ;;  %10439 = vpow2.f32 %v1381_v6  ;;  %v1287_v17 = vpop.xlane.xlu0 %1286  ;;  %v1347_v18 = vsub.f32 %v11616_v20, %v1305_v10  ;;  %8748 = vmatmul.mubr.msk.f32.vlgmr.msra.gmra.mrb[32].mxu0 %vm276_vm0, %v11790_v5  ;;  %v10091_v6 = vunpack.i.l.bf16 %v11712_v2 }
 0x35e   : > { %10441 = vpow2.f32 %v1383_v11  ;;  %v1341_v35 = vsub.f32 %v11622_v1, %v1287_v17  ;;  %9464 = vmatpush3.bf16.msra.mxu0 %v11555_v40  ;;  %v9477_v40 = vpack.c.bf16 %v10057_v34, %v10056_v13  ;;  %v10092_v11 = vunpack.i.h.bf16 %v11712_v2 }
 0x35f   : > { %v11800_v47 = vpop.eup %10435  ;;  %v1385_v33 = vmul.f32 1.442695, %v1347_v18  ;;  %2651 = vrot.lane.b32.xlu0 %v11562_v26, %s10973_s12  ;;  %10443 = vpow2.f32 %v1387_v19  ;;  %9466 = vmatprep.subr.bf16.mxu0 %v9465_v28  ;;  %v10072_v34 = vunpack.i.h.bf16 %v11688_v45  ;;  %v10052_v2 = vunpack.i.h.bf16 %v11676_v48 }
 0x360   : > { %14347 = vst [vmem:[#allocation44_spill] sm:$0xff] %v11800_v47  ;;  %v1373_v20 = vmul.f32 1.442695, %v1341_v35  ;;  %10154 = vrot.lane.b32.xlu1 %v11320_v51, %s10974_s5  ;;  %v11807_v9 = vpop.eup %10437  ;;  %8750 = vmatprep.mubr.msk.f32.mxu0 %vm276_vm0, %v11800_v47 }
 0x361   : > { %14348 = vst [vmem:[#allocation45_spill] sm:$0xff] %v11807_v9  ;;  %10445 = vpow2.f32 %v1385_v33  ;;  %v1296_v1 = vpop.xlane.xlu0 %1295  ;;  %8751 = vmatmul.mubr.msk.f32.gmra.mrb[34].mxu0 %vm276_vm0, %v11807_v9 }
 0x362   : > { %10447 = vpow2.f32 %v1373_v20  ;;  %v1323_v22 = vpop.xlane.xlu1 %1322  ;;  %v1344_v60 = vsub.f32 %v11628_v59, %v1296_v1  ;;  %9468 = vmatpush3.bf16.msra.mxu0 %v9465_v28 }
 0x363   : > { %10449 = vpow2.f32 %v1375_v12  ;;  %v1353_v52 = vsub.f32 %v11638_v14, %v1323_v22  ;;  %2768 = vrot.lane.b32.xlu0 %v11542_v16, %s10973_s12  ;;  %9478 = vmatprep.subr.bf16.mxu0 %v9477_v40  ;;  %v9481_v12 = vpack.c.bf16 %v10092_v11, %v10091_v6  ;;  %v10062_v6 = vunpack.i.h.bf16 %v11680_v21 }
 0x364   : > { %10164 = vrot.lane.b32.xlu1 %v11334_v55, %s10974_s5  ;;  %v1379_v14 = vmul.f32 1.442695, %v1344_v60 }
 0x365   : > { %v1397_v57 = vmul.f32 1.442695, %v1353_v52  ;;  %v1293_v19 = vpop.xlane.xlu0 %1292 }
 0x366   : > { %v1343_v10 = vsub.f32 %v11630_v63, %v1293_v19  ;;  %v1329_v17 = vpop.xlane.xlu1 %1328  ;;  %v10071_v63 = vunpack.i.l.bf16 %v11688_v45  ;;  %v14353_v45 = vld [vmem:[#allocation13_spill] sm:$0xff] }
 0x367   : > { %v11822_v59 = vpop.eup %10439  ;;  %10451 = vpow2.f32 %v1397_v57  ;;  %v1355_v18 = vsub.f32 %v11646_v49, %v1329_v17  ;;  %10129 = vrot.lane.b32.xlu0 %v11273_v36, %s10974_s5  ;;  %v10051_v49 = vunpack.i.l.bf16 %v11676_v48  ;;  %v10061_v57 = vunpack.i.l.bf16 %v11680_v21  ;;  %v14356_v19 = vld [vmem:[#allocation29_spill] sm:$0xff] }
 0x368   : > { %14349 = vst [vmem:[#allocation46_spill] sm:$0xff] %v11822_v59  ;;  %v11827_v28 = vpop.eup %10441  ;;  %v1377_v13 = vmul.f32 1.442695, %v1343_v10  ;;  %10169 = vrot.lane.b32.xlu1 %v11354_v61, %s10974_s5  ;;  %8775 = vmatprep.mubr.msk.f32.mxu0 %vm276_vm0, %v11822_v59 }
 0x369   : > { %14350 = vst [vmem:[#allocation47_spill] sm:$0xff] %v11827_v28  ;;  %v1326_v35 = vpop.xlane.xlu0 %1325  ;;  %8776 = vmatmul.mubr.msk.f32.vlgmr.msra.gmra.mrb[36].mxu0 %vm276_vm0, %v11827_v28  ;;  %v11839_v33 = vpop.eup %10443  ;;  %v1401_v22 = vmul.f32 1.442695, %v1355_v18  ;;  %v9473_v11 = vpack.c.bf16 %v10052_v2, %v10051_v49  ;;  %v14358_v18 = vld [vmem:[#allocation14_spill] sm:$0xff] }
 0x36a   : > { %14351 = vst [vmem:[#allocation48_spill] sm:$0xff] %v11839_v33  ;;  %10453 = vpow2.f32 %v1377_v13  ;;  %v1354_v20 = vsub.f32 %v11636_v46, %v1326_v35  ;;  %9480 = vmatpush3.bf16.msra.mxu0 %v9477_v40  ;;  %v9497_v46 = vpack.c.bf16 %v10072_v34, %v10071_v63  ;;  %v9485_v13 = vpack.c.bf16 %v10062_v6, %v10061_v57 }
 0x36b   : > { %v11842_v1 = vpop.eup %10445  ;;  %10455 = vpow2.f32 %v1379_v14  ;;  %9482 = vmatprep.subr.bf16.mxu0 %v9481_v12  ;;  %10139 = vrot.lane.b32.xlu0 %v14353_v45, %s10974_s5  ;;  %v10077_v35 = vunpack.i.h.bf16 %v11694_v8 }
 0x36c   : > { %14352 = vst [vmem:[#allocation49_spill] sm:$0xff] %v11842_v1  ;;  %v11846_v48 = vpop.eup %10447  ;;  %v1399_v60 = vmul.f32 1.442695, %v1354_v20  ;;  %10174 = vrot.lane.b32.xlu1 %v11364_v0, %s10974_s5  ;;  %8778 = vmatprep.mubr.msk.f32.mxu0 %vm276_vm0, %v11842_v1 }
 0x36d   : > { %14354 = vst [vmem:[#allocation13_spill] sm:$0xff] %v11846_v48  ;;  %v11852_v52 = vpop.eup %10449  ;;  %8761 = vmatprep.mubr.msk.f32.mxu1 %vm276_vm0, %v11846_v48  ;;  %v1332_v40 = vpop.xlane.xlu0 %1331  ;;  %8779 = vmatmul.mubr.msk.f32.gmra.mrb[38].mxu0 %vm276_vm0, %v11839_v33 }
 0x36e   : > { %14355 = vst [vmem:[#allocation50_spill] sm:$0xff] %v11852_v52  ;;  %10457 = vpow2.f32 %v1399_v60  ;;  %v1356_v10 = vsub.f32 %v14356_v19, %v1332_v40  ;;  %8762 = vmatmul.mubr.msk.f32.vlgmr.msra.gmra.mrb[20].mxu1 %vm276_vm0, %v11852_v52  ;;  %9484 = vmatpush3.bf16.msra.mxu0 %v9481_v12  ;;  %v10076_v12 = vunpack.i.l.bf16 %v11694_v8 }
 0x36f   : > { %10459 = vpow2.f32 %v1401_v22  ;;  %9472 = vmatpush3.bf16.msra.mxu1 %v11753_v27  ;;  %9499 = vmatprep.subr.msk.bf16.mxu0 %vm11411_vm2, %v9497_v46  ;;  %v14360_v27 = vld [vmem:[#allocation30_spill] sm:$0xff]  ;;  %v14363_v22 = vld [vmem:[#allocation31_spill] sm:$0xff] }
 0x370   : > { %v1403_v14 = vmul.f32 1.442695, %v1356_v10  ;;  %9474 = vmatprep.subr.bf16.mxu1 %v9473_v11  ;;  %10149 = vrot.lane.b32.xlu0 %v14358_v18, %s10974_s5  ;;  %v9503_v57 = vpack.c.bf16 %v10077_v35, %v10076_v12  ;;  %v10067_v35 = vunpack.i.h.bf16 %v11686_v4  ;;  %v10066_v12 = vunpack.i.l.bf16 %v11686_v4  ;;  %v14371_v4 = vld [vmem:[#allocation34_spill] sm:$0xff] }
 0x371   : > { %v11868_v34 = vpop.eup %10451  ;;  %10184 = vrot.lane.b32.xlu1 %v11259_v32, %s10975_s25  ;;  %v1314_v21 = vpop.xlane.xlu0 %1313 }
 0x372   : > { %14359 = vst [vmem:[#allocation29_spill] sm:$0xff] %v11868_v34  ;;  %10461 = vpow2.f32 %v1403_v14  ;;  %8803 = vmatprep.mubr.msk.f32.mxu0 %vm276_vm0, %v11868_v34  ;;  %v1350_v63 = vsub.f32 %v14360_v27, %v1314_v21  ;;  %v2297_v14 = vpop.permute.xlu1 %2296  ;;  %v14378_v34 = vld [vmem:[#allocation36_spill] sm:$0xff] }
 0x373   : > { %9476 = vmatpush3.bf16.msra.mxu1 %v9473_v11 }
 0x374   : > { %v11875_v2 = vpop.eup %10453  ;;  %9487 = vmatprep.subr.msk.bf16.mxu1 %vm11411_vm2, %v9485_v13  ;;  %10159 = vrot.lane.b32.xlu0 %v11344_v58, %s10974_s5  ;;  %v1391_v40 = vmul.f32 1.442695, %v1350_v63  ;;  %v14367_v63 = vld [vmem:[#allocation12_spill] sm:$0xff] }
 0x375   : > { %14361 = vst [vmem:[#allocation18_spill] sm:$0xff] %v11875_v2  ;;  %v11881_v49 = vpop.eup %10455  ;;  %10189 = vrot.lane.b32.xlu1 %v11273_v36, %s10975_s25  ;;  %8764 = vmatprep.mubr.msk.f32.mxu1 %vm276_vm0, %v11875_v2  ;;  %v1311_v20 = vpop.xlane.xlu0 %1310 }
 0x376   : > { %14362 = vst [vmem:[#allocation30_spill] sm:$0xff] %v11881_v49  ;;  %v1349_v60 = vsub.f32 %v14363_v22, %v1311_v20  ;;  %8765 = vmatmul.mubr.msk.f32.gmra.mrb[22].mxu1 %vm276_vm0, %v11881_v49  ;;  %v14369_v22 = vld [vmem:[#allocation17_spill] sm:$0xff] }
 0x377   : > { %v14408_v49 = vld [vmem:[#allocation21_spill] sm:$0xff] }
 0x378   : > { %v11892_v11 = vpop.eup %10457  ;;  %v1389_v6 = vmul.f32 1.442695, %v1349_v60  ;;  %10179 = vrot.lane.b32.xlu0 %v11374_v3, %s10974_s5 }
 0x379   : > { %14364 = vst [vmem:[#allocation31_spill] sm:$0xff] %v11892_v11  ;;  %v11896_v8 = vpop.eup %10459  ;;  %10199 = vrot.lane.b32.xlu1 %v11293_v42, %s10975_s25  ;;  %8804 = vmatmul.mubr.msk.f32.vlgmr.msra.gmra.mrb[40].mxu0 %vm276_vm0, %v11892_v11  ;;  %v10095_v19 = vpop.permute.xlu0 %10094 }
 0x37a   : > { %14365 = vst [vmem:[#allocation51_spill] sm:$0xff] %v11896_v8  ;;  %10463 = vpow2.f32 %v1389_v6  ;;  %9502 = vmatpush3.bf16.xpose.msk.msra.mxu0 %vm11411_vm2, %v9497_v46  ;;  %8806 = vmatprep.mubr.msk.f32.mxu0 %vm276_vm0, %v11896_v8  ;;  %v10097_v21 = vunpack.i.h.bf16 %v10095_v19  ;;  %v10096_v27 = vunpack.i.l.bf16 %v10095_v19  ;;  %v10082_v6 = vunpack.i.h.bf16 %v14371_v4 }
 0x37b   : > { %10465 = vpow2.f32 %v1391_v40  ;;  %9505 = vmatprep.subr.msk.bf16.mxu0 %vm11411_vm2, %v9503_v57  ;;  %v9491_v40 = vpack.c.bf16 %v10067_v35, %v10066_v12 }
 0x37c   : > { %v11908_v10 = vpop.eup %10461  ;;  %10194 = vrot.lane.b32.xlu0 %v11283_v39, %s10975_s25  ;;  %v9521_v46 = vpack.c.bf16 %v10097_v21, %v10096_v27  ;;  %v14372_v21 = vld [vmem:[#allocation33_spill] sm:$0xff] }
 0x37d   : > { %14366 = vst [vmem:[#allocation52_spill] sm:$0xff] %v11908_v10  ;;  %3799 = vrot.lane.b32.xlu1 %v14367_v63, %s10976_s7  ;;  %8807 = vmatmul.mubr.msk.f32.gmra.mrb[42].mxu0 %vm276_vm0, %v11908_v10 }
 0x37e   : > { %8831 = vmatprep.mubr.msk.f32.mxu0 %vm570_vm1, %v2297_v14 }
 0x380   : > { %10204 = vrot.lane.b32.xlu0 %v14353_v45, %s10975_s25 }
 0x381   : > { %10209 = vrot.lane.b32.xlu1 %v14358_v18, %s10975_s25 }
 0x382   : > { %9508 = vmatpush3.bf16.xpose.msk.msra.mxu0 %vm11411_vm2, %v9503_v57  ;;  %v10081_v57 = vunpack.i.l.bf16 %v14371_v4 }
 0x383   : > { %9523 = vmatprep.subr.msk.bf16.mxu0 %vm11411_vm2, %v9521_v46 }
 0x384   : > { %v11927_v20 = vpop.eup %10463  ;;  %3801 = vrot.lane.b32.xlu0 %v14369_v22, %s10976_s7  ;;  %v9509_v19 = vpack.c.bf16 %v10082_v6, %v10081_v57  ;;  %v14374_v6 = vld [vmem:[#allocation32_spill] sm:$0xff]  ;;  %v14411_v22 = vld [vmem:[#allocation19_spill] sm:$0xff] }
 0x385   : > { %14368 = vst [vmem:[#allocation53_spill] sm:$0xff] %v11927_v20  ;;  %v11931_v60 = vpop.eup %10465  ;;  %8789 = vmatprep.mubr.msk.f32.mxu1 %vm276_vm0, %v11927_v20 }
 0x386   : > { %14370 = vst [vmem:[#allocation54_spill] sm:$0xff] %v11931_v60  ;;  %8790 = vmatmul.mubr.msk.f32.vlgmr.msra.gmra.mrb[24].mxu1 %vm276_vm0, %v11931_v60 }
 0x387   : > { %9490 = vmatpush3.bf16.xpose.msk.msra.mxu1 %vm11411_vm2, %v9485_v13 }
 0x388   : > { %9493 = vmatprep.subr.msk.bf16.mxu1 %vm11411_vm2, %v9491_v40 }
 0x38f   : > { %9496 = vmatpush3.bf16.xpose.msk.msra.mxu1 %vm11411_vm2, %v9491_v40 }
 0x390   : > { %9511 = vmatprep.subr.msk.bf16.mxu1 %vm11411_vm2, %v9509_v19 }
 0x39b   : > { %v1317_v14 = vpop.xlane.xlu1 %1316 }
 0x39c   : > { %v1351_v27 = vsub.f32 %v14372_v21, %v1317_v14 }
 0x39e   : > { %v1393_v35 = vmul.f32 1.442695, %v1351_v27 }
 0x39f   : > { %v2184_v12 = vpop.permute.xlu1 %2183 }
 0x3a0   : > { %10467 = vpow2.f32 %v1393_v35 }
 0x3a3   : > { %v10100_v13 = vpop.permute.xlu1 %10099 }
 0x3a4   : > { %v10102_v8 = vunpack.i.h.bf16 %v10100_v13  ;;  %v10101_v4 = vunpack.i.l.bf16 %v10100_v13 }
 0x3a6   : > { %v9527_v47 = vpack.c.bf16 %v10102_v8, %v10101_v4 }
 0x3a7   : > { %v2414_v52 = vpop.permute.xlu1 %2413 }
 0x3aa   : > { %v11948_v10 = vpop.eup %10467  ;;  %v1320_v48 = vpop.xlane.xlu0 %1319 }
 0x3ab   : > { %14373 = vst [vmem:[#allocation34_spill] sm:$0xff] %v11948_v10  ;;  %v1352_v57 = vsub.f32 %v14374_v6, %v1320_v48  ;;  %8792 = vmatprep.mubr.msk.f32.mxu1 %vm276_vm0, %v11948_v10  ;;  %v2301_v40 = vpop.permute.xlu1 %2300 }
 0x3ad   : > { %v1395_v9 = vmul.f32 1.442695, %v1352_v57 }
 0x3ae   : > { %v2299_v11 = vpop.permute.xlu0 %2298 }
 0x3af   : > { %10469 = vpow2.f32 %v1395_v9  ;;  %8832 = vmatmul.mubr.msk.f32.vlgmr.msra.gmra.mrb[44].mxu0 %vm570_vm1, %v2299_v11  ;;  %v10110_v14 = vpop.permute.xlu1 %10109  ;;  %v14376_v9 = vld [vmem:[#allocation37_spill] sm:$0xff] }
 0x3b0   : > { %9526 = vmatpush3.bf16.xpose.msk.msra.mxu0 %vm11411_vm2, %v9521_v46  ;;  %8834 = vmatprep.mubr.msk.f32.mxu0 %vm570_vm1, %v2301_v40  ;;  %v10087_v11 = vunpack.i.h.bf16 %v14376_v9  ;;  %v10086_v13 = vunpack.i.l.bf16 %v14376_v9  ;;  %v14377_v46 = vld [vmem:[#allocation35_spill] sm:$0xff] }
 0x3b1   : > { %9529 = vmatprep.subr.msk.bf16.mxu0 %vm11411_vm2, %v9527_v47 }
 0x3b2   : > { %v2186_v48 = vpop.permute.xlu0 %2185  ;;  %v9515_v57 = vpack.c.bf16 %v10087_v11, %v10086_v13 }
 0x3b3   : > { %v2531_v21 = vpop.permute.xlu1 %2530 }
 0x3b6   : > { %v10105_v27 = vpop.permute.xlu0 %10104 }
 0x3b7   : > { %v2418_v35 = vpop.permute.xlu1 %2417  ;;  %v10107_v9 = vunpack.i.h.bf16 %v10105_v27 }
 0x3b8   : > { %9532 = vmatpush3.bf16.xpose.msk.msra.mxu0 %vm11411_vm2, %v9527_v47 }
 0x3b9   : > { %v11961_v8 = vpop.eup %10469 }
 0x3ba   : > { %14375 = vst [vmem:[#allocation33_spill] sm:$0xff] %v11961_v8  ;;  %v2416_v4 = vpop.permute.xlu0 %2415  ;;  %8793 = vmatmul.mubr.msk.f32.gmra.mrb[26].mxu1 %vm276_vm0, %v11961_v8 }
 0x3bb   : > { %8817 = vmatprep.mubr.msk.f32.mxu1 %vm570_vm1, %v14377_v46  ;;  %v10120_v6 = vpop.permute.xlu1 %10119  ;;  %v10106_v46 = vunpack.i.l.bf16 %v10105_v27 }
 0x3bc   : > { %v10122_v5 = vunpack.i.h.bf16 %v10120_v6 }
 0x3bd   : > { %v9533_v7 = vpack.c.bf16 %v10107_v9, %v10106_v46 }
 0x3be   : > { %v2303_v40 = vpop.permute.xlu0 %2302  ;;  %8818 = vmatmul.mubr.msk.f32.vlgmr.msra.gmra.mrb[28].mxu1 %vm570_vm1, %v14378_v34 }
 0x3bf   : > { %9514 = vmatpush3.bf16.xpose.msk.msra.mxu1 %vm11411_vm2, %v9509_v19  ;;  %8820 = vmatprep.mubr.msk.f32.mxu1 %vm570_vm1, %v2184_v12  ;;  %v2650_v47 = vpop.permute.xlu1 %2649  ;;  %v10121_v12 = vunpack.i.l.bf16 %v10120_v6 }
 0x3c0   : > { %8835 = vmatmul.mubr.msk.f32.gmra.mrb[46].mxu0 %vm570_vm1, %v2303_v40  ;;  %9517 = vmatprep.subr.msk.bf16.mxu1 %vm11411_vm2, %v9515_v57 }
 0x3c1   : > { %8859 = vmatprep.mubr.msk.f32.mxu0 %vm570_vm1, %v2531_v21  ;;  %v9551_v21 = vpack.c.bf16 %v10122_v5, %v10121_v12 }
 0x3c2   : > { %v10115_v11 = vpop.permute.xlu0 %10114  ;;  %8821 = vmatmul.mubr.msk.f32.gmra.mrb[30].mxu1 %vm570_vm1, %v2186_v48  ;;  %v10111_v48 = vunpack.i.l.bf16 %v10110_v14 }
 0x3c3   : > { %v10117_v13 = vunpack.i.h.bf16 %v10115_v11  ;;  %v10116_v34 = vunpack.i.l.bf16 %v10115_v11  ;;  %8845 = vmatprep.mubr.msk.f32.mxu1 %vm570_vm1, %v2414_v52  ;;  %v2537_v19 = vpop.permute.xlu1 %2536  ;;  %v10112_v52 = vunpack.i.h.bf16 %v10110_v14 }
 0x3c5   : > { %v9545_v8 = vpack.c.bf16 %v10117_v13, %v10116_v34 }
 0x3c6   : > { %v2533_v40 = vpop.permute.xlu0 %2532 }
 0x3c7   : > { %9520 = vmatpush3.bf16.xpose.msk.msra.mxu1 %vm11411_vm2, %v9515_v57  ;;  %v2767_v10 = vpop.permute.xlu1 %2766  ;;  %8860 = vmatmul.mubr.msk.f32.vlgmr.msra.gmra.mrb[48].mxu0 %vm570_vm1, %v2533_v40  ;;  %v9539_v57 = vpack.c.bf16 %v10112_v52, %v10111_v48 }
 0x3c8   : > { %9535 = vmatprep.subr.msk.bf16.mxu1 %vm11411_vm2, %v9533_v7  ;;  %9547 = vmatprep.subr.msk.bf16.mxu0 %vm11411_vm2, %v9545_v8 }
 0x3c9   : > { %9550 = vmatpush3.bf16.xpose.msk.msra.mxu0 %vm11411_vm2, %v9545_v8 }
 0x3ca   : > { %9553 = vmatprep.subr.msk.bf16.mxu0 %vm11411_vm2, %v9551_v21  ;;  %v2420_v27 = vpop.permute.xlu0 %2419 }
 0x3cb   : > { %v2654_v6 = vpop.permute.xlu1 %2653 }
 0x3ce   : > { %8846 = vmatmul.mubr.msk.f32.vlgmr.msra.gmra.mrb[32].mxu1 %vm570_vm1, %v2416_v4  ;;  %v2648_v5 = vpop.permute.xlu0 %2647 }
 0x3cf   : > { %8848 = vmatprep.mubr.msk.f32.mxu1 %vm570_vm1, %v2418_v35  ;;  %9538 = vmatpush3.bf16.xpose.msk.msra.mxu1 %vm11411_vm2, %v9533_v7  ;;  %v2771_v9 = vpop.permute.xlu1 %2770 }
 0x3d0   : > { %9541 = vmatprep.subr.msk.bf16.mxu1 %vm11411_vm2, %v9539_v57 }
 0x3d1   : > { %9556 = vmatpush3.bf16.xpose.msk.msra.mxu0 %vm11411_vm2, %v9551_v21 }
 0x3d2   : > { %8849 = vmatmul.mubr.msk.f32.gmra.mrb[34].mxu1 %vm570_vm1, %v2420_v27  ;;  %v2535_v14 = vpop.permute.xlu0 %2534 }
 0x3d3   : > { %8873 = vmatprep.mubr.msk.f32.mxu1 %vm570_vm1, %v2648_v5  ;;  %v10125_v8 = vpop.permute.xlu1 %10124  ;;  %8862 = vmatprep.mubr.msk.f32.mxu0 %vm570_vm1, %v2535_v14 }
 0x3d4   : > { %v10127_v4 = vunpack.i.h.bf16 %v10125_v8  ;;  %v10126_v35 = vunpack.i.l.bf16 %v10125_v8  ;;  %8863 = vmatmul.mubr.msk.f32.gmra.mrb[50].mxu0 %vm570_vm1, %v2537_v19 }
 0x3d6   : > { %v2765_v7 = vpop.permute.xlu0 %2764  ;;  %v9557_v46 = vpack.c.bf16 %v10127_v4, %v10126_v35 }
 0x3d7   : > { %9544 = vmatpush3.bf16.xpose.msk.msra.mxu1 %vm11411_vm2, %v9539_v57  ;;  %v10135_v11 = vpop.permute.xlu1 %10134  ;;  %8887 = vmatprep.mubr.msk.f32.mxu0 %vm570_vm1, %v2765_v7 }
 0x3d8   : > { %v10137_v13 = vunpack.i.h.bf16 %v10135_v11  ;;  %v10136_v34 = vunpack.i.l.bf16 %v10135_v11  ;;  %8888 = vmatmul.mubr.msk.f32.vlgmr.msra.gmra.mrb[52].mxu0 %vm570_vm1, %v2767_v10  ;;  %9558 = vmatprep.subr.bf16.mxu1 %v9557_v46 }
 0x3da   : > { %v2652_v12 = vpop.permute.xlu0 %2651  ;;  %v9565_v40 = vpack.c.bf16 %v10137_v13, %v10136_v34 }
 0x3db   : > { %v10145_v21 = vpop.permute.xlu1 %10144 }
 0x3dc   : > { %v10147_v52 = vunpack.i.h.bf16 %v10145_v21  ;;  %v10146_v48 = vunpack.i.l.bf16 %v10145_v21  ;;  %9566 = vmatprep.subr.bf16.mxu0 %v9565_v40 }
 0x3dd   : > { %9568 = vmatpush3.bf16.msra.mxu0 %v9565_v40 }
 0x3de   : > { %8874 = vmatmul.mubr.msk.f32.vlgmr.msra.gmra.mrb[36].mxu1 %vm570_vm1, %v2650_v47  ;;  %v2769_v19 = vpop.permute.xlu0 %2768  ;;  %v9569_v27 = vpack.c.bf16 %v10147_v52, %v10146_v48 }
 0x3df   : > { %8876 = vmatprep.mubr.msk.f32.mxu1 %vm570_vm1, %v2652_v12  ;;  %9560 = vmatpush3.bf16.msra.mxu1 %v9557_v46  ;;  %v10155_v57 = vpop.permute.xlu1 %10154 }
 0x3e0   : > { %v10157_v5 = vunpack.i.h.bf16 %v10155_v57  ;;  %v10156_v14 = vunpack.i.l.bf16 %v10155_v57  ;;  %8890 = vmatprep.mubr.msk.f32.mxu0 %vm570_vm1, %v2769_v19  ;;  %9570 = vmatprep.subr.bf16.mxu0 %v9569_v27 }
 0x3e1   : > { %8891 = vmatmul.mubr.msk.f32.gmra.mrb[54].mxu0 %vm570_vm1, %v2771_v9 }
 0x3e2   : > { %8877 = vmatmul.mubr.msk.f32.gmra.mrb[38].mxu1 %vm570_vm1, %v2654_v6  ;;  %9572 = vmatpush3.bf16.msra.mxu0 %v9569_v27  ;;  %v10130_v10 = vpop.permute.xlu0 %10129  ;;  %v12012_v8 = vpack.c.bf16 %v10157_v5, %v10156_v14 }
 0x3e3   : > { %v10132_v47 = vunpack.i.h.bf16 %v10130_v10  ;;  %v10131_v4 = vunpack.i.l.bf16 %v10130_v10 }
 0x3e4   : > { %9582 = vmatprep.subr.bf16.mxu0 %v12012_v8 }
 0x3e5   : > { %v9561_v35 = vpack.c.bf16 %v10132_v47, %v10131_v4 }
 0x3e6   : > { %v10140_v7 = vpop.permute.xlu0 %10139 }
 0x3e7   : > { %v10142_v46 = vunpack.i.h.bf16 %v10140_v7  ;;  %v10141_v11 = vunpack.i.l.bf16 %v10140_v7  ;;  %9562 = vmatprep.subr.bf16.mxu1 %v9561_v35 }
 0x3e8   : > { %9564 = vmatpush3.bf16.msra.mxu1 %v9561_v35 }
 0x3e9   : > { %v12015_v13 = vpack.c.bf16 %v10142_v46, %v10141_v11 }
 0x3eb   : > { %9574 = vmatprep.subr.bf16.mxu1 %v12015_v13 }
 0x41d   : > { %v12018_v9 = vpop.f32.mrb[16].mxu1 }
 0x41e   : > { %14379 = vst [vmem:[#allocation32_spill] sm:$0xff] %v12018_v9  ;;  %v12020_v6 = vpop.f32.mrb[17].mxu1 }
 0x41f   : > { %14380 = vst [vmem:[#allocation37_spill] sm:$0xff] %v12020_v6 }
 0x425   : > { %v12022_v34 = vpop.f32.mrb[18].mxu1 }
 0x426   : > { %14381 = vst [vmem:[#allocation35_spill] sm:$0xff] %v12022_v34  ;;  %v12024_v12 = vpop.f32.mrb[19].mxu1 }
 0x427   : > { %14382 = vst [vmem:[#allocation36_spill] sm:$0xff] %v12024_v12 }
 0x430   : > { %v12026_v40 = vpop.f32.mrb[32].mxu0 }
 0x431   : > { %14383 = vst [vmem:[#allocation55_spill] sm:$0xff] %v12026_v40  ;;  %v12028_v21 = vpop.f32.mrb[33].mxu0 }
 0x432   : > { %14384 = vst [vmem:[#allocation56_spill] sm:$0xff] %v12028_v21 }
 0x434   : > { %v12030_v52 = vpop.f32.mrb[34].mxu0 }
 0x435   : > { %14385 = vst [vmem:[#allocation57_spill] sm:$0xff] %v12030_v52  ;;  %v12032_v48 = vpop.f32.mrb[35].mxu0 }
 0x436   : > { %14386 = vst [vmem:[#allocation58_spill] sm:$0xff] %v12032_v48 }
 0x43c   : > { %v12034_v19 = vpop.f32.mrb[36].mxu0 }
 0x43d   : > { %14387 = vst [vmem:[#allocation59_spill] sm:$0xff] %v12034_v19  ;;  %v12036_v27 = vpop.f32.mrb[37].mxu0 }
 0x43e   : > { %14388 = vst [vmem:[#allocation60_spill] sm:$0xff] %v12036_v27 }
 0x440   : > { %v12038_v57 = vpop.f32.mrb[38].mxu0 }
 0x441   : > { %14389 = vst [vmem:[#allocation61_spill] sm:$0xff] %v12038_v57  ;;  %v12040_v5 = vpop.f32.mrb[20].mxu1  ;;  %v12042_v14 = vpop.f32.mrb[39].mxu0 }
 0x442   : > { %14390 = vst [vmem:[#allocation62_spill] sm:$0xff] %v12040_v5  ;;  %14391 = vst [vmem:[#allocation63_spill] sm:$0xff] %v12042_v14  ;;  %v12044_v10 = vpop.f32.mrb[21].mxu1 }
 0x443   : > { %14392 = vst [vmem:[#allocation64_spill] sm:$0xff] %v12044_v10 }
 0x449   : > { %v12046_v47 = vpop.f32.mrb[22].mxu1 }
 0x44a   : > { %14393 = vst [vmem:[#allocation65_spill] sm:$0xff] %v12046_v47  ;;  %v12048_v4 = vpop.f32.mrb[23].mxu1 }
 0x44b   : > { %14394 = vst [vmem:[#allocation66_spill] sm:$0xff] %v12048_v4 }
 0x44c   : > { %v12050_v35 = vpop.f32.mrb[40].mxu0 }
 0x44d   : > { %14395 = vst [vmem:[#allocation67_spill] sm:$0xff] %v12050_v35  ;;  %v12052_v7 = vpop.f32.mrb[41].mxu0 }
 0x44e   : > { %14396 = vst [vmem:[#allocation68_spill] sm:$0xff] %v12052_v7 }
 0x450   : > { %v12054_v46 = vpop.f32.mrb[42].mxu0 }
 0x451   : > { %14397 = vst [vmem:[#allocation69_spill] sm:$0xff] %v12054_v46  ;;  %v12056_v11 = vpop.f32.mrb[43].mxu0 }
 0x452   : > { %14398 = vst [vmem:[#allocation70_spill] sm:$0xff] %v12056_v11 }
 0x459   : > { %v12058_v52 = vpop.f32.mrb[24].mxu1 }
 0x45a   : > { %14399 = vst [vmem:[#allocation71_spill] sm:$0xff] %v12058_v52  ;;  %v12060_v48 = vpop.f32.mrb[25].mxu1 }
 0x45b   : > { %14400 = vst [vmem:[#allocation72_spill] sm:$0xff] %v12060_v48 }
 0x482   : > { %v12062_v5 = vpop.f32.mrb[44].mxu0 }
 0x483   : > { %v12064_v40 = vpop.f32.mrb[45].mxu0  ;;  %v2896_v10 = vsel %vm276_vm0, %v12062_v5, -inf }
 0x484   : > { %2897 = vmax.xlane.f32.xlu1 %v2896_v10  ;;  %v2893_v35 = vsel %vm276_vm0, %v12064_v40, -inf }
 0x488   : > { %2894 = vmax.xlane.f32.xlu1 %v2893_v35 }
 0x48d   : > { %v12070_v7 = vpop.f32.mrb[26].mxu1 }
 0x48e   : > { %14401 = vst [vmem:[#allocation73_spill] sm:$0xff] %v12070_v7  ;;  %v12072_v21 = vpop.f32.mrb[27].mxu1 }
 0x48f   : > { %14402 = vst [vmem:[#allocation74_spill] sm:$0xff] %v12072_v21 }
 0x491   : > { %v12074_v34 = vpop.f32.mrb[28].mxu1 }
 0x492   : > { %v12076_v52 = vpop.f32.mrb[29].mxu1  ;;  %v2884_v14 = vsel %vm276_vm0, %v12074_v34, -inf }
 0x493   : > { %v12078_v48 = vpop.f32.mrb[46].mxu0  ;;  %v2881_v21 = vsel %vm276_vm0, %v12076_v52, -inf }
 0x494   : > { %v12080_v12 = vpop.f32.mrb[47].mxu0  ;;  %v2902_v57 = vsel %vm276_vm0, %v12078_v48, -inf }
 0x495   : > { %2903 = vmax.xlane.f32.xlu0 %v2902_v57  ;;  %v12084_v10 = vpop.f32.mrb[30].mxu1  ;;  %v2899_v35 = vsel %vm276_vm0, %v12080_v12, -inf }
 0x496   : > { %2900 = vmax.xlane.f32.xlu1 %v2899_v35  ;;  %v12088_v7 = vpop.f32.mrb[31].mxu1  ;;  %v2890_v35 = vsel %vm276_vm0, %v12084_v10, -inf }
 0x497   : > { %v2887_v6 = vsel %vm276_vm0, %v12088_v7, -inf }
 0x499   : > { %2882 = vmax.xlane.f32.xlu0 %v2881_v21 }
 0x49a   : > { %2885 = vmax.xlane.f32.xlu1 %v2884_v14  ;;  %v12094_v9 = vpop.f32.mrb[48].mxu0 }
 0x49b   : > { %v12096_v19 = vpop.f32.mrb[49].mxu0  ;;  %v2920_v57 = vsel %vm276_vm0, %v12094_v9, -inf }
 0x49c   : > { %v2917_v14 = vsel %vm276_vm0, %v12096_v19, -inf }
 0x49d   : > { %2891 = vmax.xlane.f32.xlu0 %v2890_v35 }
 0x49e   : > { %2921 = vmax.xlane.f32.xlu1 %v2920_v57 }
 0x4a1   : > { %v12104_v21 = vpop.f32.mrb[32].mxu1  ;;  %2888 = vmax.xlane.f32.xlu0 %v2887_v6 }
 0x4a2   : > { %v12108_v46 = vpop.f32.mrb[33].mxu1  ;;  %2918 = vmax.xlane.f32.xlu1 %v2917_v14  ;;  %v2908_v14 = vsel %vm276_vm0, %v12104_v21, -inf }
 0x4a3   : > { %v2905_v56 = vsel %vm276_vm0, %v12108_v46, -inf }
 0x4a5   : > { %v12110_v11 = vpop.f32.mrb[34].mxu1 }
 0x4a6   : > { %v12112_v27 = vpop.f32.mrb[35].mxu1  ;;  %v2914_v30 = vsel %vm276_vm0, %v12110_v11, -inf }
 0x4a7   : > { %v12114_v4 = vpop.f32.mrb[50].mxu0 }
 0x4a8   : > { %v12116_v35 = vpop.f32.mrb[51].mxu0  ;;  %v2926_v57 = vsel %vm276_vm0, %v12114_v4, -inf }
 0x4a9   : > { %2927 = vmax.xlane.f32.xlu0 %v2926_v57  ;;  %v2923_v6 = vsel %vm276_vm0, %v12116_v35, -inf }
 0x4aa   : > { %2924 = vmax.xlane.f32.xlu1 %v2923_v6 }
 0x4ab   : > { %v12122_v47 = vpop.f32.mrb[52].mxu0 }
 0x4ac   : > { %v12124_v24 = vpop.f32.mrb[53].mxu0  ;;  %v2944_v1 = vsel %vm276_vm0, %v12122_v47, -inf }
 0x4ad   : > { %2909 = vmax.xlane.f32.xlu0 %v2908_v14  ;;  %v2941_v60 = vsel %vm276_vm0, %v12124_v24, -inf }
 0x4ae   : > { %2942 = vmax.xlane.f32.xlu1 %v2941_v60 }
 0x4b1   : > { %v12132_v57 = vpop.f32.mrb[36].mxu1  ;;  %2906 = vmax.xlane.f32.xlu0 %v2905_v56  ;;  %v2911_v56 = vsel %vm276_vm0, %v12112_v27, -inf }
 0x4b2   : > { %14403 = vst [vmem:[#allocation75_spill] sm:$0xff] %v12132_v57  ;;  %v12134_v20 = vpop.f32.mrb[37].mxu1 }
 0x4b3   : > { %14404 = vst [vmem:[#allocation76_spill] sm:$0xff] %v12134_v20 }
 0x4b4   : > { %v12136_v6 = vpop.f32.mrb[54].mxu0 }
 0x4b5   : > { %14405 = vst [vmem:[#allocation77_spill] sm:$0xff] %v12136_v6  ;;  %v12140_v33 = vpop.f32.mrb[38].mxu1  ;;  %v12142_v14 = vpop.f32.mrb[55].mxu0  ;;  %2915 = vmax.xlane.f32.xlu0 %v2914_v30  ;;  %v2950_v28 = vsel %vm276_vm0, %v12136_v6, -inf  ;;  %v2932_v30 = vsel %vm276_vm0, %v12132_v57, -inf }
 0x4b6   : > { %14406 = vst [vmem:[#allocation78_spill] sm:$0xff] %v12140_v33  ;;  %v12144_v15 = vpop.f32.mrb[39].mxu1  ;;  %v2947_v60 = vsel %vm276_vm0, %v12142_v14, -inf }
 0x4b7   : > { %14407 = vst [vmem:[#allocation79_spill] sm:$0xff] %v12144_v15  ;;  %2948 = vmax.xlane.f32.xlu1 %v2947_v60  ;;  %v2929_v60 = vsel %vm276_vm0, %v12134_v20, -inf }
 0x4b9   : > { %2912 = vmax.xlane.f32.xlu0 %v2911_v56  ;;  %v10165_v56 = vpop.permute.xlu1 %10164 }
 0x4bd   : > { %2945 = vmax.xlane.f32.xlu0 %v2944_v1  ;;  %v12162_v1 = vpop.permute.xlu1 %10169 }
 0x4c1   : > { %2951 = vmax.xlane.f32.xlu0 %v2950_v28  ;;  %v2935_v28 = vsel %vm276_vm0, %v12144_v15, -inf  ;;  %v12166_v59 = vpop.permute.xlu1 %10174 }
 0x4c5   : > { %2933 = vmax.xlane.f32.xlu0 %v2932_v30  ;;  %v12168_v30 = vpop.permute.xlu1 %10184 }
 0x4c6   : > { %14409 = vst [vmem:[#allocation80_spill] sm:$0xff] %v12168_v30 }
 0x4c8   : > { %3916 = vrot.lane.b32.xlu1 %v14408_v49, %s10976_s7  ;;  %v12176_v49 = vpop.permute.xlu0 %10149 }
 0x4c9   : > { %2930 = vmax.xlane.f32.xlu0 %v2929_v60  ;;  %v12170_v2 = vpop.permute.xlu1 %10189  ;;  %v2938_v60 = vsel %vm276_vm0, %v12140_v33, -inf  ;;  %v14417_v33 = vld [vmem:[#allocation15_spill] sm:$0xff] }
 0x4ca   : > { %14410 = vst [vmem:[#allocation81_spill] sm:$0xff] %v12170_v2 }
 0x4cc   : > { %v12184_v15 = vpop.permute.xlu0 %10159 }
 0x4cd   : > { %v12178_v63 = vpop.permute.xlu1 %10199 }
 0x4ce   : > { %14412 = vst [vmem:[#allocation82_spill] sm:$0xff] %v12178_v63 }
 0x4d0   : > { %v12190_v20 = vpop.permute.xlu0 %10179 }
 0x4d1   : > { %v12186_v2 = vpop.permute.xlu1 %3799 }
 0x4d2   : > { %14414 = vst [vmem:[#allocation83_spill] sm:$0xff] %v12186_v2  ;;  %v14418_v2 = vld [vmem:[#allocation22_spill] sm:$0xff] }
 0x4d4   : > { %v12198_v57 = vpop.permute.xlu0 %10194 }
 0x4d8   : > { %v12206_v6 = vpop.permute.xlu0 %10204 }
 0x4df   : > { %10214 = vrot.lane.b32.xlu0 %v11320_v51, %s10975_s25 }
 0x4ec   : > { %2936 = vmax.xlane.f32.xlu1 %v2935_v28  ;;  %v14413_v28 = vld [vmem:[#allocation24_spill] sm:$0xff] }
 0x4fd   : > { %3803 = vrot.lane.b32.xlu1 %v14411_v22, %s10976_s7  ;;  %v14415_v22 = vld [vmem:[#allocation23_spill] sm:$0xff] }
 0x4fe   : > { %2939 = vmax.xlane.f32.xlu0 %v2938_v60  ;;  %v12192_v60 = vpop.permute.xlu1 %10209 }
 0x4ff   : > { %14416 = vst [vmem:[#allocation84_spill] sm:$0xff] %v12192_v60 }
 0x501   : > { %10219 = vrot.lane.b32.xlu1 %v11334_v55, %s10975_s25 }
 0x505   : > { %4033 = vrot.lane.b32.xlu1 %v14413_v28, %s10976_s7 }
 0x509   : > { %3920 = vrot.lane.b32.xlu1 %v14415_v22, %s10976_s7 }
 0x50d   : > { %10229 = vrot.lane.b32.xlu1 %v11354_v61, %s10975_s25 }
 0x511   : > { %4150 = vrot.lane.b32.xlu1 %v14417_v33, %s10976_s7  ;;  %v2898_v63 = vpop.xlane.xlu1 %2897  ;;  %v14419_v33 = vld [vmem:[#allocation20_spill] sm:$0xff] }
 0x512   : > { %v2958_v28 = vsub.f32 %v12062_v5, %v2898_v63  ;;  %v12216_v63 = vpop.permute.xlu0 %3801 }
 0x514   : > { %3918 = vrot.lane.b32.xlu0 %v14418_v2, %s10976_s7  ;;  %v2987_v18 = vmul.f32 1.442695, %v2958_v28 }
 0x515   : > { %4037 = vrot.lane.b32.xlu1 %v11516_v50, %s10976_s7  ;;  %v2895_v22 = vpop.xlane.xlu1 %2894 }
 0x516   : > { %v2957_v60 = vsub.f32 %v12064_v40, %v2895_v22  ;;  %v10167_v22 = vunpack.i.h.bf16 %v10165_v56  ;;  %v10166_v40 = vunpack.i.l.bf16 %v10165_v56  ;;  %v10177_v56 = vunpack.i.h.bf16 %v12166_v59 }
 0x518   : > { %v2985_v30 = vmul.f32 1.442695, %v2957_v60  ;;  %3805 = vrot.lane.b32.xlu0 %v14419_v33, %s10976_s7 }
 0x519   : > { %10239 = vrot.lane.b32.xlu1 %v11374_v3, %s10975_s25 }
 0x51a   : > { %10471 = vpow2.f32 %v2985_v30 }
 0x51b   : > { %10473 = vpow2.f32 %v2987_v18 }
 0x51c   : > { %10224 = vrot.lane.b32.xlu0 %v11344_v58, %s10975_s25 }
 0x51d   : > { %4269 = vrot.lane.b32.xlu1 %v11558_v25, %s10976_s7 }
 0x520   : > { %4035 = vrot.lane.b32.xlu0 %v11513_v53, %s10976_s7 }
 0x521   : > { %4156 = vrot.lane.b32.xlu1 %v11499_v29, %s10976_s7 }
 0x522   : > { %v2904_v5 = vpop.xlane.xlu0 %2903 }
 0x523   : > { %v2960_v30 = vsub.f32 %v12078_v48, %v2904_v5  ;;  %v2901_v18 = vpop.xlane.xlu1 %2900  ;;  %v10176_v48 = vunpack.i.l.bf16 %v12166_v59 }
 0x524   : > { %v12223_v28 = vpop.eup %10471  ;;  %v2959_v60 = vsub.f32 %v12080_v12, %v2901_v18  ;;  %3922 = vrot.lane.b32.xlu0 %v11473_v37, %s10976_s7  ;;  %v9585_v12 = vpack.c.bf16 %v10167_v22, %v10166_v40 }
 0x525   : > { %14420 = vst [vmem:[#allocation22_spill] sm:$0xff] %v12223_v28  ;;  %v12228_v50 = vpop.eup %10473  ;;  %v2991_v25 = vmul.f32 1.442695, %v2960_v30  ;;  %4386 = vrot.lane.b32.xlu1 %v11539_v41, %s10976_s7  ;;  %8915 = vmatprep.mubr.msk.f32.mxu0 %vm276_vm0, %v12223_v28  ;;  %v12245_v22 = vpack.c.bf16 %v10177_v56, %v10176_v48  ;;  %v14485_v28 = vld [vmem:[#allocation19_spill] sm:$0xff] }
 0x526   : > { %14421 = vst [vmem:[#allocation20_spill] sm:$0xff] %v12228_v50  ;;  %v2989_v5 = vmul.f32 1.442695, %v2959_v60  ;;  %v2883_v29 = vpop.xlane.xlu0 %2882  ;;  %8916 = vmatmul.mubr.msk.f32.vlgmr.msra.gmra.mrb[56].mxu0 %vm276_vm0, %v12228_v50 }
 0x527   : > { %v2953_v18 = vsub.f32 %v12076_v52, %v2883_v29  ;;  %v2886_v53 = vpop.xlane.xlu1 %2885  ;;  %9584 = vmatpush3.bf16.msra.mxu0 %v12012_v8 }
 0x528   : > { %10475 = vpow2.f32 %v2989_v5  ;;  %v2954_v30 = vsub.f32 %v12074_v34, %v2886_v53  ;;  %9586 = vmatprep.subr.bf16.mxu0 %v9585_v12  ;;  %10234 = vrot.lane.b32.xlu0 %v11364_v0, %s10975_s25  ;;  %s14125_s25 = scalar_lea.hbm %s14180_s4, %s8156_s10 }
 0x529   : > { %10477 = vpow2.f32 %v2991_v25  ;;  %v2977_v59 = vmul.f32 1.442695, %v2953_v18  ;;  %4273 = vrot.lane.b32.xlu1 %v11569_v54, %s10976_s7 }
 0x52a   : > { %v2979_v60 = vmul.f32 1.442695, %v2954_v30  ;;  %v2892_v50 = vpop.xlane.xlu0 %2891  ;;  %v10162_v30 = vunpack.i.h.bf16 %v12184_v15 }
 0x52b   : > { %10479 = vpow2.f32 %v2977_v59  ;;  %v2956_v29 = vsub.f32 %v12084_v10, %v2892_v50  ;;  %9588 = vmatpush3.bf16.msra.mxu0 %v9585_v12  ;;  %v2922_v8 = vpop.xlane.xlu1 %2921  ;;  %v10151_v12 = vunpack.i.l.bf16 %v12176_v49  ;;  %v10161_v59 = vunpack.i.l.bf16 %v12184_v15 }
 0x52c   : > { %10481 = vpow2.f32 %v2979_v60  ;;  %9598 = vmatprep.subr.bf16.mxu0 %v12245_v22  ;;  %4152 = vrot.lane.b32.xlu0 %v11483_v23, %s10976_s7  ;;  %v2966_v53 = vsub.f32 %v12094_v9, %v2922_v8 }
 0x52d   : > { %4390 = vrot.lane.b32.xlu1 %v11551_v62, %s10976_s7  ;;  %v2983_v25 = vmul.f32 1.442695, %v2956_v29 }
 0x52e   : > { %v2889_v34 = vpop.xlane.xlu0 %2888  ;;  %v3003_v10 = vmul.f32 1.442695, %v2966_v53 }
 0x52f   : > { %v2955_v52 = vsub.f32 %v12088_v7, %v2889_v34  ;;  %v2919_v40 = vpop.xlane.xlu1 %2918  ;;  %10483 = vpow2.f32 %v2983_v25  ;;  %v10152_v7 = vunpack.i.h.bf16 %v12176_v49 }
 0x530   : > { %v2965_v50 = vsub.f32 %v12096_v19, %v2919_v40  ;;  %4039 = vrot.lane.b32.xlu0 %v11527_v43, %s10976_s7  ;;  %v12293_v40 = vpack.c.bf16 %v10162_v30, %v10161_v59  ;;  %v10196_v30 = vunpack.i.l.bf16 %v12198_v57 }
 0x531   : > { %v2981_v56 = vmul.f32 1.442695, %v2955_v52  ;;  %10244 = vrot.lane.b32.xlu1 %v11259_v32, %s10977_s29  ;;  %v9577_v29 = vpack.c.bf16 %v10152_v7, %v10151_v12  ;;  %v10182_v52 = vunpack.i.h.bf16 %v12190_v20 }
 0x532   : > { %v12260_v9 = vpop.eup %10475  ;;  %v3001_v48 = vmul.f32 1.442695, %v2965_v50 }
 0x533   : > { %14422 = vst [vmem:[#allocation85_spill] sm:$0xff] %v12260_v9  ;;  %v12262_v5 = vpop.eup %10477  ;;  %10485 = vpow2.f32 %v2981_v56  ;;  %8918 = vmatprep.mubr.msk.f32.mxu0 %vm276_vm0, %v12260_v9 }
 0x534   : > { %14423 = vst [vmem:[#allocation86_spill] sm:$0xff] %v12262_v5  ;;  %10487 = vpow2.f32 %v3001_v48  ;;  %8919 = vmatmul.mubr.msk.f32.gmra.mrb[58].mxu0 %vm276_vm0, %v12262_v5  ;;  %4267 = vrot.lane.b32.xlu0 %v11532_v38, %s10976_s7 }
 0x535   : > { %v12272_v19 = vpop.eup %10479  ;;  %10489 = vpow2.f32 %v3003_v10  ;;  %10254 = vrot.lane.b32.xlu1 %v11283_v39, %s10977_s29 }
 0x536   : > { %14424 = vst [vmem:[#allocation87_spill] sm:$0xff] %v12272_v19  ;;  %v12276_v18 = vpop.eup %10481  ;;  %8901 = vmatprep.mubr.msk.f32.mxu1 %vm276_vm0, %v12272_v19  ;;  %v2928_v49 = vpop.xlane.xlu0 %2927 }
 0x537   : > { %14425 = vst [vmem:[#allocation88_spill] sm:$0xff] %v12276_v18  ;;  %8902 = vmatmul.mubr.msk.f32.vlgmr.msra.gmra.mrb[40].mxu1 %vm276_vm0, %v12276_v18  ;;  %v2968_v60 = vsub.f32 %v12114_v4, %v2928_v49  ;;  %v2925_v8 = vpop.xlane.xlu1 %2924  ;;  %v10181_v4 = vunpack.i.l.bf16 %v12190_v20  ;;  %v10197_v49 = vunpack.i.h.bf16 %v12198_v57 }
 0x538   : > { %9576 = vmatpush3.bf16.msra.mxu1 %v12015_v13  ;;  %v2967_v53 = vsub.f32 %v12116_v35, %v2925_v8  ;;  %4154 = vrot.lane.b32.xlu0 %v11488_v44, %s10976_s7 }
 0x539   : > { %v3007_v25 = vmul.f32 1.442695, %v2968_v60  ;;  %9578 = vmatprep.subr.bf16.mxu1 %v9577_v29  ;;  %10264 = vrot.lane.b32.xlu1 %v11293_v42, %s10977_s29  ;;  %v12295_v13 = vpop.eup %10483  ;;  %v9601_v12 = vpack.c.bf16 %v10182_v52, %v10181_v4 }
 0x53a   : > { %v3005_v15 = vmul.f32 1.442695, %v2967_v53  ;;  %v2910_v34 = vpop.xlane.xlu0 %2909  ;;  %14426 = vst [vmem:[#allocation89_spill] sm:$0xff] %v12295_v13 }
 0x53b   : > { %v2943_v50 = vpop.xlane.xlu1 %2942  ;;  %v2962_v35 = vsub.f32 %v12104_v21, %v2910_v34 }
 0x53c   : > { %10491 = vpow2.f32 %v3005_v15  ;;  %9580 = vmatpush3.bf16.msra.mxu1 %v9577_v29  ;;  %v2973_v10 = vsub.f32 %v12124_v24, %v2943_v50  ;;  %4384 = vrot.lane.b32.xlu0 %v11504_v31, %s10976_s7  ;;  %v12326_v29 = vpack.c.bf16 %v10197_v49, %v10196_v30  ;;  %v10171_v50 = vunpack.i.l.bf16 %v12162_v1 }
 0x53d   : > { %v12301_v56 = vpop.eup %10485  ;;  %10493 = vpow2.f32 %v3007_v25  ;;  %9590 = vmatprep.subr.bf16.mxu1 %v12293_v40  ;;  %10274 = vrot.lane.b32.xlu1 %v11320_v51, %s10977_s29  ;;  %v2995_v59 = vmul.f32 1.442695, %v2962_v35 }
 0x53e   : > { %14427 = vst [vmem:[#allocation90_spill] sm:$0xff] %v12301_v56  ;;  %v12306_v20 = vpop.eup %10487  ;;  %v3017_v48 = vmul.f32 1.442695, %v2973_v10  ;;  %8904 = vmatprep.mubr.msk.f32.mxu1 %vm276_vm0, %v12301_v56  ;;  %v2907_v21 = vpop.xlane.xlu0 %2906 }
 0x53f   : > { %14428 = vst [vmem:[#allocation91_spill] sm:$0xff] %v12306_v20  ;;  %v12310_v7 = vpop.eup %10489  ;;  %8905 = vmatmul.mubr.msk.f32.gmra.mrb[42].mxu1 %vm276_vm0, %v12295_v13  ;;  %8943 = vmatprep.mubr.msk.f32.mxu0 %vm276_vm0, %v12306_v20  ;;  %v2961_v24 = vsub.f32 %v12108_v46, %v2907_v21 }
 0x540   : > { %14429 = vst [vmem:[#allocation92_spill] sm:$0xff] %v12310_v7  ;;  %10495 = vpow2.f32 %v3017_v48  ;;  %8944 = vmatmul.mubr.msk.f32.vlgmr.msra.gmra.mrb[60].mxu0 %vm276_vm0, %v12310_v7  ;;  %4271 = vrot.lane.b32.xlu0 %v11562_v26, %s10976_s7 }
 0x541   : > { %v2993_v60 = vmul.f32 1.442695, %v2961_v24  ;;  %9600 = vmatpush3.bf16.msra.mxu0 %v12245_v22  ;;  %10284 = vrot.lane.b32.xlu1 %v11334_v55, %s10977_s29 }
 0x542   : > { %9602 = vmatprep.subr.bf16.mxu0 %v9601_v12  ;;  %v2916_v46 = vpop.xlane.xlu0 %2915 }
 0x543   : > { %10497 = vpow2.f32 %v2993_v60  ;;  %v2964_v57 = vsub.f32 %v12110_v11, %v2916_v46  ;;  %v14437_v46 = vld [vmem:[#allocation14_spill] sm:$0xff] }
 0x544   : > { %10499 = vpow2.f32 %v2995_v59  ;;  %4388 = vrot.lane.b32.xlu0 %v11542_v16, %s10976_s7  ;;  %v2949_v8 = vpop.xlane.xlu1 %2948  ;;  %v14436_v59 = vld [vmem:[#allocation77_spill] sm:$0xff]  ;;  %s10893_s7 = scalar_lea.vmem %s14127_s11, 3072 }
 0x545   : > { %9604 = vmatpush3.bf16.msra.mxu0 %v9601_v12  ;;  %10289 = vrot.lane.b32.xlu1 %v11354_v61, %s10977_s29  ;;  %v2999_v11 = vmul.f32 1.442695, %v2964_v57  ;;  %v2975_v34 = vsub.f32 %v12142_v14, %v2949_v8  ;;  %v14435_v12 = vld [vmem:[#allocation80_spill] sm:$0xff]  ;;  %p10894_p11 = scmp.ne.s32.totalorder %s14127_s11, %s10893_s7 }
 0x546   : > { %v12333_v22 = vpop.eup %10491  ;;  %9619 = vmatprep.subr.msk.bf16.mxu0 %vm11411_vm2, %v12326_v29  ;;  %v2913_v53 = vpop.xlane.xlu0 %2912  ;;  %v10187_v49 = vunpack.i.h.bf16 %v14435_v12  ;;  %v10186_v30 = vunpack.i.l.bf16 %v14435_v12  ;;  %v14444_v12 = vld [vmem:[#allocation12_spill] sm:$0xff] }
 0x547   : > { %14430 = vst [vmem:[#allocation93_spill] sm:$0xff] %v12333_v22  ;;  %v12338_v25 = vpop.eup %10493  ;;  %v2963_v15 = vsub.f32 %v12112_v27, %v2913_v53  ;;  %8946 = vmatprep.mubr.msk.f32.mxu0 %vm276_vm0, %v12333_v22  ;;  %v10172_v27 = vunpack.i.h.bf16 %v12162_v1  ;;  %v3021_v10 = vmul.f32 1.442695, %v2975_v34  ;;  %p10895_p2 = pnand %p10894_p11, %p14689_p0 }
 0x548   : > { %14431 = vst [vmem:[#allocation94_spill] sm:$0xff] %v12338_v25  ;;  %8947 = vmatmul.mubr.msk.f32.gmra.mrb[62].mxu0 %vm276_vm0, %v12338_v25  ;;  %10249 = vrot.lane.b32.xlu0 %v11273_v36, %s10977_s29  ;;  %v9605_v53 = vpack.c.bf16 %v10187_v49, %v10186_v30 }
 0x549   : > { %v2997_v52 = vmul.f32 1.442695, %v2963_v15  ;;  %10294 = vrot.lane.b32.xlu1 %v11364_v0, %s10977_s29  ;;  %v9593_v24 = vpack.c.bf16 %v10172_v27, %v10171_v50  ;;  %v14438_v15 = vld [vmem:[#allocation75_spill] sm:$0xff]  ;;  %p10896_p3 = pneg %p10895_p2 }
 0x54a   : > { %v12350_v4 = vpop.eup %10495  ;;  %v2946_v35 = vpop.xlane.xlu0 %2945 }
 0x54b   : > { %14432 = vst [vmem:[#allocation95_spill] sm:$0xff] %v12350_v4  ;;  %10501 = vpow2.f32 %v2997_v52  ;;  %v2974_v14 = vsub.f32 %v12122_v47, %v2946_v35  ;;  %8971 = vmatprep.mubr.msk.f32.mxu0 %vm276_vm0, %v12350_v4  ;;  %v14441_v52 = vld [vmem:[#allocation82_spill] sm:$0xff] }
 0x54c   : > { %10503 = vpow2.f32 %v2999_v11  ;;  %10259 = vrot.lane.b32.xlu0 %v14353_v45, %s10977_s29  ;;  %v10202_v27 = vunpack.i.h.bf16 %v14441_v52  ;;  %v10201_v50 = vunpack.i.l.bf16 %v14441_v52  ;;  %v14448_v52 = vld [vmem:[#allocation81_spill] sm:$0xff] }
 0x54d   : > { %v12359_v48 = vpop.eup %10497  ;;  %v3019_v21 = vmul.f32 1.442695, %v2974_v14  ;;  %10304 = vrot.lane.b32.xlu1 %v11259_v32, %s10978_s30  ;;  %v14442_v14 = vld [vmem:[#allocation76_spill] sm:$0xff] }
 0x54e   : > { %14433 = vst [vmem:[#allocation96_spill] sm:$0xff] %v12359_v48  ;;  %v12363_v1 = vpop.eup %10499  ;;  %8929 = vmatprep.mubr.msk.f32.mxu1 %vm276_vm0, %v12359_v48  ;;  %v2952_v47 = vpop.xlane.xlu0 %2951  ;;  %v9623_v30 = vpack.c.bf16 %v10202_v27, %v10201_v50  ;;  %v10192_v27 = vunpack.i.h.bf16 %v14448_v52  ;;  %v10191_v50 = vunpack.i.l.bf16 %v14448_v52 }
 0x54f   : > { %14434 = vst [vmem:[#allocation97_spill] sm:$0xff] %v12363_v1  ;;  %10505 = vpow2.f32 %v3019_v21  ;;  %v2976_v60 = vsub.f32 %v14436_v59, %v2952_v47  ;;  %8930 = vmatmul.mubr.msk.f32.vlgmr.msra.gmra.mrb[44].mxu1 %vm276_vm0, %v12363_v1 }
 0x550   : > { %10507 = vpow2.f32 %v3021_v10  ;;  %9592 = vmatpush3.bf16.msra.mxu1 %v12293_v40  ;;  %10269 = vrot.lane.b32.xlu0 %v14437_v46, %s10977_s29 }
 0x551   : > { %v3023_v57 = vmul.f32 1.442695, %v2976_v60  ;;  %9594 = vmatprep.subr.bf16.mxu1 %v9593_v24  ;;  %10309 = vrot.lane.b32.xlu1 %v11273_v36, %s10978_s30 }
 0x552   : > { %v2934_v8 = vpop.xlane.xlu0 %2933 }
 0x553   : > { %10509 = vpow2.f32 %v3023_v57  ;;  %v2970_v11 = vsub.f32 %v14438_v15, %v2934_v8  ;;  %v3917_v57 = vpop.permute.xlu1 %3916 }
 0x554   : > { %9596 = vmatpush3.bf16.msra.mxu1 %v9593_v24  ;;  %10279 = vrot.lane.b32.xlu0 %v11344_v58, %s10977_s29 }
 0x555   : > { %v12380_v34 = vpop.eup %10501  ;;  %9607 = vmatprep.subr.msk.bf16.mxu1 %vm11411_vm2, %v9605_v53  ;;  %10319 = vrot.lane.b32.xlu1 %v11293_v42, %s10978_s30  ;;  %v3011_v21 = vmul.f32 1.442695, %v2970_v11 }
 0x556   : > { %14439 = vst [vmem:[#allocation80_spill] sm:$0xff] %v12380_v34  ;;  %v12386_v40 = vpop.eup %10503  ;;  %8932 = vmatprep.mubr.msk.f32.mxu1 %vm276_vm0, %v12380_v34  ;;  %v2931_v35 = vpop.xlane.xlu0 %2930 }
 0x557   : > { %14440 = vst [vmem:[#allocation77_spill] sm:$0xff] %v12386_v40  ;;  %v2969_v10 = vsub.f32 %v14442_v14, %v2931_v35  ;;  %8933 = vmatmul.mubr.msk.f32.gmra.mrb[46].mxu1 %vm276_vm0, %v12386_v40  ;;  %v14449_v35 = vld [vmem:[#allocation17_spill] sm:$0xff] }
 0x558   : > { %10299 = vrot.lane.b32.xlu0 %v11374_v3, %s10977_s29  ;;  %s10984_s29 = smov [#allocation8]  }
 0x559   : > { %v12397_v47 = vpop.eup %10505  ;;  %v3009_v24 = vmul.f32 1.442695, %v2969_v10  ;;  %5419 = vrot.lane.b32.xlu1 %v14444_v12, %s10979_s20  ;;  %v10206_v12 = vunpack.i.l.bf16 %v12206_v6 }
 0x55a   : > { %14443 = vst [vmem:[#allocation14_spill] sm:$0xff] %v12397_v47  ;;  %v12401_v49 = vpop.eup %10507  ;;  %8972 = vmatmul.mubr.msk.f32.vlgmr.msra.gmra.mrb[64].mxu0 %vm276_vm0, %v12397_v47  ;;  %v10215_v59 = vpop.permute.xlu0 %10214 }
 0x55b   : > { %14445 = vst [vmem:[#allocation75_spill] sm:$0xff] %v12401_v49  ;;  %10511 = vpow2.f32 %v3009_v24  ;;  %9622 = vmatpush3.bf16.xpose.msk.msra.mxu0 %vm11411_vm2, %v12326_v29  ;;  %8974 = vmatprep.mubr.msk.f32.mxu0 %vm276_vm0, %v12401_v49  ;;  %v10217_v8 = vunpack.i.h.bf16 %v10215_v59  ;;  %v10216_v15 = vunpack.i.l.bf16 %v10215_v59  ;;  %v14447_v29 = vld [vmem:[#allocation21_spill] sm:$0xff]  ;;  %v10207_v24 = vunpack.i.h.bf16 %v12206_v6 }
 0x55c   : > { %10513 = vpow2.f32 %v3011_v21  ;;  %9625 = vmatprep.subr.msk.bf16.mxu0 %vm11411_vm2, %v9623_v30  ;;  %10314 = vrot.lane.b32.xlu0 %v11283_v39, %s10978_s30  ;;  %v9611_v21 = vpack.c.bf16 %v10192_v27, %v10191_v50 }
 0x55d   : > { %v12414_v60 = vpop.eup %10509  ;;  %10329 = vrot.lane.b32.xlu1 %v14437_v46, %s10978_s30  ;;  %v9641_v11 = vpack.c.bf16 %v10217_v8, %v10216_v15 }
 0x55e   : > { %14446 = vst [vmem:[#allocation82_spill] sm:$0xff] %v12414_v60  ;;  %8975 = vmatmul.mubr.msk.f32.gmra.mrb[66].mxu0 %vm276_vm0, %v12414_v60 }
 0x55f   : > { %8999 = vmatprep.mubr.msk.f32.mxu0 %vm570_vm1, %v3917_v57  ;;  %v14452_v57 = vld [vmem:[#allocation79_spill] sm:$0xff] }
 0x560   : > { %10324 = vrot.lane.b32.xlu0 %v14353_v45, %s10978_s30 }
 0x561   : > { %5536 = vrot.lane.b32.xlu1 %v14447_v29, %s10979_s20 }
 0x563   : > { %9628 = vmatpush3.bf16.xpose.msk.msra.mxu0 %vm11411_vm2, %v9623_v30  ;;  %v9629_v30 = vpack.c.bf16 %v10207_v24, %v10206_v12  ;;  %v14454_v24 = vld [vmem:[#allocation78_spill] sm:$0xff] }
 0x564   : > { %9643 = vmatprep.subr.msk.bf16.mxu0 %vm11411_vm2, %v9641_v11  ;;  %5421 = vrot.lane.b32.xlu0 %v14449_v35, %s10979_s20 }
 0x565   : > { %v12433_v14 = vpop.eup %10511 }
 0x566   : > { %14450 = vst [vmem:[#allocation76_spill] sm:$0xff] %v12433_v14  ;;  %v12435_v10 = vpop.eup %10513  ;;  %8957 = vmatprep.mubr.msk.f32.mxu1 %vm276_vm0, %v12433_v14 }
 0x567   : > { %14451 = vst [vmem:[#allocation12_spill] sm:$0xff] %v12435_v10  ;;  %8958 = vmatmul.mubr.msk.f32.vlgmr.msra.gmra.mrb[48].mxu1 %vm276_vm0, %v12435_v10 }
 0x568   : > { %9610 = vmatpush3.bf16.xpose.msk.msra.mxu1 %vm11411_vm2, %v9605_v53  ;;  %10334 = vrot.lane.b32.xlu0 %v11320_v51, %s10978_s30 }
 0x569   : > { %9613 = vmatprep.subr.msk.bf16.mxu1 %vm11411_vm2, %v9611_v21 }
 0x570   : > { %9616 = vmatpush3.bf16.xpose.msk.msra.mxu1 %vm11411_vm2, %v9611_v21 }
 0x571   : > { %9631 = vmatprep.subr.msk.bf16.mxu1 %vm11411_vm2, %v9629_v30 }
 0x579   : > { %v2937_v59 = vpop.xlane.xlu1 %2936 }
 0x57a   : > { %v2971_v53 = vsub.f32 %v14452_v57, %v2937_v59 }
 0x57c   : > { %v3013_v8 = vmul.f32 1.442695, %v2971_v53 }
 0x57d   : > { %v3804_v15 = vpop.permute.xlu1 %3803 }
 0x57e   : > { %10515 = vpow2.f32 %v3013_v8 }
 0x581   : > { %v10220_v29 = vpop.permute.xlu1 %10219 }
 0x582   : > { %v10222_v35 = vunpack.i.h.bf16 %v10220_v29  ;;  %v10221_v21 = vunpack.i.l.bf16 %v10220_v29 }
 0x584   : > { %v9647_v59 = vpack.c.bf16 %v10222_v35, %v10221_v21 }
 0x585   : > { %v4034_v52 = vpop.permute.xlu1 %4033 }
 0x588   : > { %v12454_v27 = vpop.eup %10515 }
 0x589   : > { %14453 = vst [vmem:[#allocation21_spill] sm:$0xff] %v12454_v27  ;;  %8960 = vmatprep.mubr.msk.f32.mxu1 %vm276_vm0, %v12454_v27  ;;  %v3921_v6 = vpop.permute.xlu1 %3920 }
 0x58b   : > { %v2940_v50 = vpop.xlane.xlu0 %2939 }
 0x58c   : > { %v2972_v12 = vsub.f32 %v14454_v24, %v2940_v50 }
 0x58d   : > { %v10230_v60 = vpop.permute.xlu1 %10229 }
 0x58e   : > { %v3015_v49 = vmul.f32 1.442695, %v2972_v12 }
 0x58f   : > { %v3919_v47 = vpop.permute.xlu0 %3918 }
 0x590   : > { %10517 = vpow2.f32 %v3015_v49  ;;  %9000 = vmatmul.mubr.msk.f32.vlgmr.msra.gmra.mrb[68].mxu0 %vm570_vm1, %v3919_v47  ;;  %v14456_v49 = vld [vmem:[#allocation84_spill] sm:$0xff] }
 0x591   : > { %9646 = vmatpush3.bf16.xpose.msk.msra.mxu0 %vm11411_vm2, %v9641_v11  ;;  %v4151_v57 = vpop.permute.xlu1 %4150  ;;  %9002 = vmatprep.mubr.msk.f32.mxu0 %vm570_vm1, %v3921_v6  ;;  %v10212_v47 = vunpack.i.h.bf16 %v14456_v49  ;;  %v10211_v21 = vunpack.i.l.bf16 %v14456_v49  ;;  %v14457_v6 = vld [vmem:[#allocation83_spill] sm:$0xff] }
 0x592   : > { %9649 = vmatprep.subr.msk.bf16.mxu0 %vm11411_vm2, %v9647_v59 }
 0x593   : > { %v3806_v53 = vpop.permute.xlu0 %3805  ;;  %v9635_v12 = vpack.c.bf16 %v10212_v47, %v10211_v21 }
 0x595   : > { %v4038_v8 = vpop.permute.xlu1 %4037 }
 0x597   : > { %v10225_v29 = vpop.permute.xlu0 %10224 }
 0x598   : > { %v10227_v49 = vunpack.i.h.bf16 %v10225_v29 }
 0x599   : > { %v10240_v50 = vpop.permute.xlu1 %10239  ;;  %9652 = vmatpush3.bf16.xpose.msk.msra.mxu0 %vm11411_vm2, %v9647_v59 }
 0x59a   : > { %v12467_v35 = vpop.eup %10517 }
 0x59b   : > { %14455 = vst [vmem:[#allocation81_spill] sm:$0xff] %v12467_v35  ;;  %v4036_v11 = vpop.permute.xlu0 %4035  ;;  %8961 = vmatmul.mubr.msk.f32.gmra.mrb[50].mxu1 %vm276_vm0, %v12467_v35  ;;  %v10241_v35 = vunpack.i.l.bf16 %v10240_v50 }
 0x59c   : > { %8985 = vmatprep.mubr.msk.f32.mxu1 %vm570_vm1, %v14457_v6  ;;  %v10226_v6 = vunpack.i.l.bf16 %v10225_v29  ;;  %v10231_v29 = vunpack.i.l.bf16 %v10230_v60 }
 0x59d   : > { %v12475_v24 = vpop.permute.xlu1 %4269 }
 0x59f   : > { %v3923_v4 = vpop.permute.xlu0 %3922  ;;  %8986 = vmatmul.mubr.msk.f32.vlgmr.msra.gmra.mrb[52].mxu1 %vm570_vm1, %v12216_v63 }
 0x5a0   : > { %9634 = vmatpush3.bf16.xpose.msk.msra.mxu1 %vm11411_vm2, %v9629_v30  ;;  %8988 = vmatprep.mubr.msk.f32.mxu1 %vm570_vm1, %v3804_v15  ;;  %v10242_v30 = vunpack.i.h.bf16 %v10240_v50 }
 0x5a1   : > { %9003 = vmatmul.mubr.msk.f32.gmra.mrb[70].mxu0 %vm570_vm1, %v3923_v4  ;;  %9637 = vmatprep.subr.msk.bf16.mxu1 %vm11411_vm2, %v9635_v12  ;;  %v4157_v59 = vpop.permute.xlu1 %4156  ;;  %v9653_v4 = vpack.c.bf16 %v10227_v49, %v10226_v6 }
 0x5a2   : > { %9027 = vmatprep.mubr.msk.f32.mxu0 %vm570_vm1, %v4151_v57  ;;  %v9671_v57 = vpack.c.bf16 %v10242_v30, %v10241_v35 }
 0x5a3   : > { %v10235_v47 = vpop.permute.xlu0 %10234  ;;  %8989 = vmatmul.mubr.msk.f32.gmra.mrb[54].mxu1 %vm570_vm1, %v3806_v53 }
 0x5a4   : > { %v10237_v21 = vunpack.i.h.bf16 %v10235_v47  ;;  %v10236_v63 = vunpack.i.l.bf16 %v10235_v47  ;;  %9013 = vmatprep.mubr.msk.f32.mxu1 %vm570_vm1, %v4034_v52  ;;  %v10232_v52 = vunpack.i.h.bf16 %v10230_v60 }
 0x5a5   : > { %v4387_v15 = vpop.permute.xlu1 %4386 }
 0x5a6   : > { %v9665_v27 = vpack.c.bf16 %v10237_v21, %v10236_v63  ;;  %v9659_v49 = vpack.c.bf16 %v10232_v52, %v10231_v29 }
 0x5a7   : > { %v4153_v10 = vpop.permute.xlu0 %4152 }
 0x5a8   : > { %9640 = vmatpush3.bf16.xpose.msk.msra.mxu1 %vm11411_vm2, %v9635_v12  ;;  %9028 = vmatmul.mubr.msk.f32.vlgmr.msra.gmra.mrb[72].mxu0 %vm570_vm1, %v4153_v10 }
 0x5a9   : > { %9655 = vmatprep.subr.msk.bf16.mxu1 %vm11411_vm2, %v9653_v4  ;;  %v4274_v53 = vpop.permute.xlu1 %4273  ;;  %9667 = vmatprep.subr.msk.bf16.mxu0 %vm11411_vm2, %v9665_v27 }
 0x5aa   : > { %9670 = vmatpush3.bf16.xpose.msk.msra.mxu0 %vm11411_vm2, %v9665_v27 }
 0x5ab   : > { %9673 = vmatprep.subr.msk.bf16.mxu0 %vm11411_vm2, %v9671_v57  ;;  %v4040_v50 = vpop.permute.xlu0 %4039 }
 0x5ad   : > { %v4391_v12 = vpop.permute.xlu1 %4390 }
 0x5af   : > { %9014 = vmatmul.mubr.msk.f32.vlgmr.msra.gmra.mrb[56].mxu1 %vm570_vm1, %v4036_v11  ;;  %v4268_v10 = vpop.permute.xlu0 %4267 }
 0x5b0   : > { %9016 = vmatprep.mubr.msk.f32.mxu1 %vm570_vm1, %v4038_v8  ;;  %9658 = vmatpush3.bf16.xpose.msk.msra.mxu1 %vm11411_vm2, %v9653_v4 }
 0x5b1   : > { %v10245_v35 = vpop.permute.xlu1 %10244  ;;  %9661 = vmatprep.subr.msk.bf16.mxu1 %vm11411_vm2, %v9659_v49 }
 0x5b2   : > { %9676 = vmatpush3.bf16.xpose.msk.msra.mxu0 %vm11411_vm2, %v9671_v57  ;;  %v10247_v60 = vunpack.i.h.bf16 %v10245_v35  ;;  %v10246_v27 = vunpack.i.l.bf16 %v10245_v35 }
 0x5b3   : > { %9017 = vmatmul.mubr.msk.f32.gmra.mrb[58].mxu1 %vm570_vm1, %v4040_v50  ;;  %v4155_v6 = vpop.permute.xlu0 %4154 }
 0x5b4   : > { %9041 = vmatprep.mubr.msk.f32.mxu1 %vm570_vm1, %v4268_v10  ;;  %9030 = vmatprep.mubr.msk.f32.mxu0 %vm570_vm1, %v4155_v6  ;;  %v9677_v63 = vpack.c.bf16 %v10247_v60, %v10246_v27 }
 0x5b5   : > { %v10255_v8 = vpop.permute.xlu1 %10254  ;;  %9031 = vmatmul.mubr.msk.f32.gmra.mrb[74].mxu0 %vm570_vm1, %v4157_v59 }
 0x5b6   : > { %v10257_v11 = vunpack.i.h.bf16 %v10255_v8  ;;  %v10256_v47 = vunpack.i.l.bf16 %v10255_v8 }
 0x5b7   : > { %v4385_v21 = vpop.permute.xlu0 %4384 }
 0x5b8   : > { %9664 = vmatpush3.bf16.xpose.msk.msra.mxu1 %vm11411_vm2, %v9659_v49  ;;  %9055 = vmatprep.mubr.msk.f32.mxu0 %vm570_vm1, %v4385_v21  ;;  %v9685_v30 = vpack.c.bf16 %v10257_v11, %v10256_v47 }
 0x5b9   : > { %v10265_v4 = vpop.permute.xlu1 %10264  ;;  %9678 = vmatprep.subr.bf16.mxu1 %v9677_v63  ;;  %9056 = vmatmul.mubr.msk.f32.vlgmr.msra.gmra.mrb[76].mxu0 %vm570_vm1, %v4387_v15 }
 0x5ba   : > { %v10267_v57 = vunpack.i.h.bf16 %v10265_v4  ;;  %v10266_v52 = vunpack.i.l.bf16 %v10265_v4  ;;  %9686 = vmatprep.subr.bf16.mxu0 %v9685_v30 }
 0x5bb   : > { %9688 = vmatpush3.bf16.msra.mxu0 %v9685_v30  ;;  %v4272_v29 = vpop.permute.xlu0 %4271 }
 0x5bc   : > { %v9689_v59 = vpack.c.bf16 %v10267_v57, %v10266_v52 }
 0x5bd   : > { %v10275_v50 = vpop.permute.xlu1 %10274 }
 0x5be   : > { %v10277_v10 = vunpack.i.h.bf16 %v10275_v50  ;;  %v10276_v35 = vunpack.i.l.bf16 %v10275_v50  ;;  %9690 = vmatprep.subr.bf16.mxu0 %v9689_v59 }
 0x5bf   : > { %9042 = vmatmul.mubr.msk.f32.vlgmr.msra.gmra.mrb[60].mxu1 %vm570_vm1, %v12475_v24  ;;  %9692 = vmatpush3.bf16.msra.mxu0 %v9689_v59  ;;  %v4389_v49 = vpop.permute.xlu0 %4388 }
 0x5c0   : > { %9044 = vmatprep.mubr.msk.f32.mxu1 %vm570_vm1, %v4272_v29  ;;  %9680 = vmatpush3.bf16.msra.mxu1 %v9677_v63  ;;  %v12518_v60 = vpack.c.bf16 %v10277_v10, %v10276_v35 }
 0x5c1   : > { %9058 = vmatprep.mubr.msk.f32.mxu0 %vm570_vm1, %v4389_v49 }
 0x5c2   : > { %9059 = vmatmul.mubr.msk.f32.gmra.mrb[78].mxu0 %vm570_vm1, %v4391_v12  ;;  %9702 = vmatprep.subr.bf16.mxu0 %v12518_v60 }
 0x5c3   : > { %9045 = vmatmul.mubr.msk.f32.gmra.mrb[62].mxu1 %vm570_vm1, %v4274_v53  ;;  %v10250_v15 = vpop.permute.xlu0 %10249 }
 0x5c4   : > { %v10252_v27 = vunpack.i.h.bf16 %v10250_v15  ;;  %v10251_v6 = vunpack.i.l.bf16 %v10250_v15 }
 0x5c6   : > { %v9681_v8 = vpack.c.bf16 %v10252_v27, %v10251_v6 }
 0x5c7   : > { %v10260_v24 = vpop.permute.xlu0 %10259 }
 0x5c8   : > { %v10262_v11 = vunpack.i.h.bf16 %v10260_v24  ;;  %v10261_v47 = vunpack.i.l.bf16 %v10260_v24  ;;  %9682 = vmatprep.subr.bf16.mxu1 %v9681_v8 }
 0x5c9   : > { %9684 = vmatpush3.bf16.msra.mxu1 %v9681_v8 }
 0x5ca   : > { %v12524_v21 = vpack.c.bf16 %v10262_v11, %v10261_v47 }
 0x5cc   : > { %9694 = vmatprep.subr.bf16.mxu1 %v12524_v21 }
 0x5f9   : > { %v12527_v63 = vpop.f32.mrb[56].mxu0 }
 0x5fa   : > { %14458 = vst [vmem:[#allocation17_spill] sm:$0xff] %v12527_v63  ;;  %v12529_v12 = vpop.f32.mrb[57].mxu0 }
 0x5fb   : > { %14459 = vst [vmem:[#allocation79_spill] sm:$0xff] %v12529_v12 }
 0x607   : > { %v12531_v30 = vpop.f32.mrb[58].mxu0 }
 0x608   : > { %14460 = vst [vmem:[#allocation78_spill] sm:$0xff] %v12531_v30  ;;  %v12533_v53 = vpop.f32.mrb[59].mxu0 }
 0x609   : > { %14461 = vst [vmem:[#allocation84_spill] sm:$0xff] %v12533_v53 }
 0x60a   : > { %v12535_v4 = vpop.f32.mrb[40].mxu1 }
 0x60b   : > { %14462 = vst [vmem:[#allocation83_spill] sm:$0xff] %v12535_v4  ;;  %v12537_v57 = vpop.f32.mrb[41].mxu1 }
 0x60c   : > { %14463 = vst [vmem:[#allocation98_spill] sm:$0xff] %v12537_v57 }
 0x612   : > { %v12539_v52 = vpop.f32.mrb[42].mxu1 }
 0x613   : > { %14464 = vst [vmem:[#allocation99_spill] sm:$0xff] %v12539_v52  ;;  %v12541_v29 = vpop.f32.mrb[43].mxu1  ;;  %v12543_v59 = vpop.f32.mrb[60].mxu0 }
 0x614   : > { %14465 = vst [vmem:[#allocation100_spill] sm:$0xff] %v12541_v29  ;;  %14466 = vst [vmem:[#allocation101_spill] sm:$0xff] %v12543_v59  ;;  %v12545_v50 = vpop.f32.mrb[61].mxu0 }
 0x615   : > { %14467 = vst [vmem:[#allocation102_spill] sm:$0xff] %v12545_v50 }
 0x61b   : > { %v12547_v10 = vpop.f32.mrb[62].mxu0 }
 0x61c   : > { %14468 = vst [vmem:[#allocation103_spill] sm:$0xff] %v12547_v10  ;;  %v12549_v35 = vpop.f32.mrb[63].mxu0 }
 0x61d   : > { %14469 = vst [vmem:[#allocation104_spill] sm:$0xff] %v12549_v35 }
 0x622   : > { %v12551_v49 = vpop.f32.mrb[44].mxu1 }
 0x623   : > { %14470 = vst [vmem:[#allocation105_spill] sm:$0xff] %v12551_v49  ;;  %v12553_v15 = vpop.f32.mrb[45].mxu1 }
 0x624   : > { %14471 = vst [vmem:[#allocation106_spill] sm:$0xff] %v12553_v15 }
 0x62a   : > { %v12555_v27 = vpop.f32.mrb[46].mxu1 }
 0x62b   : > { %14472 = vst [vmem:[#allocation107_spill] sm:$0xff] %v12555_v27  ;;  %v12557_v6 = vpop.f32.mrb[47].mxu1 }
 0x62c   : > { %14473 = vst [vmem:[#allocation108_spill] sm:$0xff] %v12557_v6 }
 0x62d   : > { %v12559_v8 = vpop.f32.mrb[64].mxu0 }
 0x62e   : > { %14474 = vst [vmem:[#allocation109_spill] sm:$0xff] %v12559_v8  ;;  %v12561_v24 = vpop.f32.mrb[65].mxu0 }
 0x62f   : > { %14475 = vst [vmem:[#allocation110_spill] sm:$0xff] %v12561_v24 }
 0x631   : > { %v12563_v11 = vpop.f32.mrb[66].mxu0 }
 0x632   : > { %14476 = vst [vmem:[#allocation111_spill] sm:$0xff] %v12563_v11  ;;  %v12565_v47 = vpop.f32.mrb[67].mxu0 }
 0x633   : > { %14477 = vst [vmem:[#allocation112_spill] sm:$0xff] %v12565_v47 }
 0x63a   : > { %v12567_v30 = vpop.f32.mrb[48].mxu1 }
 0x63b   : > { %14478 = vst [vmem:[#allocation113_spill] sm:$0xff] %v12567_v30  ;;  %v12569_v53 = vpop.f32.mrb[49].mxu1 }
 0x63c   : > { %14479 = vst [vmem:[#allocation114_spill] sm:$0xff] %v12569_v53 }
 0x663   : > { %v12571_v63 = vpop.f32.mrb[68].mxu0 }
 0x664   : > { %v12573_v49 = vpop.f32.mrb[69].mxu0  ;;  %v4516_v15 = vsel %vm276_vm0, %v12571_v63, -inf }
 0x665   : > { %4517 = vmax.xlane.f32.xlu1 %v4516_v15  ;;  %v4513_v8 = vsel %vm276_vm0, %v12573_v49, -inf }
 0x669   : > { %4514 = vmax.xlane.f32.xlu1 %v4513_v8 }
 0x66e   : > { %v12579_v24 = vpop.f32.mrb[50].mxu1 }
 0x66f   : > { %14480 = vst [vmem:[#allocation115_spill] sm:$0xff] %v12579_v24  ;;  %v12581_v11 = vpop.f32.mrb[51].mxu1 }
 0x670   : > { %14481 = vst [vmem:[#allocation116_spill] sm:$0xff] %v12581_v11 }
 0x672   : > { %v12583_v47 = vpop.f32.mrb[52].mxu1 }
 0x673   : > { %v12585_v12 = vpop.f32.mrb[53].mxu1  ;;  %v4504_v29 = vsel %vm276_vm0, %v12583_v47, -inf }
 0x674   : > { %v12587_v30 = vpop.f32.mrb[70].mxu0  ;;  %v4501_v11 = vsel %vm276_vm0, %v12585_v12, -inf }
 0x675   : > { %v12589_v53 = vpop.f32.mrb[71].mxu0  ;;  %v4522_v52 = vsel %vm276_vm0, %v12587_v30, -inf }
 0x676   : > { %4523 = vmax.xlane.f32.xlu0 %v4522_v52  ;;  %v12593_v15 = vpop.f32.mrb[54].mxu1  ;;  %v4519_v8 = vsel %vm276_vm0, %v12589_v53, -inf }
 0x677   : > { %4520 = vmax.xlane.f32.xlu1 %v4519_v8  ;;  %v12597_v24 = vpop.f32.mrb[55].mxu1  ;;  %v4510_v8 = vsel %vm276_vm0, %v12593_v15, -inf }
 0x678   : > { %v4507_v4 = vsel %vm276_vm0, %v12597_v24, -inf }
 0x67a   : > { %4502 = vmax.xlane.f32.xlu0 %v4501_v11 }
 0x67b   : > { %4505 = vmax.xlane.f32.xlu1 %v4504_v29  ;;  %v12603_v10 = vpop.f32.mrb[72].mxu0 }
 0x67c   : > { %v12605_v35 = vpop.f32.mrb[73].mxu0  ;;  %v4540_v52 = vsel %vm276_vm0, %v12603_v10, -inf }
 0x67d   : > { %v4537_v29 = vsel %vm276_vm0, %v12605_v35, -inf }
 0x67e   : > { %4511 = vmax.xlane.f32.xlu0 %v4510_v8 }
 0x67f   : > { %4541 = vmax.xlane.f32.xlu1 %v4540_v52 }
 0x682   : > { %v12613_v11 = vpop.f32.mrb[56].mxu1  ;;  %4508 = vmax.xlane.f32.xlu0 %v4507_v4 }
 0x683   : > { %v12617_v57 = vpop.f32.mrb[57].mxu1  ;;  %4538 = vmax.xlane.f32.xlu1 %v4537_v29  ;;  %v4528_v29 = vsel %vm276_vm0, %v12613_v11, -inf }
 0x684   : > { %v4525_v48 = vsel %vm276_vm0, %v12617_v57, -inf }
 0x686   : > { %v12619_v59 = vpop.f32.mrb[58].mxu1 }
 0x687   : > { %v12621_v50 = vpop.f32.mrb[59].mxu1  ;;  %v4534_v5 = vsel %vm276_vm0, %v12619_v59, -inf }
 0x688   : > { %v12623_v27 = vpop.f32.mrb[74].mxu0 }
 0x689   : > { %v12625_v8 = vpop.f32.mrb[75].mxu0  ;;  %v4546_v52 = vsel %vm276_vm0, %v12623_v27, -inf }
 0x68a   : > { %4547 = vmax.xlane.f32.xlu0 %v4546_v52  ;;  %v4543_v4 = vsel %vm276_vm0, %v12625_v8, -inf }
 0x68b   : > { %4544 = vmax.xlane.f32.xlu1 %v4543_v4 }
 0x68c   : > { %v12631_v6 = vpop.f32.mrb[76].mxu0 }
 0x68d   : > { %v12633_v1 = vpop.f32.mrb[77].mxu0  ;;  %v4564_v7 = vsel %vm276_vm0, %v12631_v6, -inf }
 0x68e   : > { %4529 = vmax.xlane.f32.xlu0 %v4528_v29  ;;  %v4561_v14 = vsel %vm276_vm0, %v12633_v1, -inf }
 0x68f   : > { %4562 = vmax.xlane.f32.xlu1 %v4561_v14 }
 0x692   : > { %v12641_v52 = vpop.f32.mrb[60].mxu1  ;;  %4526 = vmax.xlane.f32.xlu0 %v4525_v48  ;;  %v4531_v48 = vsel %vm276_vm0, %v12621_v50, -inf }
 0x693   : > { %v12643_v25 = vpop.f32.mrb[61].mxu1 }
 0x694   : > { %14482 = vst [vmem:[#allocation117_spill] sm:$0xff] %v12643_v25 }
 0x695   : > { %v12645_v4 = vpop.f32.mrb[78].mxu0 }
 0x696   : > { %v12649_v22 = vpop.f32.mrb[62].mxu1  ;;  %v12651_v29 = vpop.f32.mrb[79].mxu0  ;;  %4535 = vmax.xlane.f32.xlu0 %v4534_v5  ;;  %v4570_v34 = vsel %vm276_vm0, %v12645_v4, -inf  ;;  %v4552_v5 = vsel %vm276_vm0, %v12641_v52, -inf }
 0x697   : > { %14483 = vst [vmem:[#allocation118_spill] sm:$0xff] %v12649_v22  ;;  %v12653_v9 = vpop.f32.mrb[63].mxu1  ;;  %v4567_v14 = vsel %vm276_vm0, %v12651_v29, -inf }
 0x698   : > { %14484 = vst [vmem:[#allocation119_spill] sm:$0xff] %v12653_v9  ;;  %4568 = vmax.xlane.f32.xlu1 %v4567_v14  ;;  %v4549_v14 = vsel %vm276_vm0, %v12643_v25, -inf }
 0x69a   : > { %4532 = vmax.xlane.f32.xlu0 %v4531_v48  ;;  %v10285_v48 = vpop.permute.xlu1 %10284 }
 0x69e   : > { %4565 = vmax.xlane.f32.xlu0 %v4564_v7  ;;  %v12671_v7 = vpop.permute.xlu1 %10289 }
 0x6a2   : > { %4571 = vmax.xlane.f32.xlu0 %v4570_v34  ;;  %v12673_v13 = vpop.permute.xlu1 %10294  ;;  %v4555_v34 = vsel %vm276_vm0, %v12653_v9, -inf  ;;  %v14489_v9 = vld [vmem:[#allocation23_spill] sm:$0xff] }
 0x6a6   : > { %4553 = vmax.xlane.f32.xlu0 %v4552_v5  ;;  %v12677_v5 = vpop.permute.xlu1 %10304 }
 0x6a9   : > { %5423 = vrot.lane.b32.xlu1 %v14485_v28, %s10979_s20  ;;  %v12681_v28 = vpop.permute.xlu0 %10269 }
 0x6aa   : > { %4550 = vmax.xlane.f32.xlu0 %v4549_v14  ;;  %v12679_v56 = vpop.permute.xlu1 %10309 }
 0x6ab   : > { %14486 = vst [vmem:[#allocation19_spill] sm:$0xff] %v12679_v56 }
 0x6ad   : > { %v12689_v14 = vpop.permute.xlu0 %10279 }
 0x6ae   : > { %v12683_v18 = vpop.permute.xlu1 %10319 }
 0x6b1   : > { %v12697_v20 = vpop.permute.xlu0 %10299 }
 0x6b2   : > { %v12691_v19 = vpop.permute.xlu1 %5419 }
 0x6b3   : > { %14487 = vst [vmem:[#allocation120_spill] sm:$0xff] %v12691_v19  ;;  %v14492_v19 = vld [vmem:[#allocation15_spill] sm:$0xff] }
 0x6b5   : > { %v12703_v40 = vpop.permute.xlu0 %10314 }
 0x6b6   : > { %v12699_v56 = vpop.permute.xlu1 %10329 }
 0x6c0   : > { %5538 = vrot.lane.b32.xlu0 %v14418_v2, %s10979_s20  ;;  %v4558_v2 = vsel %vm276_vm0, %v12649_v22, -inf  ;;  %v12711_v22 = vpop.permute.xlu0 %10324 }
 0x6c4   : > { %v12719_v25 = vpop.permute.xlu0 %5421 }
 0x6cd   : > { %4556 = vmax.xlane.f32.xlu1 %v4555_v34  ;;  %v14488_v34 = vld [vmem:[#allocation24_spill] sm:$0xff] }
 0x6ce   : > { %14490 = vst [vmem:[#allocation24_spill] sm:$0xff] %v12699_v56 }
 0x6de   : > { %10339 = vrot.lane.b32.xlu1 %v11334_v55, %s10978_s30 }
 0x6df   : > { %4559 = vmax.xlane.f32.xlu0 %v4558_v2  ;;  %v12705_v2 = vpop.permute.xlu1 %5536 }
 0x6e0   : > { %14491 = vst [vmem:[#allocation23_spill] sm:$0xff] %v12705_v2 }
 0x6e2   : > { %5653 = vrot.lane.b32.xlu1 %v14488_v34, %s10979_s20 }
 0x6e6   : > { %5540 = vrot.lane.b32.xlu1 %v14489_v9, %s10979_s20 }
 0x6ea   : > { %5542 = vrot.lane.b32.xlu1 %v11473_v37, %s10979_s20 }
 0x6ee   : > { %10349 = vrot.lane.b32.xlu1 %v11354_v61, %s10978_s30 }
 0x6f2   : > { %5770 = vrot.lane.b32.xlu1 %v14492_v19, %s10979_s20  ;;  %v4518_v34 = vpop.xlane.xlu1 %4517  ;;  %v12729_v19 = vpop.permute.xlu0 %10334 }
 0x6f3   : > { %v4578_v9 = vsub.f32 %v12571_v63, %v4518_v34  ;;  %v14495_v63 = vld [vmem:[#allocation27_spill] sm:$0xff] }
 0x6f5   : > { %5425 = vrot.lane.b32.xlu0 %v14419_v33, %s10979_s20  ;;  %v4607_v2 = vmul.f32 1.442695, %v4578_v9  ;;  %v14493_v33 = vld [vmem:[#allocation26_spill] sm:$0xff] }
 0x6f6   : > { %5774 = vrot.lane.b32.xlu1 %v11488_v44, %s10979_s20  ;;  %v4515_v37 = vpop.xlane.xlu1 %4514  ;;  %v14494_v44 = vld [vmem:[#allocation28_spill] sm:$0xff] }
 0x6f7   : > { %v4577_v56 = vsub.f32 %v12573_v49, %v4515_v37  ;;  %v10286_v49 = vunpack.i.l.bf16 %v10285_v48 }
 0x6f9   : > { %v4605_v61 = vmul.f32 1.442695, %v4577_v56  ;;  %10344 = vrot.lane.b32.xlu0 %v11344_v58, %s10978_s30  ;;  %v10287_v56 = vunpack.i.h.bf16 %v10285_v48 }
 0x6fa   : > { %10359 = vrot.lane.b32.xlu1 %v11374_v3, %s10978_s30 }
 0x6fb   : > { %10519 = vpow2.f32 %v4605_v61 }
 0x6fc   : > { %10521 = vpow2.f32 %v4607_v2 }
 0x6fd   : > { %5655 = vrot.lane.b32.xlu0 %v14493_v33, %s10979_s20 }
 0x6fe   : > { %5889 = vrot.lane.b32.xlu1 %v14494_v44, %s10979_s20 }
 0x701   : > { %5657 = vrot.lane.b32.xlu0 %v14495_v63, %s10979_s20 }
 0x702   : > { %5893 = vrot.lane.b32.xlu1 %v11569_v54, %s10979_s20  ;;  %v10297_v54 = vunpack.i.h.bf16 %v12673_v13 }
 0x703   : > { %v4524_v34 = vpop.xlane.xlu0 %4523 }
 0x704   : > { %v4580_v61 = vsub.f32 %v12587_v30, %v4524_v34  ;;  %v4521_v2 = vpop.xlane.xlu1 %4520  ;;  %v10296_v30 = vunpack.i.l.bf16 %v12673_v13 }
 0x705   : > { %v12736_v9 = vpop.eup %10519  ;;  %v4579_v37 = vsub.f32 %v12589_v53, %v4521_v2  ;;  %5659 = vrot.lane.b32.xlu0 %v11527_v43, %s10979_s20  ;;  %v9705_v53 = vpack.c.bf16 %v10287_v56, %v10286_v49 }
 0x706   : > { %v12741_v33 = vpop.eup %10521  ;;  %v4611_v44 = vmul.f32 1.442695, %v4580_v61  ;;  %6006 = vrot.lane.b32.xlu1 %v11539_v41, %s10979_s20  ;;  %9083 = vmatprep.mubr.msk.f32.mxu0 %vm276_vm0, %v12736_v9  ;;  %v12758_v56 = vpack.c.bf16 %v10297_v54, %v10296_v30  ;;  %v14496_v54 = vld [vmem:[#allocation25_spill] sm:$0xff] }
 0x707   : > { %v4609_v48 = vmul.f32 1.442695, %v4579_v37  ;;  %v4503_v63 = vpop.xlane.xlu0 %4502  ;;  %9084 = vmatmul.mubr.msk.f32.vlgmr.msra.gmra.mrb[80].mxu0 %vm276_vm0, %v12741_v33 }
 0x708   : > { %v4573_v43 = vsub.f32 %v12585_v12, %v4503_v63  ;;  %v4506_v34 = vpop.xlane.xlu1 %4505  ;;  %9704 = vmatpush3.bf16.msra.mxu0 %v12518_v60  ;;  %v10272_v63 = vunpack.i.h.bf16 %v12681_v28 }
 0x709   : > { %10523 = vpow2.f32 %v4609_v48  ;;  %v4574_v41 = vsub.f32 %v12583_v47, %v4506_v34  ;;  %9706 = vmatprep.subr.bf16.mxu0 %v9705_v53  ;;  %10354 = vrot.lane.b32.xlu0 %v11364_v0, %s10978_s30  ;;  %s10897_s30 = sshll.u32 %s10984_s29, 4  ;;  %s10898_s30 = int_to_ptr.vmem [resolvable:$false] %s10897_s30 }
 0x70a   : > { %10525 = vpow2.f32 %v4611_v44  ;;  %v4597_v13 = vmul.f32 1.442695, %v4573_v43  ;;  %6010 = vrot.lane.b32.xlu1 %v11551_v62, %s10979_s20  ;;  %v10281_v43 = vunpack.i.l.bf16 %v12689_v14  ;;  %p10900_p7 = scmp.lt.s32.totalorder %s14127_s11, %s10898_s30 }
 0x70b   : > { %v4599_v61 = vmul.f32 1.442695, %v4574_v41  ;;  %v4512_v2 = vpop.xlane.xlu0 %4511 }
 0x70c   : > { %10527 = vpow2.f32 %v4597_v13  ;;  %v4576_v12 = vsub.f32 %v12593_v15, %v4512_v2  ;;  %9708 = vmatpush3.bf16.msra.mxu0 %v9705_v53  ;;  %v4542_v60 = vpop.xlane.xlu1 %4541  ;;  %v10282_v53 = vunpack.i.h.bf16 %v12689_v14  ;;  %v10302_v2 = vunpack.i.h.bf16 %v12697_v20 }
 0x70d   : > { %10529 = vpow2.f32 %v4599_v61  ;;  %9718 = vmatprep.subr.bf16.mxu0 %v12758_v56  ;;  %5772 = vrot.lane.b32.xlu0 %v11483_v23, %s10979_s20  ;;  %v4586_v47 = vsub.f32 %v12603_v10, %v4542_v60 }
 0x70e   : > { %10369 = vrot.lane.b32.xlu1 %v11273_v36, %s10980_s24  ;;  %v4603_v62 = vmul.f32 1.442695, %v4576_v12  ;;  %v12806_v12 = vpack.c.bf16 %v10282_v53, %v10281_v43 }
 0x70f   : > { %v4509_v49 = vpop.xlane.xlu0 %4508  ;;  %v4623_v30 = vmul.f32 1.442695, %v4586_v47 }
 0x710   : > { %v4575_v37 = vsub.f32 %v12597_v24, %v4509_v49  ;;  %v4539_v44 = vpop.xlane.xlu1 %4538  ;;  %10531 = vpow2.f32 %v4603_v62  ;;  %v10271_v24 = vunpack.i.l.bf16 %v12681_v28  ;;  %v10316_v49 = vunpack.i.l.bf16 %v12703_v40 }
 0x711   : > { %v4585_v15 = vsub.f32 %v12605_v35, %v4539_v44  ;;  %5776 = vrot.lane.b32.xlu0 %v14496_v54, %s10979_s20 }
 0x712   : > { %v4601_v48 = vmul.f32 1.442695, %v4575_v37  ;;  %10379 = vrot.lane.b32.xlu1 %v14353_v45, %s10980_s24  ;;  %v9697_v34 = vpack.c.bf16 %v10272_v63, %v10271_v24  ;;  %v10292_v24 = vunpack.i.h.bf16 %v12671_v7 }
 0x713   : > { %v12773_v23 = vpop.eup %10523  ;;  %v4621_v10 = vmul.f32 1.442695, %v4585_v15 }
 0x714   : > { %v12775_v36 = vpop.eup %10525  ;;  %10533 = vpow2.f32 %v4601_v48  ;;  %9086 = vmatprep.mubr.msk.f32.mxu0 %vm276_vm0, %v12773_v23 }
 0x715   : > { %10535 = vpow2.f32 %v4621_v10  ;;  %9087 = vmatmul.mubr.msk.f32.gmra.mrb[82].mxu0 %vm276_vm0, %v12775_v36  ;;  %5887 = vrot.lane.b32.xlu0 %v11532_v38, %s10979_s20 }
 0x716   : > { %v12785_v45 = vpop.eup %10527  ;;  %10537 = vpow2.f32 %v4623_v30  ;;  %10389 = vrot.lane.b32.xlu1 %v14437_v46, %s10980_s24 }
 0x717   : > { %v12789_v35 = vpop.eup %10529  ;;  %9069 = vmatprep.mubr.msk.f32.mxu1 %vm276_vm0, %v12785_v45  ;;  %v4548_v28 = vpop.xlane.xlu0 %4547 }
 0x718   : > { %9070 = vmatmul.mubr.msk.f32.vlgmr.msra.gmra.mrb[64].mxu1 %vm276_vm0, %v12789_v35  ;;  %v4588_v38 = vsub.f32 %v12623_v27, %v4548_v28  ;;  %v4545_v41 = vpop.xlane.xlu1 %4544  ;;  %v10301_v27 = vunpack.i.l.bf16 %v12697_v20  ;;  %v10291_v28 = vunpack.i.l.bf16 %v12671_v7 }
 0x719   : > { %9696 = vmatpush3.bf16.msra.mxu1 %v12524_v21  ;;  %v4587_v46 = vsub.f32 %v12625_v8, %v4545_v41  ;;  %5891 = vrot.lane.b32.xlu0 %v11562_v26, %s10979_s20  ;;  %v10306_v41 = vunpack.i.l.bf16 %v12677_v5 }
 0x71a   : > { %v4627_v13 = vmul.f32 1.442695, %v4588_v38  ;;  %9698 = vmatprep.subr.bf16.mxu1 %v9697_v34  ;;  %10399 = vrot.lane.b32.xlu1 %v11334_v55, %s10980_s24  ;;  %v12808_v21 = vpop.eup %10531 }
 0x71b   : > { %v4625_v14 = vmul.f32 1.442695, %v4587_v46  ;;  %v4530_v61 = vpop.xlane.xlu0 %4529 }
 0x71c   : > { %v4563_v60 = vpop.xlane.xlu1 %4562  ;;  %v4582_v26 = vsub.f32 %v12613_v11, %v4530_v61 }
 0x71d   : > { %10539 = vpow2.f32 %v4625_v14  ;;  %9700 = vmatpush3.bf16.msra.mxu1 %v9697_v34  ;;  %v4593_v8 = vsub.f32 %v12633_v1, %v4563_v60  ;;  %6004 = vrot.lane.b32.xlu0 %v11504_v31, %s10979_s20  ;;  %v9721_v1 = vpack.c.bf16 %v10302_v2, %v10301_v27  ;;  %v9713_v34 = vpack.c.bf16 %v10292_v24, %v10291_v28  ;;  %v14498_v60 = vld [vmem:[#allocation16_spill] sm:$0xff] }
 0x71e   : > { %v12814_v55 = vpop.eup %10533  ;;  %10541 = vpow2.f32 %v4627_v13  ;;  %9710 = vmatprep.subr.bf16.mxu1 %v12806_v12  ;;  %10419 = vrot.lane.b32.xlu1 %v11374_v3, %s10980_s24  ;;  %v10317_v3 = vunpack.i.h.bf16 %v12703_v40  ;;  %v4615_v37 = vmul.f32 1.442695, %v4582_v26  ;;  %v10321_v2 = vunpack.i.l.bf16 %v12683_v18 }
 0x71f   : > { %v12819_v20 = vpop.eup %10535  ;;  %v4637_v47 = vmul.f32 1.442695, %v4593_v8  ;;  %9072 = vmatprep.mubr.msk.f32.mxu1 %vm276_vm0, %v12814_v55  ;;  %v4527_v11 = vpop.xlane.xlu0 %4526  ;;  %v10327_v24 = vunpack.i.h.bf16 %v12711_v22  ;;  %v10326_v28 = vunpack.i.l.bf16 %v12711_v22  ;;  %v14506_v22 = vld [vmem:[#allocation89_spill] sm:$0xff] }
 0x720   : > { %v12823_v62 = vpop.eup %10537  ;;  %9073 = vmatmul.mubr.msk.f32.gmra.mrb[66].mxu1 %vm276_vm0, %v12808_v21  ;;  %9111 = vmatprep.mubr.msk.f32.mxu0 %vm276_vm0, %v12819_v20  ;;  %v4581_v31 = vsub.f32 %v12617_v57, %v4527_v11  ;;  %v12837_v57 = vpack.c.bf16 %v10317_v3, %v10316_v49  ;;  %v14499_v3 = vld [vmem:[#allocation23_spill] sm:$0xff]  ;;  %v14500_v49 = vld [vmem:[#allocation77_spill] sm:$0xff] }
 0x721   : > { %10543 = vpow2.f32 %v4637_v47  ;;  %9112 = vmatmul.mubr.msk.f32.vlgmr.msra.gmra.mrb[84].mxu0 %vm276_vm0, %v12823_v62  ;;  %6008 = vrot.lane.b32.xlu0 %v11542_v16, %s10979_s20  ;;  %s10899_s20 = scalar_lea.vmem %s10898_s30, 6144 }
 0x722   : > { %v4613_v44 = vmul.f32 1.442695, %v4581_v31  ;;  %9720 = vmatpush3.bf16.msra.mxu0 %v12758_v56  ;;  %v10337_v31 = vunpack.i.h.bf16 %v12729_v19  ;;  %p10901_p9 = scmp.lt.s32.totalorder %s10899_s20, %s10893_s7 }
 0x723   : > { %9722 = vmatprep.subr.bf16.mxu0 %v9721_v1  ;;  %v4536_v15 = vpop.xlane.xlu0 %4535 }
 0x724   : > { %10545 = vpow2.f32 %v4613_v44  ;;  %v4584_v54 = vsub.f32 %v12619_v59, %v4536_v15  ;;  %v14501_v15 = vld [vmem:[#allocation19_spill] sm:$0xff]  ;;  %p10902_p12 = por %p10901_p9, %p10900_p7 }
 0x725   : > { %10547 = vpow2.f32 %v4615_v37  ;;  %10364 = vrot.lane.b32.xlu0 %v11259_v32, %s10980_s24  ;;  %v4569_v40 = vpop.xlane.xlu1 %4568  ;;  %v3058_v37 = vsel %vm276_vm0, %v14500_v49, 0.0 }
 0x726   : > { %9724 = vmatpush3.bf16.msra.mxu0 %v9721_v1  ;;  %v4619_v59 = vmul.f32 1.442695, %v4584_v54  ;;  %v4595_v10 = vsub.f32 %v12651_v29, %v4569_v40  ;;  %v10336_v1 = vunpack.i.l.bf16 %v12729_v19  ;;  %v14502_v19 = vld [vmem:[#allocation91_spill] sm:$0xff]  ;;  %p10903_p1 = pnand %p10902_p12, %p10896_p3 }
 0x727   : > { %v12842_v30 = vpop.eup %10539  ;;  %9739 = vmatprep.subr.msk.bf16.mxu0 %vm11411_vm2, %v12837_v57  ;;  %v4533_v16 = vpop.xlane.xlu0 %4532  ;;  %v3061_v54 = vsel %vm276_vm0, %v14502_v19, 0.0  ;;  %v14515_v19 = vld [vmem:[#allocation94_spill] sm:$0xff] }
 0x728   : > { %v12847_v56 = vpop.eup %10541  ;;  %v4583_v48 = vsub.f32 %v12621_v50, %v4533_v16  ;;  %9114 = vmatprep.mubr.msk.f32.mxu0 %vm276_vm0, %v12842_v30  ;;  %v4641_v29 = vmul.f32 1.442695, %v4595_v10  ;;  %v9761_v44 = vpack.c.bf16 %v10337_v31, %v10336_v1  ;;  %v14512_v1 = vld [vmem:[#allocation85_spill] sm:$0xff] }
 0x729   : > { %9115 = vmatmul.mubr.msk.f32.gmra.mrb[86].mxu0 %vm276_vm0, %v12847_v56  ;;  %10374 = vrot.lane.b32.xlu0 %v11283_v39, %s10980_s24 }
 0x72a   : > { %v4617_v32 = vmul.f32 1.442695, %v4583_v48 }
 0x72b   : > { %v12857_v63 = vpop.eup %10543  ;;  %v4566_v50 = vpop.xlane.xlu0 %4565 }
 0x72c   : > { %10549 = vpow2.f32 %v4617_v32  ;;  %v4594_v53 = vsub.f32 %v12631_v6, %v4566_v50  ;;  %9139 = vmatprep.mubr.msk.f32.mxu0 %vm276_vm0, %v12857_v63  ;;  %v10307_v6 = vunpack.i.h.bf16 %v12677_v5  ;;  %v14504_v50 = vld [vmem:[#allocation88_spill] sm:$0xff] }
 0x72d   : > { %10551 = vpow2.f32 %v4619_v59  ;;  %10384 = vrot.lane.b32.xlu0 %v11293_v42, %s10980_s24  ;;  %v14503_v59 = vld [vmem:[#allocation87_spill] sm:$0xff] }
 0x72e   : > { %v12866_v39 = vpop.eup %10545  ;;  %v4639_v43 = vmul.f32 1.442695, %v4594_v53  ;;  %v9725_v14 = vpack.c.bf16 %v10307_v6, %v10306_v41  ;;  %v3025_v10 = vsel %vm276_vm0, %v14503_v59, 0.0  ;;  %v3028_v53 = vsel %vm276_vm0, %v14504_v50, 0.0  ;;  %v12963_v6 = vpop.permute.xlu1 %5423  ;;  %v14507_v41 = vld [vmem:[#allocation22_spill] sm:$0xff]  ;;  %v14516_v59 = vld [vmem:[#allocation96_spill] sm:$0xff] }
 0x72f   : > { %v12868_v38 = vpop.eup %10547  ;;  %9097 = vmatprep.mubr.msk.f32.mxu1 %vm276_vm0, %v12866_v39  ;;  %v4572_v7 = vpop.xlane.xlu0 %4571 }
 0x730   : > { %10553 = vpow2.f32 %v4639_v43  ;;  %v4596_v46 = vsub.f32 %v12645_v4, %v4572_v7  ;;  %9098 = vmatmul.mubr.msk.f32.vlgmr.msra.gmra.mrb[68].mxu1 %vm276_vm0, %v12868_v38  ;;  %v14505_v43 = vld [vmem:[#allocation90_spill] sm:$0xff] }
 0x731   : > { %10555 = vpow2.f32 %v4641_v29  ;;  %9712 = vmatpush3.bf16.msra.mxu1 %v12806_v12  ;;  %10394 = vrot.lane.b32.xlu0 %v11320_v51, %s10980_s24  ;;  %v10322_v51 = vunpack.i.h.bf16 %v12683_v18  ;;  %v12952_v29 = vpack.c.bf16 %v10327_v24, %v10326_v28  ;;  %v3031_v7 = vsel %vm276_vm0, %v14505_v43, 0.0  ;;  %v14517_v24 = vld [vmem:[#allocation76_spill] sm:$0xff] }
 0x732   : > { %v4643_v42 = vmul.f32 1.442695, %v4596_v46  ;;  %9714 = vmatprep.subr.bf16.mxu1 %v9713_v34  ;;  %v3037_v46 = vsel %vm276_vm0, %v14507_v41, 0.0  ;;  %v3073_v28 = vsel %vm276_vm0, %v14517_v24, 0.0 }
 0x733   : > { %v4554_v13 = vpop.xlane.xlu0 %4553  ;;  %v9743_v11 = vpack.c.bf16 %v10322_v51, %v10321_v2 }
 0x734   : > { %10557 = vpow2.f32 %v4643_v42  ;;  %v4590_v61 = vsub.f32 %v12641_v52, %v4554_v13  ;;  %v14497_v52 = vld [vmem:[#allocation117_spill] sm:$0xff]  ;;  %v14508_v13 = vld [vmem:[#allocation119_spill] sm:$0xff] }
 0x735   : > { %9716 = vmatpush3.bf16.msra.mxu1 %v9713_v34  ;;  %10404 = vrot.lane.b32.xlu0 %v11344_v58, %s10980_s24  ;;  %v3034_v34 = vsel %vm276_vm0, %v14506_v22, 0.0 }
 0x736   : > { %v12883_v4 = vpop.eup %10549  ;;  %9727 = vmatprep.subr.msk.bf16.mxu1 %vm11411_vm2, %v9725_v14  ;;  %v4631_v58 = vmul.f32 1.442695, %v4590_v61  ;;  %v14509_v61 = vld [vmem:[#allocation80_spill] sm:$0xff] }
 0x737   : > { %v12887_v5 = vpop.eup %10551  ;;  %9100 = vmatprep.mubr.msk.f32.mxu1 %vm276_vm0, %v12883_v4  ;;  %v4551_v27 = vpop.xlane.xlu0 %4550  ;;  %v3055_v51 = vsel %vm276_vm0, %v14509_v61, 0.0 }
 0x738   : > { %v4589_v12 = vsub.f32 %v14497_v52, %v4551_v27  ;;  %9101 = vmatmul.mubr.msk.f32.gmra.mrb[70].mxu1 %vm276_vm0, %v12887_v5  ;;  %v14510_v27 = vld [vmem:[#allocation20_spill] sm:$0xff] }
 0x739   : > { %10409 = vrot.lane.b32.xlu0 %v14498_v60, %s10980_s24  ;;  %v3040_v52 = vsel %vm276_vm0, %v14510_v27, 0.0 }
 0x73a   : > { %v12898_v26 = vpop.eup %10553  ;;  %v4629_v8 = vmul.f32 1.442695, %v4589_v12 }
 0x73b   : > { %v12900_v47 = vpop.eup %10555  ;;  %9140 = vmatmul.mubr.msk.f32.vlgmr.msra.gmra.mrb[88].mxu0 %vm276_vm0, %v12898_v26  ;;  %v5539_v32 = vpop.permute.xlu0 %5538 }
 0x73c   : > { %10559 = vpow2.f32 %v4629_v8  ;;  %9742 = vmatpush3.bf16.xpose.msk.msra.mxu0 %vm11411_vm2, %v12837_v57  ;;  %9142 = vmatprep.mubr.msk.f32.mxu0 %vm276_vm0, %v12900_v47  ;;  %v10312_v57 = vunpack.i.h.bf16 %v14501_v15  ;;  %v14511_v8 = vld [vmem:[#allocation92_spill] sm:$0xff] }
 0x73d   : > { %10561 = vpow2.f32 %v4631_v58  ;;  %9745 = vmatprep.subr.msk.bf16.mxu0 %vm11411_vm2, %v9743_v11  ;;  %10414 = vrot.lane.b32.xlu0 %v11364_v0, %s10980_s24  ;;  %v10311_v0 = vunpack.i.l.bf16 %v14501_v15  ;;  %v14514_v15 = vld [vmem:[#allocation86_spill] sm:$0xff] }
 0x73e   : > { %v12913_v18 = vpop.eup %10557 }
 0x73f   : > { %9143 = vmatmul.mubr.msk.f32.gmra.mrb[90].mxu0 %vm276_vm0, %v12913_v18  ;;  %v9731_v48 = vpack.c.bf16 %v10312_v57, %v10311_v0  ;;  %v3046_v57 = vsel %vm276_vm0, %v14514_v15, 0.0  ;;  %v14526_v15 = vld [vmem:[#allocation24_spill] sm:$0xff] }
 0x740   : > { %9167 = vmatprep.mubr.msk.f32.mxu0 %vm570_vm1, %v14499_v3  ;;  %v3043_v3 = vsel %vm276_vm0, %v14512_v1, 0.0  ;;  %v4660_v1 = vsel %vm276_vm0, %v12741_v33, 0.0 }
 0x742   : > { %3059 = vadd.xlane.f32.xlu1 %v3058_v37  ;;  %v14513_v37 = vld [vmem:[#allocation93_spill] sm:$0xff] }
 0x744   : > { %9748 = vmatpush3.bf16.xpose.msk.msra.mxu0 %vm11411_vm2, %v9743_v11  ;;  %v3064_v11 = vsel %vm276_vm0, %v14511_v8, 0.0 }
 0x745   : > { %9763 = vmatprep.subr.msk.bf16.mxu0 %vm11411_vm2, %v9761_v44 }
 0x746   : > { %v12931_v40 = vpop.eup %10559  ;;  %3062 = vadd.xlane.f32.xlu1 %v3061_v54  ;;  %v3070_v54 = vsel %vm276_vm0, %v14515_v19, 0.0 }
 0x747   : > { %v12933_v16 = vpop.eup %10561  ;;  %9125 = vmatprep.mubr.msk.f32.mxu1 %vm276_vm0, %v12931_v40 }
 0x748   : > { %9126 = vmatmul.mubr.msk.f32.vlgmr.msra.gmra.mrb[72].mxu1 %vm276_vm0, %v12933_v16 }
 0x749   : > { %9730 = vmatpush3.bf16.xpose.msk.msra.mxu1 %vm11411_vm2, %v9725_v14 }
 0x74a   : > { %9733 = vmatprep.subr.msk.bf16.mxu1 %vm11411_vm2, %v9731_v48  ;;  %3026 = vadd.xlane.f32.xlu1 %v3025_v10  ;;  %v3049_v10 = vsel %vm276_vm0, %v14516_v59, 0.0  ;;  %v14527_v59 = vld [vmem:[#allocation120_spill] sm:$0xff] }
 0x74b   : > { %9168 = vmatmul.mubr.msk.f32.vlgmr.msra.gmra.mrb[92].mxu0 %vm570_vm1, %v5539_v32 }
 0x74c   : > { %9766 = vmatpush3.bf16.xpose.msk.msra.mxu0 %vm11411_vm2, %v9761_v44  ;;  %v3067_v44 = vsel %vm276_vm0, %v14513_v37, 0.0  ;;  %v14525_v37 = vld [vmem:[#allocation95_spill] sm:$0xff] }
 0x74e   : > { %3029 = vadd.xlane.f32.xlu1 %v3028_v53  ;;  %v14518_v53 = vld [vmem:[#allocation118_spill] sm:$0xff] }
 0x751   : > { %9736 = vmatpush3.bf16.xpose.msk.msra.mxu1 %vm11411_vm2, %v9731_v48 }
 0x752   : > { %9751 = vmatprep.subr.msk.bf16.mxu1 %vm11411_vm2, %v12952_v29  ;;  %3032 = vadd.xlane.f32.xlu1 %v3031_v7  ;;  %v14519_v7 = vld [vmem:[#allocation97_spill] sm:$0xff] }
 0x753   : > { %v3052_v22 = vsel %vm276_vm0, %v14519_v7, 0.0 }
 0x756   : > { %3035 = vadd.xlane.f32.xlu1 %v3034_v34 }
 0x75a   : > { %3038 = vadd.xlane.f32.xlu1 %v3037_v46  ;;  %v4557_v42 = vpop.xlane.xlu1 %4556  ;;  %v14520_v46 = vld [vmem:[#allocation12_spill] sm:$0xff] }
 0x75b   : > { %v4591_v14 = vsub.f32 %v14508_v13, %v4557_v42  ;;  %v3076_v42 = vsel %vm276_vm0, %v14520_v46, 0.0 }
 0x75c   : > { %3056 = vadd.xlane.f32.xlu0 %v3055_v51 }
 0x75d   : > { %v4633_v2 = vmul.f32 1.442695, %v4591_v14  ;;  %v14521_v14 = vld [vmem:[#allocation18_spill] sm:$0xff] }
 0x75e   : > { %3041 = vadd.xlane.f32.xlu1 %v3040_v52  ;;  %v10340_v12 = vpop.permute.xlu1 %10339  ;;  %v1435_v61 = vsel %vm276_vm0, %v14521_v14, 0.0  ;;  %v14530_v14 = vld [vmem:[#allocation82_spill] sm:$0xff] }
 0x75f   : > { %10563 = vpow2.f32 %v4633_v2  ;;  %v10342_v58 = vunpack.i.h.bf16 %v10340_v12  ;;  %v10341_v60 = vunpack.i.l.bf16 %v10340_v12  ;;  %v14522_v2 = vld [vmem:[#allocation21_spill] sm:$0xff]  ;;  %v14523_v12 = vld [vmem:[#allocation46_spill] sm:$0xff] }
 0x760   : > { %3065 = vadd.xlane.f32.xlu0 %v3064_v11  ;;  %v3079_v27 = vsel %vm276_vm0, %v14522_v2, 0.0 }
 0x761   : > { %v9767_v31 = vpack.c.bf16 %v10342_v58, %v10341_v60  ;;  %v1441_v58 = vsel %vm276_vm0, %v14523_v12, 0.0  ;;  %v14524_v60 = vld [vmem:[#allocation81_spill] sm:$0xff] }
 0x762   : > { %3044 = vadd.xlane.f32.xlu1 %v3043_v3  ;;  %v12976_v49 = vpop.permute.xlu1 %5653  ;;  %v3082_v8 = vsel %vm276_vm0, %v14524_v60, 0.0  ;;  %v4645_v60 = vsel %vm276_vm0, %v12785_v45, 0.0  ;;  %v4654_v45 = vsel %vm276_vm0, %v12808_v21, 0.0 }
 0x763   : > { %9769 = vmatprep.subr.msk.bf16.mxu0 %vm11411_vm2, %v9767_v31 }
 0x764   : > { %9772 = vmatpush3.bf16.xpose.msk.msra.mxu0 %vm11411_vm2, %v9767_v31  ;;  %3068 = vadd.xlane.f32.xlu0 %v3067_v44  ;;  %v3085_v44 = vsel %vm276_vm0, %v14525_v37, 0.0 }
 0x766   : > { %3047 = vadd.xlane.f32.xlu1 %v3046_v57  ;;  %v5541_v0 = vpop.permute.xlu1 %5540  ;;  %v10332_v57 = vunpack.i.h.bf16 %v14526_v15 }
 0x767   : > { %9170 = vmatprep.mubr.msk.f32.mxu0 %vm570_vm1, %v5541_v0  ;;  %v10331_v0 = vunpack.i.l.bf16 %v14526_v15  ;;  %v4651_v15 = vsel %vm276_vm0, %v12814_v55, 0.0  ;;  %v4687_v55 = vsel %vm276_vm0, %v12842_v30, 0.0 }
 0x768   : > { %3071 = vadd.xlane.f32.xlu0 %v3070_v54  ;;  %v4657_v54 = vsel %vm276_vm0, %v12736_v9, 0.0  ;;  %v4666_v9 = vsel %vm276_vm0, %v12775_v36, 0.0 }
 0x769   : > { %v12989_v48 = vpop.eup %10563  ;;  %v9755_v24 = vpack.c.bf16 %v10332_v57, %v10331_v0  ;;  %v4690_v57 = vsel %vm276_vm0, %v12847_v56, 0.0  ;;  %v4672_v56 = vsel %vm276_vm0, %v12868_v38, 0.0  ;;  %v4669_v38 = vsel %vm276_vm0, %v12866_v39, 0.0 }
 0x76a   : > { %3050 = vadd.xlane.f32.xlu1 %v3049_v10  ;;  %9128 = vmatprep.mubr.msk.f32.mxu1 %vm276_vm0, %v12989_v48  ;;  %v5543_v32 = vpop.permute.xlu1 %5542  ;;  %v14528_v10 = vld [vmem:[#allocation14_spill] sm:$0xff] }
 0x76b   : > { %9171 = vmatmul.mubr.msk.f32.gmra.mrb[94].mxu0 %vm570_vm1, %v5543_v32  ;;  %v3088_v32 = vsel %vm276_vm0, %v14528_v10, 0.0 }
 0x76c   : > { %3074 = vadd.xlane.f32.xlu0 %v3073_v28  ;;  %v4560_v50 = vpop.xlane.xlu0 %4559 }
 0x76d   : > { %v4592_v43 = vsub.f32 %v14518_v53, %v4560_v50  ;;  %v14529_v50 = vld [vmem:[#allocation75_spill] sm:$0xff] }
 0x76e   : > { %3053 = vadd.xlane.f32.xlu1 %v3052_v22  ;;  %v13001_v34 = vpop.permute.xlu1 %10349  ;;  %v3091_v53 = vsel %vm276_vm0, %v14529_v50, 0.0 }
 0x76f   : > { %v4635_v41 = vmul.f32 1.442695, %v4592_v43  ;;  %v10352_v12 = vunpack.i.h.bf16 %v13001_v34 }
 0x770   : > { %3077 = vadd.xlane.f32.xlu0 %v3076_v42  ;;  %v5426_v13 = vpop.permute.xlu0 %5425 }
 0x771   : > { %10565 = vpow2.f32 %v4635_v41 }
 0x772   : > { %1436 = vadd.xlane.f32.xlu1 %v1435_v61  ;;  %v5771_v51 = vpop.permute.xlu1 %5770  ;;  %v3094_v61 = vsel %vm276_vm0, %v14530_v14, 0.0 }
 0x773   : > { %9195 = vmatprep.mubr.msk.f32.mxu0 %vm570_vm1, %v5771_v51 }
 0x774   : > { %3080 = vadd.xlane.f32.xlu0 %v3079_v27  ;;  %v10345_v52 = vpop.permute.xlu0 %10344  ;;  %v14531_v27 = vld [vmem:[#allocation30_spill] sm:$0xff] }
 0x775   : > { %v10347_v43 = vunpack.i.h.bf16 %v10345_v52  ;;  %v10346_v7 = vunpack.i.l.bf16 %v10345_v52  ;;  %v1438_v52 = vsel %vm276_vm0, %v14531_v27, 0.0 }
 0x776   : > { %1442 = vadd.xlane.f32.xlu1 %v1441_v58  ;;  %v5775_v11 = vpop.permute.xlu1 %5774 }
 0x777   : > { %v9773_v51 = vpack.c.bf16 %v10347_v43, %v10346_v7 }
 0x778   : > { %3083 = vadd.xlane.f32.xlu0 %v3082_v8  ;;  %v13014_v31 = vpop.permute.xlu0 %5655  ;;  %v14532_v8 = vld [vmem:[#allocation47_spill] sm:$0xff] }
 0x77a   : > { %4661 = vadd.xlane.f32.xlu1 %v4660_v1  ;;  %v10360_v33 = vpop.permute.xlu1 %10359 }
 0x77b   : > { %v13018_v3 = vpop.eup %10565  ;;  %v10362_v41 = vunpack.i.h.bf16 %v10360_v33  ;;  %v10361_v46 = vunpack.i.l.bf16 %v10360_v33 }
 0x77c   : > { %3086 = vadd.xlane.f32.xlu0 %v3085_v44  ;;  %v5658_v19 = vpop.permute.xlu0 %5657  ;;  %9129 = vmatmul.mubr.msk.f32.gmra.mrb[74].mxu1 %vm276_vm0, %v13018_v3 }
 0x77d   : > { %9153 = vmatprep.mubr.msk.f32.mxu1 %vm570_vm1, %v14527_v59  ;;  %v4678_v59 = vsel %vm276_vm0, %v12887_v5, 0.0 }
 0x77e   : > { %4658 = vadd.xlane.f32.xlu1 %v4657_v54 }
 0x780   : > { %3089 = vadd.xlane.f32.xlu0 %v3088_v32  ;;  %v5660_v28 = vpop.permute.xlu0 %5659  ;;  %9154 = vmatmul.mubr.msk.f32.vlgmr.msra.gmra.mrb[76].mxu1 %vm570_vm1, %v12719_v25  ;;  %v13045_v25 = vpop.permute.xlu1 %5889 }
 0x781   : > { %9754 = vmatpush3.bf16.xpose.msk.msra.mxu1 %vm11411_vm2, %v12952_v29  ;;  %9156 = vmatprep.mubr.msk.f32.mxu1 %vm570_vm1, %v12963_v6  ;;  %v4663_v6 = vsel %vm276_vm0, %v12773_v23, 0.0 }
 0x782   : > { %4667 = vadd.xlane.f32.xlu1 %v4666_v9  ;;  %9757 = vmatprep.subr.msk.bf16.mxu1 %vm11411_vm2, %v9755_v24 }
 0x784   : > { %3092 = vadd.xlane.f32.xlu0 %v3091_v53  ;;  %v10355_v22 = vpop.permute.xlu0 %10354  ;;  %9157 = vmatmul.mubr.msk.f32.gmra.mrb[78].mxu1 %vm570_vm1, %v5426_v13  ;;  %v4648_v13 = vsel %vm276_vm0, %v12789_v35, 0.0  ;;  %v13059_v23 = vpop.permute.xlu1 %5893  ;;  %v10351_v35 = vunpack.i.l.bf16 %v13001_v34 }
 0x785   : > { %v10357_v29 = vunpack.i.h.bf16 %v10355_v22  ;;  %v10356_v36 = vunpack.i.l.bf16 %v10355_v22  ;;  %9181 = vmatprep.mubr.msk.f32.mxu1 %vm570_vm1, %v12976_v49  ;;  %v9791_v49 = vpack.c.bf16 %v10362_v41, %v10361_v46  ;;  %v4705_v41 = vsel %vm276_vm0, %v12857_v63, 0.0 }
 0x786   : > { %4664 = vadd.xlane.f32.xlu1 %v4663_v6  ;;  %v9779_v1 = vpack.c.bf16 %v10352_v12, %v10351_v35  ;;  %v4696_v63 = vsel %vm276_vm0, %v12933_v16, 0.0 }
 0x787   : > { %v9785_v42 = vpack.c.bf16 %v10357_v29, %v10356_v36 }
 0x788   : > { %3095 = vadd.xlane.f32.xlu0 %v3094_v61  ;;  %v5773_v2 = vpop.permute.xlu0 %5772  ;;  %v6007_v37 = vpop.permute.xlu1 %6006  ;;  %v4714_v61 = vsel %vm276_vm0, %v12913_v18, 0.0  ;;  %v4699_v18 = vsel %vm276_vm0, %v12989_v48, 0.0 }
 0x789   : > { %9760 = vmatpush3.bf16.xpose.msk.msra.mxu1 %vm11411_vm2, %v9755_v24  ;;  %9196 = vmatmul.mubr.msk.f32.vlgmr.msra.gmra.mrb[96].mxu0 %vm570_vm1, %v5773_v2  ;;  %v4693_v2 = vsel %vm276_vm0, %v12931_v40, 0.0 }
 0x78a   : > { %4649 = vadd.xlane.f32.xlu1 %v4648_v13  ;;  %9775 = vmatprep.subr.msk.bf16.mxu1 %vm11411_vm2, %v9773_v51  ;;  %v4702_v13 = vsel %vm276_vm0, %v13018_v3, 0.0 }
 0x78b   : > { %9787 = vmatprep.subr.msk.bf16.mxu0 %vm11411_vm2, %v9785_v42  ;;  %9198 = vmatprep.mubr.msk.f32.mxu0 %vm570_vm1, %v5775_v11  ;;  %v1444_v11 = vsel %vm276_vm0, %v14532_v8, 0.0 }
 0x78c   : > { %9790 = vmatpush3.bf16.xpose.msk.msra.mxu0 %vm11411_vm2, %v9785_v42  ;;  %1439 = vadd.xlane.f32.xlu0 %v1438_v52  ;;  %v5777_v58 = vpop.permute.xlu0 %5776  ;;  %v6011_v21 = vpop.permute.xlu1 %6010 }
 0x78d   : > { %9793 = vmatprep.subr.msk.bf16.mxu0 %vm11411_vm2, %v9791_v49  ;;  %9199 = vmatmul.mubr.msk.f32.gmra.mrb[98].mxu0 %vm570_vm1, %v5777_v58 }
 0x78e   : > { %4646 = vadd.xlane.f32.xlu1 %v4645_v60 }
 0x790   : > { %9182 = vmatmul.mubr.msk.f32.vlgmr.msra.gmra.mrb[80].mxu1 %vm570_vm1, %v13014_v31  ;;  %1445 = vadd.xlane.f32.xlu0 %v1444_v11  ;;  %v5888_v34 = vpop.permute.xlu0 %5887  ;;  %v4684_v31 = vsel %vm276_vm0, %v12823_v62, 0.0  ;;  %v4681_v62 = vsel %vm276_vm0, %v12819_v20, 0.0 }
 0x791   : > { %9184 = vmatprep.mubr.msk.f32.mxu1 %vm570_vm1, %v5658_v19  ;;  %9778 = vmatpush3.bf16.xpose.msk.msra.mxu1 %vm11411_vm2, %v9773_v51  ;;  %v10370_v19 = vpop.permute.xlu1 %10369  ;;  %v4711_v51 = vsel %vm276_vm0, %v12900_v47, 0.0 }
 0x792   : > { %4655 = vadd.xlane.f32.xlu1 %v4654_v45  ;;  %9781 = vmatprep.subr.msk.bf16.mxu1 %vm11411_vm2, %v9779_v1  ;;  %v10372_v17 = vunpack.i.h.bf16 %v10370_v19  ;;  %v10371_v20 = vunpack.i.l.bf16 %v10370_v19 }
 0x794   : > { %9796 = vmatpush3.bf16.xpose.msk.msra.mxu0 %vm11411_vm2, %v9791_v49  ;;  %9185 = vmatmul.mubr.msk.f32.gmra.mrb[82].mxu1 %vm570_vm1, %v5660_v28  ;;  %v5892_v44 = vpop.permute.xlu0 %5891  ;;  %v4675_v28 = vsel %vm276_vm0, %v12883_v4, 0.0  ;;  %v9801_v5 = vpack.c.bf16 %v10372_v17, %v10371_v20 }
 0x795   : > { %4685 = vadd.xlane.f32.xlu0 %v4684_v31  ;;  %9209 = vmatprep.mubr.msk.f32.mxu1 %vm570_vm1, %v5888_v34  ;;  %v10380_v32 = vpop.permute.xlu1 %10379 }
 0x796   : > { %4652 = vadd.xlane.f32.xlu1 %v4651_v15  ;;  %v10382_v50 = vunpack.i.h.bf16 %v10380_v32  ;;  %v10381_v53 = vunpack.i.l.bf16 %v10380_v32 }
 0x798   : > { %v6005_v0 = vpop.permute.xlu0 %6004  ;;  %v13123_v4 = vpack.c.bf16 %v10382_v50, %v10381_v53 }
 0x799   : > { %4691 = vadd.xlane.f32.xlu0 %v4690_v57  ;;  %9784 = vmatpush3.bf16.xpose.msk.msra.mxu1 %vm11411_vm2, %v9779_v1  ;;  %v13171_v11 = vpop.permute.xlu1 %10389 }
 0x79a   : > { %4682 = vadd.xlane.f32.xlu1 %v4681_v62  ;;  %9223 = vmatprep.mubr.msk.f32.mxu0 %vm570_vm1, %v6005_v0  ;;  %14533 = vst [vmem:[#allocation15_spill] sm:$0xff] %v13123_v4  ;;  %14539 = vst [vmem:[#allocation16_spill] sm:$0xff] %v13171_v11 }
 0x79b   : > { %9224 = vmatmul.mubr.msk.f32.vlgmr.msra.gmra.mrb[100].mxu0 %vm570_vm1, %v6007_v37 }
 0x79c   : > { %v6009_v54 = vpop.permute.xlu0 %6008 }
 0x79d   : > { %4688 = vadd.xlane.f32.xlu0 %v4687_v55  ;;  %9226 = vmatprep.mubr.msk.f32.mxu0 %vm570_vm1, %v6009_v54  ;;  %v13177_v34 = vpop.permute.xlu1 %10399 }
 0x79e   : > { %4673 = vadd.xlane.f32.xlu1 %v4672_v56 }
 0x79f   : > { %9227 = vmatmul.mubr.msk.f32.gmra.mrb[102].mxu0 %vm570_vm1, %v6011_v21 }
 0x7a0   : > { %9210 = vmatmul.mubr.msk.f32.vlgmr.msra.gmra.mrb[84].mxu1 %vm570_vm1, %v13045_v25  ;;  %v10365_v33 = vpop.permute.xlu0 %10364  ;;  %v4708_v25 = vsel %vm276_vm0, %v12898_v26, 0.0 }
 0x7a1   : > { %4679 = vadd.xlane.f32.xlu0 %v4678_v59  ;;  %v10367_v30 = vunpack.i.h.bf16 %v10365_v33  ;;  %v10366_v10 = vunpack.i.l.bf16 %v10365_v33  ;;  %9212 = vmatprep.mubr.msk.f32.mxu1 %vm570_vm1, %v5892_v44  ;;  %v13187_v21 = vpop.permute.xlu1 %10419 }
 0x7a2   : > { %4670 = vadd.xlane.f32.xlu1 %v4669_v38  ;;  %14544 = vst [vmem:[#allocation87_spill] sm:$0xff] %v13187_v21 }
 0x7a3   : > { %v9797_v24 = vpack.c.bf16 %v10367_v30, %v10366_v10 }
 0x7a4   : > { %9213 = vmatmul.mubr.msk.f32.gmra.mrb[86].mxu1 %vm570_vm1, %v13059_v23  ;;  %v10375_v9 = vpop.permute.xlu0 %10374 }
 0x7a5   : > { %4676 = vadd.xlane.f32.xlu0 %v4675_v28  ;;  %v10377_v43 = vunpack.i.h.bf16 %v10375_v9  ;;  %v10376_v7 = vunpack.i.l.bf16 %v10375_v9  ;;  %9798 = vmatprep.subr.bf16.mxu1 %v9797_v24 }
 0x7a6   : > { %9800 = vmatpush3.bf16.msra.mxu1 %v9797_v24 }
 0x7a7   : > { %9802 = vmatprep.subr.bf16.mxu1 %v9801_v5  ;;  %v9805_v39 = vpack.c.bf16 %v10377_v43, %v10376_v7 }
 0x7a8   : > { %v10385_v22 = vpop.permute.xlu0 %10384 }
 0x7a9   : > { %4709 = vadd.xlane.f32.xlu0 %v4708_v25  ;;  %v10387_v29 = vunpack.i.h.bf16 %v10385_v22  ;;  %v10386_v36 = vunpack.i.l.bf16 %v10385_v22  ;;  %9806 = vmatprep.subr.bf16.mxu0 %v9805_v39 }
 0x7aa   : > { %9804 = vmatpush3.bf16.msra.mxu1 %v9801_v5  ;;  %9808 = vmatpush3.bf16.msra.mxu0 %v9805_v39 }
 0x7ab   : > { %9814 = vmatprep.subr.bf16.mxu1 %v13123_v4  ;;  %v9809_v6 = vpack.c.bf16 %v10387_v29, %v10386_v36 }
 0x7ac   : > { %v10395_v46 = vpop.permute.xlu0 %10394 }
 0x7ad   : > { %4706 = vadd.xlane.f32.xlu0 %v4705_v41  ;;  %v10397_v42 = vunpack.i.h.bf16 %v10395_v46  ;;  %v10396_v14 = vunpack.i.l.bf16 %v10395_v46  ;;  %9810 = vmatprep.subr.bf16.mxu0 %v9809_v6 }
 0x7ae   : > { %9812 = vmatpush3.bf16.msra.mxu0 %v9809_v6 }
 0x7af   : > { %v13128_v26 = vpack.c.bf16 %v10397_v42, %v10396_v14 }
 0x7b0   : > { %v13209_v33 = vpop.permute.xlu0 %10404 }
 0x7b1   : > { %4715 = vadd.xlane.f32.xlu0 %v4714_v61  ;;  %9822 = vmatprep.subr.bf16.mxu0 %v13128_v26  ;;  %14545 = vst [vmem:[#allocation88_spill] sm:$0xff] %v13209_v33  ;;  %v14591_v33 = vld [vmem:[#allocation31_spill] sm:$0xff] }
 0x7b4   : > { %v13213_v10 = vpop.permute.xlu0 %10409 }
 0x7b5   : > { %4712 = vadd.xlane.f32.xlu0 %v4711_v51  ;;  %14546 = vst [vmem:[#allocation90_spill] sm:$0xff] %v13213_v10 }
 0x7b8   : > { %v13217_v32 = vpop.permute.xlu0 %10414 }
 0x7b9   : > { %4697 = vadd.xlane.f32.xlu0 %v4696_v63 }
 0x7bd   : > { %4694 = vadd.xlane.f32.xlu0 %v4693_v2 }
 0x7c1   : > { %4703 = vadd.xlane.f32.xlu0 %v4702_v13 }
 0x7c5   : > { %4700 = vadd.xlane.f32.xlu0 %v4699_v18 }
 0x7cf   : > { %v13189_v57 = vpop.xlane.xlu1 %3059 }
 0x7d3   : > { %v13195_v19 = vpop.xlane.xlu1 %3062 }
 0x7d7   : > { %v13205_v20 = vpop.xlane.xlu1 %3026 }
 0x7da   : > { %v13143_v23 = vpop.f32.mrb[80].mxu0 }
 0x7db   : > { %14534 = vst [vmem:[#allocation26_spill] sm:$0xff] %v13143_v23  ;;  %v13145_v47 = vpop.f32.mrb[81].mxu0  ;;  %v13207_v59 = vpop.xlane.xlu1 %3029  ;;  %v14592_v23 = vld [vmem:[#allocation45_spill] sm:$0xff] }
 0x7df   : > { %v13211_v30 = vpop.xlane.xlu1 %3032 }
 0x7e3   : > { %v13215_v38 = vpop.xlane.xlu1 %3035 }
 0x7e7   : > { %v13219_v24 = vpop.xlane.xlu1 %3038 }
 0x7e8   : > { %v13147_v49 = vpop.f32.mrb[82].mxu0 }
 0x7e9   : > { %14535 = vst [vmem:[#allocation28_spill] sm:$0xff] %v13147_v49  ;;  %v13149_v16 = vpop.f32.mrb[83].mxu0  ;;  %v13227_v50 = vpop.xlane.xlu0 %3056 }
 0x7ea   : > { %14536 = vst [vmem:[#allocation27_spill] sm:$0xff] %v13149_v16  ;;  %10567 = vrcp.f32 %v13227_v50 }
 0x7eb   : > { %v13151_v27 = vpop.f32.mrb[64].mxu1  ;;  %v13229_v53 = vpop.xlane.xlu1 %3041  ;;  %10569 = vrcp.f32 %v13189_v57 }
 0x7ec   : > { %v13153_v40 = vpop.f32.mrb[65].mxu1 }
 0x7ed   : > { %v13233_v7 = vpop.xlane.xlu0 %3065 }
 0x7ef   : > { %v13235_v39 = vpop.xlane.xlu1 %3044 }
 0x7f1   : > { %v13237_v25 = vpop.xlane.xlu0 %3068 }
 0x7f3   : > { %v13155_v52 = vpop.f32.mrb[66].mxu1  ;;  %v13239_v22 = vpop.xlane.xlu1 %3047 }
 0x7f4   : > { %v13157_v3 = vpop.f32.mrb[67].mxu1  ;;  %v13159_v12 = vpop.f32.mrb[84].mxu0  ;;  %14547 = vst [vmem:[#allocation89_spill] sm:$0xff] %v13239_v22 }
 0x7f5   : > { %v13161_v48 = vpop.f32.mrb[85].mxu0  ;;  %v13245_v6 = vpop.xlane.xlu0 %3071 }
 0x7f6   : > { %v10568_v50 = vpop.eup %10567 }
 0x7f7   : > { %v13249_v46 = vpop.xlane.xlu1 %3050  ;;  %v10570_v57 = vpop.eup %10569 }
 0x7f8   : > { %14550 = vst [vmem:[#allocation80_spill] sm:$0xff] %v13249_v46 }
 0x7f9   : > { %v13259_v63 = vpop.xlane.xlu0 %3074 }
 0x7fb   : > { %v13265_v18 = vpop.xlane.xlu1 %3053 }
 0x7fc   : > { %v13163_v35 = vpop.f32.mrb[86].mxu0  ;;  %14551 = vst [vmem:[#allocation20_spill] sm:$0xff] %v13265_v18 }
 0x7fd   : > { %v13165_v58 = vpop.f32.mrb[87].mxu0 }
 0x803   : > { %v13167_v60 = vpop.f32.mrb[68].mxu1 }
 0x804   : > { %14537 = vst [vmem:[#allocation25_spill] sm:$0xff] %v13167_v60  ;;  %v13169_v8 = vpop.f32.mrb[69].mxu1 }
 0x805   : > { %14538 = vst [vmem:[#allocation117_spill] sm:$0xff] %v13169_v8 }
 0x80b   : > { %v13173_v1 = vpop.f32.mrb[70].mxu1 }
 0x80c   : > { %v13175_v37 = vpop.f32.mrb[71].mxu1 }
 0x80e   : > { %v13179_v45 = vpop.f32.mrb[88].mxu0 }
 0x80f   : > { %14540 = vst [vmem:[#allocation23_spill] sm:$0xff] %v13179_v45  ;;  %v13181_v31 = vpop.f32.mrb[89].mxu0 }
 0x810   : > { %14541 = vst [vmem:[#allocation77_spill] sm:$0xff] %v13181_v31 }
 0x812   : > { %v13183_v44 = vpop.f32.mrb[90].mxu0 }
 0x813   : > { %14542 = vst [vmem:[#allocation19_spill] sm:$0xff] %v13183_v44  ;;  %v13185_v15 = vpop.f32.mrb[91].mxu0 }
 0x814   : > { %14543 = vst [vmem:[#allocation91_spill] sm:$0xff] %v13185_v15 }
 0x81b   : > { %v13191_v0 = vpop.f32.mrb[72].mxu1 }
 0x81c   : > { %v13193_v62 = vpop.f32.mrb[73].mxu1 }
 0x81e   : > { %v13197_v55 = vpop.f32.mrb[92].mxu0 }
 0x81f   : > { %v13199_v54 = vpop.f32.mrb[93].mxu0  ;;  %v6136_v56 = vsel %vm276_vm0, %v13197_v55, -inf }
 0x820   : > { %6137 = vmax.xlane.f32.xlu1 %v6136_v56  ;;  %v6133_v17 = vsel %vm276_vm0, %v13199_v54, -inf }
 0x824   : > { %6134 = vmax.xlane.f32.xlu1 %v6133_v17 }
 0x83e   : > { %v13221_v28 = vpop.f32.mrb[94].mxu0 }
 0x83f   : > { %v13223_v9 = vpop.f32.mrb[95].mxu0  ;;  %v6142_v5 = vsel %vm276_vm0, %v13221_v28, -inf }
 0x840   : > { %6143 = vmax.xlane.f32.xlu1 %v6142_v5  ;;  %v6139_v43 = vsel %vm276_vm0, %v13223_v9, -inf }
 0x844   : > { %6140 = vmax.xlane.f32.xlu1 %v6139_v43  ;;  %v13273_v43 = vpop.xlane.xlu0 %3077 }
 0x84f   : > { %v13241_v29 = vpop.f32.mrb[74].mxu1 }
 0x850   : > { %14548 = vst [vmem:[#allocation22_spill] sm:$0xff] %v13241_v29  ;;  %v13243_v36 = vpop.f32.mrb[75].mxu1 }
 0x851   : > { %14549 = vst [vmem:[#allocation119_spill] sm:$0xff] %v13243_v36 }
 0x853   : > { %v13247_v41 = vpop.f32.mrb[76].mxu1 }
 0x854   : > { %v13251_v42 = vpop.f32.mrb[77].mxu1  ;;  %v6124_v14 = vsel %vm276_vm0, %v13247_v41, -inf }
 0x855   : > { %6125 = vmax.xlane.f32.xlu1 %v6124_v14  ;;  %v6121_v61 = vsel %vm276_vm0, %v13251_v42, -inf }
 0x856   : > { %6122 = vmax.xlane.f32.xlu0 %v6121_v61  ;;  %v13277_v61 = vpop.xlane.xlu1 %1436 }
 0x857   : > { %v13257_v51 = vpop.f32.mrb[78].mxu1  ;;  %14553 = vst [vmem:[#allocation85_spill] sm:$0xff] %v13277_v61 }
 0x858   : > { %v13261_v2 = vpop.f32.mrb[79].mxu1  ;;  %v6130_v13 = vsel %vm276_vm0, %v13257_v51, -inf }
 0x859   : > { %v6127_v5 = vsel %vm276_vm0, %v13261_v2, -inf }
 0x85a   : > { %6131 = vmax.xlane.f32.xlu0 %v6130_v13  ;;  %v13295_v46 = vpop.xlane.xlu1 %1442 }
 0x85b   : > { %14558 = vst [vmem:[#allocation76_spill] sm:$0xff] %v13295_v46 }
 0x85c   : > { %v13267_v56 = vpop.f32.mrb[96].mxu0 }
 0x85d   : > { %14552 = vst [vmem:[#allocation92_spill] sm:$0xff] %v13267_v56  ;;  %v13269_v17 = vpop.f32.mrb[97].mxu0  ;;  %v6160_v13 = vsel %vm276_vm0, %v13267_v56, -inf  ;;  %v14596_v56 = vld [vmem:[#allocation50_spill] sm:$0xff] }
 0x85e   : > { %6128 = vmax.xlane.f32.xlu0 %v6127_v5  ;;  %v6157_v14 = vsel %vm276_vm0, %v13269_v17, -inf  ;;  %v13289_v5 = vpop.xlane.xlu0 %3080  ;;  %v13307_v16 = vpop.xlane.xlu1 %4661  ;;  %v1432_v11 = vsel %vm276_vm0, %v14596_v56, 0.0 }
 0x85f   : > { %6158 = vmax.xlane.f32.xlu1 %v6157_v14 }
 0x860   : > { %v13279_v44 = vpop.f32.mrb[98].mxu0 }
 0x861   : > { %14554 = vst [vmem:[#allocation93_spill] sm:$0xff] %v13279_v44  ;;  %v13281_v60 = vpop.f32.mrb[99].mxu0  ;;  %v6166_v8 = vsel %vm276_vm0, %v13279_v44, -inf  ;;  %v14594_v44 = vld [vmem:[#allocation13_spill] sm:$0xff] }
 0x862   : > { %14555 = vst [vmem:[#allocation86_spill] sm:$0xff] %v13281_v60  ;;  %6161 = vmax.xlane.f32.xlu0 %v6160_v13  ;;  %v6163_v49 = vsel %vm276_vm0, %v13281_v60, -inf  ;;  %v13305_v31 = vpop.xlane.xlu0 %3083 }
 0x863   : > { %v13287_v15 = vpop.f32.mrb[80].mxu1  ;;  %6167 = vmax.xlane.f32.xlu1 %v6166_v8 }
 0x864   : > { %14556 = vst [vmem:[#allocation94_spill] sm:$0xff] %v13287_v15  ;;  %v13291_v18 = vpop.f32.mrb[81].mxu1  ;;  %v6148_v14 = vsel %vm276_vm0, %v13287_v15, -inf  ;;  %v14586_v15 = vld [vmem:[#allocation42_spill] sm:$0xff] }
 0x865   : > { %14557 = vst [vmem:[#allocation96_spill] sm:$0xff] %v13291_v18  ;;  %v6145_v8 = vsel %vm276_vm0, %v13291_v18, -inf }
 0x866   : > { %6149 = vmax.xlane.f32.xlu0 %v6148_v14  ;;  %v13315_v22 = vpop.xlane.xlu0 %3086 }
 0x867   : > { %v13299_v45 = vpop.f32.mrb[82].mxu1  ;;  %6164 = vmax.xlane.f32.xlu1 %v6163_v49  ;;  %14563 = vst [vmem:[#allocation21_spill] sm:$0xff] %v13315_v22 }
 0x868   : > { %14559 = vst [vmem:[#allocation118_spill] sm:$0xff] %v13299_v45  ;;  %v13301_v13 = vpop.f32.mrb[83].mxu1  ;;  %v6154_v46 = vsel %vm276_vm0, %v13299_v45, -inf }
 0x869   : > { %14560 = vst [vmem:[#allocation97_spill] sm:$0xff] %v13301_v13  ;;  %v6151_v10 = vsel %vm276_vm0, %v13301_v13, -inf }
 0x86a   : > { %6146 = vmax.xlane.f32.xlu0 %v6145_v8  ;;  %v13321_v8 = vpop.xlane.xlu1 %4658 }
 0x86e   : > { %v13311_v14 = vpop.f32.mrb[100].mxu0  ;;  %6155 = vmax.xlane.f32.xlu0 %v6154_v46  ;;  %v13343_v60 = vpop.xlane.xlu1 %4667 }
 0x86f   : > { %14561 = vst [vmem:[#allocation12_spill] sm:$0xff] %v13311_v14  ;;  %v13313_v61 = vpop.f32.mrb[101].mxu0  ;;  %14571 = vst [vmem:[#allocation82_spill] sm:$0xff] %v13343_v60 }
 0x870   : > { %14562 = vst [vmem:[#allocation18_spill] sm:$0xff] %v13313_v61  ;;  %v6181_v49 = vsel %vm276_vm0, %v13313_v61, -inf  ;;  %v13335_v61 = vpop.xlane.xlu0 %3089 }
 0x871   : > { %6182 = vmax.xlane.f32.xlu1 %v6181_v49  ;;  %v6184_v49 = vsel %vm276_vm0, %v13311_v14, -inf  ;;  %14568 = vst [vmem:[#allocation120_spill] sm:$0xff] %v13335_v61 }
 0x872   : > { %v13323_v21 = vpop.f32.mrb[102].mxu0  ;;  %6152 = vmax.xlane.f32.xlu0 %v6151_v10  ;;  %v13353_v14 = vpop.xlane.xlu1 %4664 }
 0x873   : > { %14564 = vst [vmem:[#allocation46_spill] sm:$0xff] %v13323_v21  ;;  %v13325_v45 = vpop.f32.mrb[84].mxu1  ;;  %v13327_v18 = vpop.f32.mrb[103].mxu0  ;;  %v6190_v46 = vsel %vm276_vm0, %v13323_v21, -inf  ;;  %14573 = vst [vmem:[#allocation47_spill] sm:$0xff] %v13353_v14 }
 0x874   : > { %14565 = vst [vmem:[#allocation81_spill] sm:$0xff] %v13325_v45  ;;  %14566 = vst [vmem:[#allocation95_spill] sm:$0xff] %v13327_v18  ;;  %v13331_v22 = vpop.f32.mrb[85].mxu1  ;;  %v6187_v10 = vsel %vm276_vm0, %v13327_v18, -inf  ;;  %v6172_v21 = vsel %vm276_vm0, %v13325_v45, -inf }
 0x875   : > { %14567 = vst [vmem:[#allocation24_spill] sm:$0xff] %v13331_v22  ;;  %6191 = vmax.xlane.f32.xlu1 %v6190_v46  ;;  %v13347_v46 = vpop.xlane.xlu0 %3092  ;;  %v6169_v61 = vsel %vm276_vm0, %v13331_v22, -inf }
 0x876   : > { %6185 = vmax.xlane.f32.xlu0 %v6184_v49  ;;  %14572 = vst [vmem:[#allocation30_spill] sm:$0xff] %v13347_v46  ;;  %v14576_v46 = vld [vmem:[#allocation38_spill] sm:$0xff] }
 0x877   : > { %v13337_v13 = vpop.f32.mrb[86].mxu1  ;;  %v1405_v22 = vsel %vm276_vm0, %v14576_v46, 0.0  ;;  %v14581_v46 = vld [vmem:[#allocation40_spill] sm:$0xff] }
 0x878   : > { %14569 = vst [vmem:[#allocation14_spill] sm:$0xff] %v13337_v13  ;;  %v13339_v29 = vpop.f32.mrb[87].mxu1  ;;  %v6178_v49 = vsel %vm276_vm0, %v13337_v13, -inf  ;;  %v14577_v13 = vld [vmem:[#allocation48_spill] sm:$0xff]  ;;  %v1411_v18 = vsel %vm276_vm0, %v14581_v46, 0.0  ;;  %v14587_v46 = vld [vmem:[#allocation33_spill] sm:$0xff] }
 0x879   : > { %14570 = vst [vmem:[#allocation75_spill] sm:$0xff] %v13339_v29  ;;  %6188 = vmax.xlane.f32.xlu1 %v6187_v10  ;;  %v6175_v60 = vsel %vm276_vm0, %v13339_v29, -inf  ;;  %v14574_v10 = vld [vmem:[#allocation49_spill] sm:$0xff]  ;;  %v14579_v29 = vld [vmem:[#allocation39_spill] sm:$0xff] }
 0x87a   : > { %6173 = vmax.xlane.f32.xlu0 %v6172_v21  ;;  %v1447_v45 = vsel %vm276_vm0, %v14574_v10, 0.0  ;;  %v13359_v21 = vpop.xlane.xlu0 %3095  ;;  %v14580_v10 = vld [vmem:[#allocation53_spill] sm:$0xff] }
 0x87b   : > { %14575 = vst [vmem:[#allocation49_spill] sm:$0xff] %v13359_v21  ;;  %v1453_v21 = vsel %vm276_vm0, %v14580_v10, 0.0  ;;  %v14585_v10 = vld [vmem:[#allocation34_spill] sm:$0xff] }
 0x87d   : > { %6170 = vmax.xlane.f32.xlu1 %v6169_v61  ;;  %v13363_v61 = vpop.xlane.xlu1 %4649 }
 0x87e   : > { %6179 = vmax.xlane.f32.xlu0 %v6178_v49  ;;  %v1450_v49 = vsel %vm276_vm0, %v14577_v13, 0.0  ;;  %v13367_v14 = vpop.xlane.xlu0 %1439 }
 0x87f   : > { %14578 = vst [vmem:[#allocation38_spill] sm:$0xff] %v13367_v14  ;;  %v14584_v14 = vld [vmem:[#allocation41_spill] sm:$0xff] }
 0x881   : > { %6176 = vmax.xlane.f32.xlu1 %v6175_v60  ;;  %v1408_v60 = vsel %vm276_vm0, %v14579_v29, 0.0  ;;  %v1414_v29 = vsel %vm276_vm0, %v14584_v14, 0.0 }
 0x882   : > { %1448 = vadd.xlane.f32.xlu0 %v1447_v45  ;;  %v13373_v45 = vpop.xlane.xlu1 %4646 }
 0x885   : > { %1406 = vadd.xlane.f32.xlu1 %v1405_v22  ;;  %v14582_v22 = vld [vmem:[#allocation54_spill] sm:$0xff] }
 0x886   : > { %1451 = vadd.xlane.f32.xlu0 %v1450_v49  ;;  %v1456_v13 = vsel %vm276_vm0, %v14582_v22, 0.0  ;;  %v13379_v49 = vpop.xlane.xlu0 %1445  ;;  %v1462_v22 = vsel %vm276_vm0, %v14587_v46, 0.0  ;;  %v1468_v46 = vsel %vm276_vm0, %v14591_v33, 0.0 }
 0x887   : > { %14583 = vst [vmem:[#allocation48_spill] sm:$0xff] %v13379_v49  ;;  %v14588_v49 = vld [vmem:[#allocation43_spill] sm:$0xff] }
 0x888   : > { %v1420_v14 = vsel %vm276_vm0, %v14588_v49, 0.0  ;;  %v1426_v49 = vsel %vm276_vm0, %v14592_v23, 0.0 }
 0x889   : > { %1409 = vadd.xlane.f32.xlu1 %v1408_v60  ;;  %v13383_v60 = vpop.xlane.xlu1 %4655 }
 0x88a   : > { %1454 = vadd.xlane.f32.xlu0 %v1453_v21  ;;  %v1459_v21 = vsel %vm276_vm0, %v14585_v10, 0.0  ;;  %v4686_v4 = vpop.xlane.xlu0 %4685 }
 0x88d   : > { %1412 = vadd.xlane.f32.xlu1 %v1411_v18  ;;  %v1417_v18 = vsel %vm276_vm0, %v14586_v15, 0.0 }
 0x88e   : > { %1457 = vadd.xlane.f32.xlu0 %v1456_v13  ;;  %v13391_v13 = vpop.xlane.xlu1 %4652  ;;  %v13397_v10 = vpop.xlane.xlu0 %4691 }
 0x891   : > { %1415 = vadd.xlane.f32.xlu1 %v1414_v29  ;;  %v14589_v29 = vld [vmem:[#allocation29_spill] sm:$0xff] }
 0x892   : > { %1460 = vadd.xlane.f32.xlu0 %v1459_v21  ;;  %v1465_v36 = vsel %vm276_vm0, %v14589_v29, 0.0  ;;  %v14590_v21 = vld [vmem:[#allocation44_spill] sm:$0xff] }
 0x893   : > { %v1423_v15 = vsel %vm276_vm0, %v14590_v21, 0.0  ;;  %v1429_v21 = vsel %vm276_vm0, %v14594_v44, 0.0 }
 0x895   : > { %1418 = vadd.xlane.f32.xlu1 %v1417_v18  ;;  %v4683_v18 = vpop.xlane.xlu1 %4682 }
 0x896   : > { %1463 = vadd.xlane.f32.xlu0 %v1462_v22  ;;  %v13403_v22 = vpop.xlane.xlu0 %4688 }
 0x899   : > { %1421 = vadd.xlane.f32.xlu1 %v1420_v14  ;;  %v14593_v14 = vld [vmem:[#allocation51_spill] sm:$0xff] }
 0x89a   : > { %1466 = vadd.xlane.f32.xlu0 %v1465_v36  ;;  %v1471_v29 = vsel %vm276_vm0, %v14593_v14, 0.0  ;;  %v13409_v36 = vpop.xlane.xlu1 %4673 }
 0x89d   : > { %1424 = vadd.xlane.f32.xlu1 %v1423_v15  ;;  %v14595_v15 = vld [vmem:[#allocation52_spill] sm:$0xff] }
 0x89e   : > { %1469 = vadd.xlane.f32.xlu0 %v1468_v46  ;;  %v1474_v33 = vsel %vm276_vm0, %v14595_v15, 0.0  ;;  %v4680_v46 = vpop.xlane.xlu0 %4679  ;;  %v13417_v23 = vpop.xlane.xlu1 %4670 }
 0x8a1   : > { %1427 = vadd.xlane.f32.xlu1 %v1426_v49 }
 0x8a2   : > { %1472 = vadd.xlane.f32.xlu0 %v1471_v29  ;;  %v4677_v49 = vpop.xlane.xlu0 %4676 }
 0x8a3   : > { %10571 = vrcp.f32 %v4677_v49 }
 0x8a4   : > { %10573 = vrcp.f32 %v13195_v19 }
 0x8a5   : > { %1430 = vadd.xlane.f32.xlu1 %v1429_v21  ;;  %10575 = vrcp.f32 %v4680_v46 }
 0x8a6   : > { %1475 = vadd.xlane.f32.xlu0 %v1474_v33  ;;  %10577 = vrcp.f32 %v13233_v7  ;;  %v13425_v56 = vpop.xlane.xlu0 %4709  ;;  %v14597_v33 = vld [vmem:[#allocation108_spill] sm:$0xff] }
 0x8a7   : > { %10579 = vrcp.f32 %v4683_v18  ;;  %v3785_v49 = vmul.f32 %v10568_v50, %v14597_v33 }
 0x8a9   : > { %1433 = vadd.xlane.f32.xlu1 %v1432_v11 }
 0x8aa   : > { %v13429_v19 = vpop.xlane.xlu0 %4706 }
 0x8ad   : > { %v6138_v14 = vpop.xlane.xlu1 %6137 }
 0x8ae   : > { %v6198_v44 = vsub.f32 %v13197_v55, %v6138_v14  ;;  %v10572_v55 = vpop.eup %10571  ;;  %v13443_v50 = vpop.xlane.xlu0 %4715 }
 0x8af   : > { %v10574_v46 = vpop.eup %10573  ;;  %v5405_v18 = vmul.f32 %v10572_v55, %v13175_v37 }
 0x8b0   : > { %v6227_v15 = vmul.f32 1.442695, %v6198_v44  ;;  %v10576_v14 = vpop.eup %10575 }
 0x8b1   : > { %v6135_v29 = vpop.xlane.xlu1 %6134  ;;  %v10578_v44 = vpop.eup %10577  ;;  %v5406_v37 = vmul.f32 %v10576_v14, %v13173_v1 }
 0x8b2   : > { %v6197_v21 = vsub.f32 %v13199_v54, %v6135_v29  ;;  %v14598_v54 = vld [vmem:[#allocation107_spill] sm:$0xff]  ;;  %v10402_v29 = vunpack.i.h.bf16 %v13177_v34 }
 0x8b3   : > { %v3786_v7 = vmul.f32 %v10570_v57, %v14598_v54  ;;  %v10416_v57 = vunpack.i.l.bf16 %v13217_v32 }
 0x8b4   : > { %v6225_v11 = vmul.f32 1.442695, %v6197_v21  ;;  %v14599_v21 = vld [vmem:[#allocation102_spill] sm:$0xff] }
 0x8b6   : > { %10581 = vpow2.f32 %v6225_v11  ;;  %v10580_v11 = vpop.eup %10579 }
 0x8b7   : > { %10583 = vpow2.f32 %v6227_v15  ;;  %v3787_v15 = vmul.f32 %v10574_v46, %v14599_v21  ;;  %v5407_v33 = vmul.f32 %v10580_v11, %v13161_v48  ;;  %v14601_v48 = vld [vmem:[#allocation98_spill] sm:$0xff] }
 0x8b8   : > { %10585 = vrcp.f32 %v13205_v20  ;;  %v10401_v20 = vunpack.i.l.bf16 %v13177_v34  ;;  %v10417_v34 = vunpack.i.h.bf16 %v13217_v32  ;;  %v13463_v32 = vpop.xlane.xlu0 %4712 }
 0x8b9   : > { %10587 = vrcp.f32 %v4686_v4 }
 0x8ba   : > { %7083 = vrot.lane.b32.xlu1 %v3785_v49, %s10981_s6  ;;  %10589 = vrcp.f32 %v13207_v59  ;;  %v13466_v54 = vpack.c.bf16 %v10417_v34, %v10416_v57 }
 0x8bb   : > { %10591 = vrcp.f32 %v13237_v25  ;;  %v9825_v25 = vpack.c.bf16 %v10402_v29, %v10401_v20 }
 0x8bc   : > { %7085 = vrot.lane.b32.xlu0 %v3786_v7, %s10981_s6  ;;  %10593 = vrcp.f32 %v13373_v45  ;;  %v14600_v45 = vld [vmem:[#allocation101_spill] sm:$0xff] }
 0x8bd   : > { %10595 = vrcp.f32 %v13245_v6  ;;  %v3788_v49 = vmul.f32 %v10578_v44, %v14600_v45  ;;  %v4698_v44 = vpop.xlane.xlu0 %4697 }
 0x8be   : > { %7179 = vrot.lane.b32.xlu1 %v5405_v18, %s10982_s9  ;;  %10597 = vrcp.f32 %v13363_v61  ;;  %v14602_v61 = vld [vmem:[#allocation83_spill] sm:$0xff] }
 0x8bf   : > { %10599 = vrcp.f32 %v13403_v22  ;;  %v14603_v22 = vld [vmem:[#allocation104_spill] sm:$0xff] }
 0x8c0   : > { %v13441_v4 = vpop.eup %10581  ;;  %7087 = vrot.lane.b32.xlu0 %v3787_v15, %s10981_s6  ;;  %10601 = vrcp.f32 %v13211_v30 }
 0x8c1   : > { %v13447_v59 = vpop.eup %10583  ;;  %9251 = vmatprep.mubr.msk.f32.mxu0 %vm276_vm0, %v13441_v4  ;;  %10603 = vrcp.f32 %v13397_v10  ;;  %v14604_v10 = vld [vmem:[#allocation103_spill] sm:$0xff]  ;;  %v4695_v57 = vpop.xlane.xlu0 %4694 }
 0x8c2   : > { %9252 = vmatmul.mubr.msk.f32.vlgmr.msra.gmra.mrb[104].mxu0 %vm276_vm0, %v13447_v59  ;;  %7181 = vrot.lane.b32.xlu1 %v5406_v37, %s10982_s9  ;;  %v10586_v1 = vpop.eup %10585  ;;  %10605 = vrcp.f32 %v13215_v38 }
 0x8c3   : > { %9824 = vmatpush3.bf16.msra.mxu0 %v13128_v26  ;;  %v10588_v55 = vpop.eup %10587  ;;  %v3775_v7 = vmul.f32 %v10586_v1, %v14601_v48  ;;  %10607 = vrcp.f32 %v13259_v63  ;;  %v14607_v48 = vld [vmem:[#allocation114_spill] sm:$0xff] }
 0x8c4   : > { %9826 = vmatprep.subr.bf16.mxu0 %v9825_v25  ;;  %7183 = vrot.lane.b32.xlu0 %v5407_v33, %s10982_s9  ;;  %v10590_v46 = vpop.eup %10589  ;;  %v5408_v26 = vmul.f32 %v10588_v55, %v13159_v12  ;;  %10609 = vrcp.f32 %v13391_v13 }
 0x8c5   : > { %v10592_v6 = vpop.eup %10591  ;;  %v3776_v18 = vmul.f32 %v10590_v46, %v14602_v61  ;;  %10611 = vrcp.f32 %v13273_v43 }
 0x8c6   : > { %7089 = vrot.lane.b32.xlu1 %v3788_v49, %s10981_s6  ;;  %v10594_v14 = vpop.eup %10593  ;;  %v3789_v29 = vmul.f32 %v10592_v6, %v14603_v22  ;;  %10613 = vrcp.f32 %v13383_v60  ;;  %v4704_v60 = vpop.xlane.xlu0 %4703 }
 0x8c7   : > { %9828 = vmatpush3.bf16.msra.mxu0 %v9825_v25  ;;  %v10596_v20 = vpop.eup %10595  ;;  %v5395_v12 = vmul.f32 %v10594_v14, %v13153_v40  ;;  %10615 = vrcp.f32 %v4695_v57 }
 0x8c8   : > { %9838 = vmatprep.subr.bf16.mxu0 %v13466_v54  ;;  %7063 = vrot.lane.b32.xlu0 %v3775_v7, %s10981_s6  ;;  %v10598_v30 = vpop.eup %10597  ;;  %v3790_v11 = vmul.f32 %v10596_v20, %v14604_v10 }
 0x8c9   : > { %v10600_v37 = vpop.eup %10599  ;;  %v5396_v40 = vmul.f32 %v10598_v30, %v13151_v27 }
 0x8ca   : > { %7185 = vrot.lane.b32.xlu1 %v5408_v26, %s10982_s9  ;;  %v10602_v25 = vpop.eup %10601  ;;  %v5409_v33 = vmul.f32 %v10600_v37, %v13165_v58  ;;  %v14606_v58 = vld [vmem:[#allocation99_spill] sm:$0xff]  ;;  %v4701_v6 = vpop.xlane.xlu0 %4700 }
 0x8cb   : > { %v10604_v13 = vpop.eup %10603 }
 0x8cc   : > { %7065 = vrot.lane.b32.xlu0 %v3776_v18, %s10981_s6  ;;  %v10606_v45 = vpop.eup %10605  ;;  %v5410_v27 = vmul.f32 %v10604_v13, %v13163_v35  ;;  %v14608_v18 = vld [vmem:[#allocation113_spill] sm:$0xff]  ;;  %v14612_v13 = vld [vmem:[#allocation16_spill] sm:$0xff] }
 0x8cd   : > { %v6144_v21 = vpop.xlane.xlu1 %6143  ;;  %v10608_v43 = vpop.eup %10607  ;;  %v3778_v49 = vmul.f32 %v10606_v45, %v14606_v58 }
 0x8ce   : > { %7091 = vrot.lane.b32.xlu1 %v3789_v29, %s10981_s6  ;;  %v6200_v15 = vsub.f32 %v13221_v28, %v6144_v21  ;;  %v10610_v55 = vpop.eup %10609  ;;  %v3791_v7 = vmul.f32 %v10608_v43, %v14607_v48  ;;  %v14613_v43 = vld [vmem:[#allocation92_spill] sm:$0xff] }
 0x8cf   : > { %v10612_v46 = vpop.eup %10611  ;;  %v5397_v35 = vmul.f32 %v10610_v55, %v13157_v3 }
 0x8d0   : > { %7159 = vrot.lane.b32.xlu0 %v5395_v12, %s10982_s9  ;;  %v6231_v63 = vmul.f32 1.442695, %v6200_v15  ;;  %v10614_v26 = vpop.eup %10613  ;;  %v3792_v14 = vmul.f32 %v10612_v46, %v14608_v18 }
 0x8d1   : > { %v6141_v34 = vpop.xlane.xlu1 %6140 }
 0x8d2   : > { %v6199_v38 = vsub.f32 %v13223_v9, %v6141_v34  ;;  %7093 = vrot.lane.b32.xlu1 %v3790_v11, %s10981_s6  ;;  %v14605_v9 = vld [vmem:[#allocation100_spill] sm:$0xff] }
 0x8d3   : > { %v3777_v1 = vmul.f32 %v10602_v25, %v14605_v9  ;;  %v10392_v9 = vunpack.i.h.bf16 %v14612_v13 }
 0x8d4   : > { %v6229_v28 = vmul.f32 1.442695, %v6199_v38  ;;  %7161 = vrot.lane.b32.xlu0 %v5396_v40, %s10982_s9 }
 0x8d6   : > { %10617 = vpow2.f32 %v6229_v28  ;;  %7187 = vrot.lane.b32.xlu1 %v5409_v33, %s10982_s9 }
 0x8d7   : > { %10619 = vpow2.f32 %v6231_v63 }
 0x8d8   : > { %7067 = vrot.lane.b32.xlu0 %v3777_v1, %s10981_s6  ;;  %10621 = vrcp.f32 %v13219_v24  ;;  %v10616_v24 = vpop.eup %10615  ;;  %v10391_v1 = vunpack.i.l.bf16 %v14612_v13 }
 0x8d9   : > { %10623 = vrcp.f32 %v4698_v44 }
 0x8da   : > { %7189 = vrot.lane.b32.xlu1 %v5410_v27, %s10982_s9  ;;  %10625 = vrcp.f32 %v13229_v53  ;;  %v5398_v53 = vmul.f32 %v10614_v26, %v13155_v52  ;;  %v14609_v52 = vld [vmem:[#allocation79_spill] sm:$0xff]  ;;  %v14616_v26 = vld [vmem:[#allocation26_spill] sm:$0xff]  ;;  %v9817_v18 = vpack.c.bf16 %v10392_v9, %v10391_v1 }
 0x8db   : > { %10627 = vrcp.f32 %v13289_v5 }
 0x8dc   : > { %7069 = vrot.lane.b32.xlu0 %v3778_v49, %s10981_s6  ;;  %10629 = vrcp.f32 %v13321_v8  ;;  %v5411_v8 = vmul.f32 %v10616_v24, %v13193_v62 }
 0x8dd   : > { %10631 = vrcp.f32 %v13305_v31 }
 0x8de   : > { %7095 = vrot.lane.b32.xlu1 %v3791_v7, %s10981_s6  ;;  %10633 = vrcp.f32 %v13307_v16  ;;  %v14610_v16 = vld [vmem:[#allocation17_spill] sm:$0xff] }
 0x8df   : > { %10635 = vrcp.f32 %v13235_v39  ;;  %v14615_v7 = vld [vmem:[#allocation93_spill] sm:$0xff] }
 0x8e0   : > { %v13507_v61 = vpop.eup %10617  ;;  %7163 = vrot.lane.b32.xlu0 %v5397_v35, %s10982_s9  ;;  %10637 = vrcp.f32 %v4701_v6 }
 0x8e1   : > { %v13511_v44 = vpop.eup %10619  ;;  %9254 = vmatprep.mubr.msk.f32.mxu0 %vm276_vm0, %v13507_v61 }
 0x8e2   : > { %9255 = vmatmul.mubr.msk.f32.gmra.mrb[106].mxu0 %vm276_vm0, %v13511_v44  ;;  %7097 = vrot.lane.b32.xlu1 %v3792_v14, %s10981_s6  ;;  %v6126_v3 = vpop.xlane.xlu1 %6125  ;;  %v10622_v5 = vpop.eup %10621  ;;  %v14617_v14 = vld [vmem:[#allocation88_spill] sm:$0xff] }
 0x8e3   : > { %v6194_v22 = vsub.f32 %v13247_v41, %v6126_v3  ;;  %v6123_v29 = vpop.xlane.xlu0 %6122  ;;  %v10624_v21 = vpop.eup %10623  ;;  %v3779_v31 = vmul.f32 %v10622_v5, %v14609_v52  ;;  %v10407_v3 = vunpack.i.h.bf16 %v14617_v14 }
 0x8e4   : > { %v6193_v20 = vsub.f32 %v13251_v42, %v6123_v29  ;;  %7165 = vrot.lane.b32.xlu0 %v5398_v53, %s10982_s9  ;;  %v10626_v15 = vpop.eup %10625  ;;  %v5412_v62 = vmul.f32 %v10624_v21, %v13191_v0  ;;  %v10406_v53 = vunpack.i.l.bf16 %v14617_v14  ;;  %v14630_v14 = vld [vmem:[#allocation46_spill] sm:$0xff] }
 0x8e5   : > { %v6219_v12 = vmul.f32 1.442695, %v6194_v22  ;;  %v10628_v10 = vpop.eup %10627  ;;  %v3780_v39 = vmul.f32 %v10626_v15, %v14610_v16  ;;  %v14618_v22 = vld [vmem:[#allocation119_spill] sm:$0xff]  ;;  %v14622_v15 = vld [vmem:[#allocation84_spill] sm:$0xff] }
 0x8e6   : > { %v6217_v30 = vmul.f32 1.442695, %v6193_v20  ;;  %7191 = vrot.lane.b32.xlu1 %v5411_v8, %s10982_s9  ;;  %v10630_v11 = vpop.eup %10629  ;;  %v14619_v8 = vld [vmem:[#allocation94_spill] sm:$0xff] }
 0x8e7   : > { %v6132_v41 = vpop.xlane.xlu0 %6131  ;;  %v10632_v25 = vpop.eup %10631  ;;  %v5399_v28 = vmul.f32 %v10630_v11, %v13145_v47 }
 0x8e8   : > { %10639 = vpow2.f32 %v6217_v30  ;;  %v6196_v42 = vsub.f32 %v13257_v51, %v6132_v41  ;;  %7071 = vrot.lane.b32.xlu0 %v3779_v31, %s10981_s6  ;;  %v14611_v51 = vld [vmem:[#allocation116_spill] sm:$0xff]  ;;  %v10634_v33 = vpop.eup %10633  ;;  %v14621_v30 = vld [vmem:[#allocation86_spill] sm:$0xff] }
 0x8e9   : > { %10641 = vpow2.f32 %v6219_v12  ;;  %v3793_v40 = vmul.f32 %v10628_v10, %v14611_v51  ;;  %v10636_v27 = vpop.eup %10635  ;;  %v5400_v35 = vmul.f32 %v10634_v33, %v14616_v26  ;;  %v14620_v12 = vld [vmem:[#allocation15_spill] sm:$0xff]  ;;  %v14623_v10 = vld [vmem:[#allocation22_spill] sm:$0xff] }
 0x8ea   : > { %7193 = vrot.lane.b32.xlu1 %v5412_v62, %s10982_s9  ;;  %10643 = vrcp.f32 %v4704_v60  ;;  %v6223_v37 = vmul.f32 1.442695, %v6196_v42  ;;  %v10638_v55 = vpop.eup %10637  ;;  %v3781_v41 = vmul.f32 %v10636_v27, %v14622_v15  ;;  %v14626_v33 = vld [vmem:[#allocation118_spill] sm:$0xff] }
 0x8eb   : > { %v6129_v34 = vpop.xlane.xlu0 %6128  ;;  %v5413_v29 = vmul.f32 %v10638_v55, %v14618_v22 }
 0x8ec   : > { %v6195_v57 = vsub.f32 %v13261_v2, %v6129_v34  ;;  %v6159_v38 = vpop.xlane.xlu1 %6158  ;;  %7073 = vrot.lane.b32.xlu0 %v3780_v39, %s10981_s6  ;;  %10645 = vpow2.f32 %v6223_v37  ;;  %v14624_v39 = vld [vmem:[#allocation96_spill] sm:$0xff]  ;;  %v9829_v37 = vpack.c.bf16 %v10407_v3, %v10406_v53 }
 0x8ed   : > { %v6205_v0 = vsub.f32 %v13269_v17, %v6159_v38  ;;  %v14614_v17 = vld [vmem:[#allocation115_spill] sm:$0xff] }
 0x8ee   : > { %v6221_v63 = vmul.f32 1.442695, %v6195_v57  ;;  %7099 = vrot.lane.b32.xlu1 %v3793_v40, %s10981_s6  ;;  %v3794_v49 = vmul.f32 %v10632_v25, %v14614_v17  ;;  %v14625_v25 = vld [vmem:[#allocation87_spill] sm:$0xff] }
 0x8ef   : > { %v6241_v2 = vmul.f32 1.442695, %v6205_v0  ;;  %v6162_v45 = vpop.xlane.xlu0 %6161  ;;  %v10422_v0 = vunpack.i.h.bf16 %v14625_v25 }
 0x8f0   : > { %10647 = vpow2.f32 %v6221_v63  ;;  %v6206_v60 = vsub.f32 %v14613_v43, %v6162_v45  ;;  %v6168_v58 = vpop.xlane.xlu1 %6167  ;;  %7167 = vrot.lane.b32.xlu0 %v5399_v28, %s10982_s9  ;;  %v10421_v63 = vunpack.i.l.bf16 %v14625_v25 }
 0x8f1   : > { %10649 = vpow2.f32 %v6241_v2  ;;  %v6208_v46 = vsub.f32 %v14615_v7, %v6168_v58  ;;  %v14627_v2 = vld [vmem:[#allocation18_spill] sm:$0xff] }
 0x8f2   : > { %v13545_v47 = vpop.eup %10639  ;;  %v6243_v48 = vmul.f32 1.442695, %v6206_v60  ;;  %7101 = vrot.lane.b32.xlu1 %v3794_v49, %s10981_s6  ;;  %v9841_v43 = vpack.c.bf16 %v10422_v0, %v10421_v63  ;;  %v14628_v60 = vld [vmem:[#allocation97_spill] sm:$0xff] }
 0x8f3   : > { %v13550_v24 = vpop.eup %10641  ;;  %9237 = vmatprep.mubr.msk.f32.mxu1 %vm276_vm0, %v13545_v47  ;;  %v6150_v6 = vpop.xlane.xlu0 %6149  ;;  %v6247_v31 = vmul.f32 1.442695, %v6208_v46  ;;  %v14629_v46 = vld [vmem:[#allocation90_spill] sm:$0xff] }
 0x8f4   : > { %10651 = vpow2.f32 %v6243_v48  ;;  %9238 = vmatmul.mubr.msk.f32.vlgmr.msra.gmra.mrb[88].mxu1 %vm276_vm0, %v13550_v24  ;;  %v6165_v5 = vpop.xlane.xlu1 %6164  ;;  %7169 = vrot.lane.b32.xlu0 %v5400_v35, %s10982_s9  ;;  %v10644_v20 = vpop.eup %10643  ;;  %v6202_v21 = vsub.f32 %v14619_v8, %v6150_v6  ;;  %v10412_v26 = vunpack.i.h.bf16 %v14629_v46  ;;  %v14632_v8 = vld [vmem:[#allocation95_spill] sm:$0xff] }
 0x8f5   : > { %9816 = vmatpush3.bf16.msra.mxu1 %v14620_v12  ;;  %v6207_v52 = vsub.f32 %v14621_v30, %v6165_v5  ;;  %v5414_v16 = vmul.f32 %v10644_v20, %v14623_v10 }
 0x8f6   : > { %9818 = vmatprep.subr.bf16.mxu1 %v9817_v18  ;;  %7195 = vrot.lane.b32.xlu1 %v5413_v29, %s10982_s9  ;;  %v13568_v34 = vpop.eup %10645  ;;  %v6235_v57 = vmul.f32 1.442695, %v6202_v21 }
 0x8f7   : > { %v6245_v42 = vmul.f32 1.442695, %v6207_v52  ;;  %v6147_v62 = vpop.xlane.xlu0 %6146  ;;  %v14633_v52 = vld [vmem:[#allocation81_spill] sm:$0xff] }
 0x8f8   : > { %v6201_v11 = vsub.f32 %v14624_v39, %v6147_v62  ;;  %7075 = vrot.lane.b32.xlu0 %v3781_v41, %s10981_s6  ;;  %v14634_v62 = vld [vmem:[#allocation24_spill] sm:$0xff] }
 0x8f9   : > { %10653 = vpow2.f32 %v6245_v42  ;;  %9820 = vmatpush3.bf16.msra.mxu1 %v9817_v18  ;;  %v10411_v18 = vunpack.i.l.bf16 %v14629_v46 }
 0x8fa   : > { %v13570_v38 = vpop.eup %10647  ;;  %10655 = vpow2.f32 %v6247_v31  ;;  %v6233_v51 = vmul.f32 1.442695, %v6201_v11  ;;  %9830 = vmatprep.subr.bf16.mxu1 %v9829_v37  ;;  %7197 = vrot.lane.b32.xlu1 %v5414_v16, %s10982_s9  ;;  %v14635_v11 = vld [vmem:[#allocation14_spill] sm:$0xff] }
 0x8fb   : > { %v13573_v40 = vpop.eup %10649  ;;  %9240 = vmatprep.mubr.msk.f32.mxu1 %vm276_vm0, %v13570_v38  ;;  %v6156_v28 = vpop.xlane.xlu0 %6155  ;;  %v9833_v15 = vpack.c.bf16 %v10412_v26, %v10411_v18 }
 0x8fc   : > { %10657 = vpow2.f32 %v6233_v51  ;;  %9241 = vmatmul.mubr.msk.f32.gmra.mrb[90].mxu1 %vm276_vm0, %v13568_v34  ;;  %9279 = vmatprep.mubr.msk.f32.mxu0 %vm276_vm0, %v13573_v40  ;;  %v6204_v13 = vsub.f32 %v14626_v33, %v6156_v28  ;;  %v14636_v28 = vld [vmem:[#allocation75_spill] sm:$0xff] }
 0x8fd   : > { %10659 = vpow2.f32 %v6235_v57 }
 0x8fe   : > { %v13584_v9 = vpop.eup %10651  ;;  %v6183_v1 = vpop.xlane.xlu1 %6182  ;;  %v6239_v17 = vmul.f32 1.442695, %v6204_v13 }
 0x8ff   : > { %v6213_v45 = vsub.f32 %v14627_v2, %v6183_v1  ;;  %v6153_v27 = vpop.xlane.xlu0 %6152  ;;  %9280 = vmatmul.mubr.msk.f32.vlgmr.msra.gmra.mrb[108].mxu0 %vm276_vm0, %v13584_v9 }
 0x900   : > { %v6203_v58 = vsub.f32 %v14628_v60, %v6153_v27  ;;  %9840 = vmatpush3.bf16.msra.mxu0 %v13466_v54  ;;  %v14631_v54 = vld [vmem:[#allocation12_spill] sm:$0xff] }
 0x901   : > { %v6257_v49 = vmul.f32 1.442695, %v6213_v45  ;;  %9842 = vmatprep.subr.bf16.mxu0 %v9841_v43 }
 0x902   : > { %v6237_v55 = vmul.f32 1.442695, %v6203_v58  ;;  %v6192_v48 = vpop.xlane.xlu1 %6191 }
 0x903   : > { %v13591_v7 = vpop.eup %10653  ;;  %10661 = vpow2.f32 %v6257_v49  ;;  %v6186_v35 = vpop.xlane.xlu0 %6185  ;;  %v6216_v3 = vsub.f32 %v14630_v14, %v6192_v48  ;;  %v6304_v49 = vsel %vm276_vm0, %v13584_v9, 0.0  ;;  %v6280_v14 = vsel %vm276_vm0, %v13447_v59, 0.0 }
 0x904   : > { %v13594_v6 = vpop.eup %10655  ;;  %10663 = vpow2.f32 %v6237_v55  ;;  %9844 = vmatpush3.bf16.msra.mxu0 %v9841_v43  ;;  %v6214_v53 = vsub.f32 %v14631_v54, %v6186_v35  ;;  %9282 = vmatprep.mubr.msk.f32.mxu0 %vm276_vm0, %v13591_v7  ;;  %v6277_v59 = vsel %vm276_vm0, %v13441_v4, 0.0  ;;  %v6283_v4 = vsel %vm276_vm0, %v13507_v61, 0.0 }
 0x905   : > { %10665 = vpow2.f32 %v6239_v17  ;;  %9283 = vmatmul.mubr.msk.f32.gmra.mrb[110].mxu0 %vm276_vm0, %v13594_v6  ;;  %v6263_v30 = vmul.f32 1.442695, %v6216_v3  ;;  %v6310_v35 = vsel %vm276_vm0, %v13594_v6, 0.0  ;;  %v6307_v6 = vsel %vm276_vm0, %v13591_v7, 0.0 }
 0x906   : > { %v13603_v5 = vpop.eup %10657  ;;  %v6259_v22 = vmul.f32 1.442695, %v6214_v53  ;;  %v6189_v29 = vpop.xlane.xlu1 %6188  ;;  %v6286_v7 = vsel %vm276_vm0, %v13511_v44, 0.0  ;;  %v14640_v44 = vld [vmem:[#allocation76_spill] sm:$0xff] }
 0x907   : > { %v13605_v20 = vpop.eup %10659  ;;  %v6215_v21 = vsub.f32 %v14632_v8, %v6189_v29  ;;  %9265 = vmatprep.mubr.msk.f32.mxu1 %vm276_vm0, %v13603_v5  ;;  %v6174_v12 = vpop.xlane.xlu0 %6173 }
 0x908   : > { %10667 = vpow2.f32 %v6259_v22  ;;  %v6210_v31 = vsub.f32 %v14633_v52, %v6174_v12  ;;  %9266 = vmatmul.mubr.msk.f32.vlgmr.msra.gmra.mrb[92].mxu1 %vm276_vm0, %v13605_v20  ;;  %v14638_v52 = vld [vmem:[#allocation89_spill] sm:$0xff] }
 0x909   : > { %v6261_v41 = vmul.f32 1.442695, %v6215_v21  ;;  %9832 = vmatpush3.bf16.msra.mxu1 %v9829_v37 }
 0x90a   : > { %9834 = vmatprep.subr.bf16.mxu1 %v9833_v15  ;;  %v6171_v42 = vpop.xlane.xlu1 %6170  ;;  %v6251_v39 = vmul.f32 1.442695, %v6210_v31 }
 0x90b   : > { %10669 = vpow2.f32 %v6261_v41  ;;  %v6209_v10 = vsub.f32 %v14634_v62, %v6171_v42  ;;  %v6180_v16 = vpop.xlane.xlu0 %6179  ;;  %v14639_v41 = vld [vmem:[#allocation85_spill] sm:$0xff]  ;;  %v6268_v42 = vsel %vm276_vm0, %v13550_v24, 0.0  ;;  %v14641_v62 = vld [vmem:[#allocation47_spill] sm:$0xff]  ;;  %v6274_v24 = vsel %vm276_vm0, %v13568_v34, 0.0 }
 0x90c   : > { %10671 = vpow2.f32 %v6263_v30  ;;  %v6212_v57 = vsub.f32 %v14635_v11, %v6180_v16  ;;  %v14637_v30 = vld [vmem:[#allocation38_spill] sm:$0xff]  ;;  %v6265_v16 = vsel %vm276_vm0, %v13545_v47, 0.0  ;;  %v6271_v34 = vsel %vm276_vm0, %v13570_v38, 0.0 }
 0x90d   : > { %v13615_v51 = vpop.eup %10661  ;;  %v6249_v25 = vmul.f32 1.442695, %v6209_v10  ;;  %9836 = vmatpush3.bf16.msra.mxu1 %v9833_v15  ;;  %v14643_v47 = vld [vmem:[#allocation78_spill] sm:$0xff]  ;;  %v6301_v38 = vsel %vm276_vm0, %v13573_v40, 0.0 }
 0x90e   : > { %v13617_v0 = vpop.eup %10663  ;;  %9307 = vmatprep.mubr.msk.f32.mxu0 %vm276_vm0, %v13615_v51  ;;  %v6177_v37 = vpop.xlane.xlu1 %6176  ;;  %v6255_v1 = vmul.f32 1.442695, %v6212_v57 }
 0x90f   : > { %v10666_v63 = vpop.eup %10665  ;;  %10673 = vpow2.f32 %v6249_v25  ;;  %v6211_v33 = vsub.f32 %v14636_v28, %v6177_v37  ;;  %9268 = vmatprep.mubr.msk.f32.mxu1 %vm276_vm0, %v13617_v0  ;;  %v13624_v13 = vpop.xlane.xlu0 %1448  ;;  %v14642_v28 = vld [vmem:[#allocation65_spill] sm:$0xff] }
 0x910   : > { %10675 = vpow2.f32 %v6251_v39  ;;  %9269 = vmatmul.mubr.msk.f32.gmra.mrb[94].mxu1 %vm276_vm0, %v10666_v63  ;;  %v6298_v29 = vsel %vm276_vm0, %v10666_v63, 0.0 }
 0x911   : > { %v6253_v2 = vmul.f32 1.442695, %v6211_v33 }
 0x912   : > { %v13627_v45 = vpop.eup %10667  ;;  %v1407_v27 = vpop.xlane.xlu1 %1406 }
 0x913   : > { %10677 = vpow2.f32 %v6253_v2  ;;  %v13629_v43 = vpop.xlane.xlu0 %1451  ;;  %9308 = vmatmul.mubr.msk.f32.vlgmr.msra.gmra.mrb[112].mxu0 %vm276_vm0, %v13627_v45 }
 0x914   : > { %10679 = vpow2.f32 %v6255_v1 }
 0x915   : > { %v13633_v60 = vpop.eup %10669  ;;  %10681 = vrcp.f32 %v14637_v30  ;;  %v14646_v30 = vld [vmem:[#allocation60_spill] sm:$0xff] }
 0x916   : > { %v13635_v58 = vpop.eup %10671  ;;  %9310 = vmatprep.mubr.msk.f32.mxu0 %vm276_vm0, %v13633_v60  ;;  %v13639_v17 = vpop.xlane.xlu1 %1409  ;;  %10683 = vrcp.f32 %v14638_v52 }
 0x917   : > { %6305 = vadd.xlane.f32.xlu0 %v6304_v49  ;;  %v13643_v55 = vpop.xlane.xlu0 %1454  ;;  %9311 = vmatmul.mubr.msk.f32.gmra.mrb[114].mxu0 %vm276_vm0, %v13635_v58  ;;  %10685 = vrcp.f32 %v14639_v41 }
 0x918   : > { %10687 = vrcp.f32 %v14640_v44  ;;  %v14647_v44 = vld [vmem:[#allocation27_spill] sm:$0xff] }
 0x919   : > { %v13647_v48 = vpop.eup %10673  ;;  %10689 = vrcp.f32 %v14641_v62  ;;  %v14648_v62 = vld [vmem:[#allocation70_spill] sm:$0xff] }
 0x91a   : > { %v13649_v46 = vpop.eup %10675  ;;  %9293 = vmatprep.mubr.msk.f32.mxu1 %vm276_vm0, %v13647_v48  ;;  %v13653_v26 = vpop.xlane.xlu1 %1412 }
 0x91b   : > { %9294 = vmatmul.mubr.msk.f32.vlgmr.msra.gmra.mrb[96].mxu1 %vm276_vm0, %v13649_v46  ;;  %6311 = vadd.xlane.f32.xlu0 %v6310_v35  ;;  %v13659_v9 = vpop.xlane.xlu0 %1457 }
 0x91d   : > { %v13661_v18 = vpop.eup %10677 }
 0x91e   : > { %v13665_v3 = vpop.eup %10679  ;;  %6281 = vadd.xlane.f32.xlu1 %v6280_v14  ;;  %9296 = vmatprep.mubr.msk.f32.mxu1 %vm276_vm0, %v13661_v18  ;;  %v13669_v54 = vpop.xlane.xlu1 %1415  ;;  %v14644_v14 = vld [vmem:[#allocation48_spill] sm:$0xff] }
 0x91f   : > { %9297 = vmatmul.mubr.msk.f32.gmra.mrb[98].mxu1 %vm276_vm0, %v13665_v3  ;;  %6308 = vadd.xlane.f32.xlu0 %v6307_v6  ;;  %v13675_v53 = vpop.xlane.xlu0 %1460  ;;  %v10682_v11 = vpop.eup %10681 }
 0x920   : > { %v10684_v25 = vpop.eup %10683  ;;  %v2166_v33 = vmul.f32 %v10682_v11, %v14642_v28 }
 0x921   : > { %v10686_v37 = vpop.eup %10685  ;;  %v3782_v49 = vmul.f32 %v10684_v25, %v14643_v47  ;;  %v14650_v47 = vld [vmem:[#allocation37_spill] sm:$0xff] }
 0x922   : > { %6278 = vadd.xlane.f32.xlu1 %v6277_v59  ;;  %v13679_v22 = vpop.xlane.xlu1 %1418  ;;  %v10688_v1 = vpop.eup %10687 }
 0x923   : > { %6299 = vadd.xlane.f32.xlu0 %v6298_v29  ;;  %v13682_v8 = vpop.xlane.xlu0 %1463  ;;  %v10690_v35 = vpop.eup %10689 }
 0x926   : > { %6287 = vadd.xlane.f32.xlu1 %v6286_v7  ;;  %v13686_v21 = vpop.xlane.xlu1 %1421 }
 0x927   : > { %v13688_v12 = vpop.xlane.xlu0 %1466 }
 0x92a   : > { %6284 = vadd.xlane.f32.xlu1 %v6283_v4  ;;  %v13694_v31 = vpop.xlane.xlu1 %1424  ;;  %v2167_v4 = vmul.f32 %v10688_v1, %v14646_v30  ;;  %v6292_v1 = vsel %vm276_vm0, %v13605_v20, 0.0  ;;  %v14651_v20 = vld [vmem:[#allocation59_spill] sm:$0xff] }
 0x92b   : > { %v13696_v15 = vpop.xlane.xlu0 %1469 }
 0x92e   : > { %6269 = vadd.xlane.f32.xlu1 %v6268_v42  ;;  %v13703_v10 = vpop.xlane.xlu1 %1427  ;;  %v5401_v42 = vmul.f32 %v10690_v35, %v14647_v44 }
 0x92f   : > { %v1473_v61 = vpop.xlane.xlu0 %1472 }
 0x930   : > { %10691 = vrcp.f32 %v1473_v61 }
 0x932   : > { %6266 = vadd.xlane.f32.xlu1 %v6265_v16  ;;  %v13707_v39 = vpop.xlane.xlu1 %1430 }
 0x933   : > { %v1476_v57 = vpop.xlane.xlu0 %1475 }
 0x934   : > { %10693 = vrcp.f32 %v1476_v57 }
 0x935   : > { %10695 = vrcp.f32 %v1407_v27  ;;  %v14645_v27 = vld [vmem:[#allocation66_spill] sm:$0xff] }
 0x936   : > { %6275 = vadd.xlane.f32.xlu1 %v6274_v24  ;;  %v13711_v63 = vpop.xlane.xlu1 %1433  ;;  %10697 = vrcp.f32 %v14644_v14  ;;  %v2165_v59 = vmul.f32 %v10686_v37, %v14645_v27  ;;  %v14649_v37 = vld [vmem:[#allocation69_spill] sm:$0xff]  ;;  %v6289_v27 = vsel %vm276_vm0, %v13603_v5, 0.0 }
 0x937   : > { %v7086_v2 = vpop.permute.xlu0 %7085  ;;  %10699 = vrcp.f32 %v13639_v17 }
 0x938   : > { %v7338_v6 = vsel %vm570_vm1, %v2166_v33, %v7086_v2  ;;  %10701 = vrcp.f32 %v13624_v13 }
 0x939   : > { %7077 = vrot.lane.b32.xlu0 %v3782_v49, %s10981_s6  ;;  %10703 = vrcp.f32 %v13629_v43  ;;  %v6295_v43 = vsel %vm276_vm0, %v13617_v0, 0.0 }
 0x93a   : > { %v10692_v29 = vpop.eup %10691  ;;  %6272 = vadd.xlane.f32.xlu1 %v6271_v34  ;;  %v7084_v7 = vpop.permute.xlu1 %7083  ;;  %10705 = vrcp.f32 %v13653_v26 }
 0x93b   : > { %v7337_v52 = vsel %vm570_vm1, %v2165_v59, %v7084_v7  ;;  %v7088_v41 = vpop.permute.xlu0 %7087  ;;  %v13726_v61 = vmul.f32 %v10692_v29, %v14648_v62  ;;  %v14652_v7 = vld [vmem:[#allocation32_spill] sm:$0xff]  ;;  %10707 = vrcp.f32 %v13669_v54 }
 0x93c   : > { %v7339_v17 = vsel %vm570_vm1, %v2167_v4, %v7088_v41 }
 0x93d   : > { %7171 = vrot.lane.b32.xlu0 %v5401_v42, %s10982_s9  ;;  %v14653_v42 = vld [vmem:[#allocation21_spill] sm:$0xff] }
 0x93e   : > { %v10694_v16 = vpop.eup %10693  ;;  %6302 = vadd.xlane.f32.xlu1 %v6301_v38  ;;  %v7180_v11 = vpop.permute.xlu1 %7179  ;;  %10709 = vrcp.f32 %v14653_v42  ;;  %v14660_v42 = vld [vmem:[#allocation72_spill] sm:$0xff] }
 0x93f   : > { %v10696_v57 = vpop.eup %10695  ;;  %v13733_v25 = vsel %vm7351_vm3, %v7337_v52, %v7180_v11  ;;  %v7184_v24 = vpop.permute.xlu0 %7183  ;;  %v13736_v28 = vmul.f32 %v10694_v16, %v14649_v37 }
 0x940   : > { %v13740_v33 = vsel %vm7351_vm3, %v7339_v17, %v7184_v24  ;;  %v10698_v40 = vpop.eup %10697  ;;  %v2155_v49 = vmul.f32 %v10696_v57, %v14650_v47  ;;  %v14654_v17 = vld [vmem:[#allocation63_spill] sm:$0xff]  ;;  %v14655_v57 = vld [vmem:[#allocation120_spill] sm:$0xff] }
 0x941   : > { %v10700_v35 = vpop.eup %10699  ;;  %v2168_v59 = vmul.f32 %v10698_v40, %v14651_v20  ;;  %10711 = vrcp.f32 %v14655_v57  ;;  %v14657_v47 = vld [vmem:[#allocation36_spill] sm:$0xff] }
 0x942   : > { %6293 = vadd.xlane.f32.xlu1 %v6292_v1  ;;  %v7182_v2 = vpop.permute.xlu1 %7181  ;;  %v2156_v30 = vmul.f32 %v10700_v35, %v14652_v7  ;;  %v10702_v26 = vpop.eup %10701  ;;  %10713 = vrcp.f32 %v13643_v55  ;;  %v14656_v1 = vld [vmem:[#allocation61_spill] sm:$0xff] }
 0x943   : > { %v13746_v14 = vsel %vm7351_vm3, %v7338_v6, %v7182_v2  ;;  %v7064_v34 = vpop.permute.xlu0 %7063  ;;  %v2169_v38 = vmul.f32 %v10702_v26, %v14654_v17  ;;  %v10704_v16 = vpop.eup %10703  ;;  %10715 = vrcp.f32 %v13429_v19  ;;  %v14661_v17 = vld [vmem:[#allocation109_spill] sm:$0xff] }
 0x944   : > { %v7327_v13 = vsel %vm570_vm1, %v2155_v49, %v7064_v34  ;;  %v10706_v54 = vpop.eup %10705  ;;  %v2170_v40 = vmul.f32 %v10704_v16, %v14656_v1  ;;  %10717 = vrcp.f32 %v13659_v9  ;;  %v14659_v9 = vld [vmem:[#allocation110_spill] sm:$0xff]  ;;  %v14662_v1 = vld [vmem:[#allocation71_spill] sm:$0xff] }
 0x945   : > { %v2157_v49 = vmul.f32 %v10706_v54, %v14657_v47  ;;  %v10708_v35 = vpop.eup %10707  ;;  %10719 = vrcp.f32 %v13679_v22 }
 0x946   : > { %6290 = vadd.xlane.f32.xlu1 %v6289_v27  ;;  %v7090_v29 = vpop.permute.xlu1 %7089  ;;  %10721 = vrcp.f32 %v13425_v56 }
 0x947   : > { %v7340_v4 = vsel %vm570_vm1, %v2168_v59, %v7090_v29  ;;  %v7066_v6 = vpop.permute.xlu0 %7065  ;;  %v14658_v59 = vld [vmem:[#allocation35_spill] sm:$0xff]  ;;  %10723 = vrcp.f32 %v13686_v21 }
 0x948   : > { %v7328_v52 = vsel %vm570_vm1, %v2156_v30, %v7066_v6  ;;  %v10710_v55 = vpop.eup %10709  ;;  %v2158_v29 = vmul.f32 %v10708_v35, %v14658_v59  ;;  %10725 = vrcp.f32 %v13675_v53  ;;  %v6334_v53 = vsel %vm276_vm0, %v13635_v58, 0.0  ;;  %v14665_v59 = vld [vmem:[#allocation23_spill] sm:$0xff] }
 0x949   : > { %v3795_v6 = vmul.f32 %v10710_v55, %v14659_v9  ;;  %10727 = vrcp.f32 %v13682_v8  ;;  %v6331_v58 = vsel %vm276_vm0, %v13633_v60, 0.0 }
 0x94a   : > { %6296 = vadd.xlane.f32.xlu1 %v6295_v43  ;;  %v7186_v41 = vpop.permute.xlu1 %7185  ;;  %10729 = vrcp.f32 %v13694_v31 }
 0x94b   : > { %v13761_v5 = vsel %vm7351_vm3, %v7340_v4, %v7186_v41  ;;  %v7160_v44 = vpop.permute.xlu0 %7159  ;;  %v10712_v4 = vpop.eup %10711  ;;  %v6328_v41 = vsel %vm276_vm0, %v13627_v45, 0.0  ;;  %v6325_v45 = vsel %vm276_vm0, %v13615_v51, 0.0 }
 0x94c   : > { %v13765_v62 = vsel %vm7351_vm3, %v7327_v13, %v7160_v44 }
 0x94e   : > { %v7092_v11 = vpop.permute.xlu1 %7091 }
 0x94f   : > { %v7341_v0 = vsel %vm570_vm1, %v2169_v38, %v7092_v11  ;;  %v7162_v24 = vpop.permute.xlu0 %7161  ;;  %v3796_v38 = vmul.f32 %v10712_v4, %v14661_v17 }
 0x950   : > { %v13772_v37 = vsel %vm7351_vm3, %v7328_v52, %v7162_v24  ;;  %v10714_v52 = vpop.eup %10713 }
 0x951   : > { %v10716_v44 = vpop.eup %10715  ;;  %v2171_v21 = vmul.f32 %v10714_v52, %v14660_v42  ;;  %v14667_v42 = vld [vmem:[#allocation74_spill] sm:$0xff] }
 0x952   : > { %v7094_v2 = vpop.permute.xlu1 %7093  ;;  %v10718_v16 = vpop.eup %10717 }
 0x953   : > { %v7342_v34 = vsel %vm570_vm1, %v2170_v40, %v7094_v2  ;;  %v7068_v13 = vpop.permute.xlu0 %7067  ;;  %v10720_v54 = vpop.eup %10719  ;;  %v2172_v40 = vmul.f32 %v10718_v16, %v14662_v1  ;;  %v14663_v2 = vld [vmem:[#allocation77_spill] sm:$0xff]  ;;  %v14669_v1 = vld [vmem:[#allocation58_spill] sm:$0xff] }
 0x954   : > { %v7329_v27 = vsel %vm570_vm1, %v2157_v49, %v7068_v13  ;;  %v5415_v47 = vmul.f32 %v10716_v44, %v14663_v2  ;;  %v10722_v49 = vpop.eup %10721 }
 0x956   : > { %v7188_v20 = vpop.permute.xlu1 %7187 }
 0x957   : > { %v13783_v7 = vsel %vm7351_vm3, %v7341_v0, %v7188_v20  ;;  %v7070_v30 = vpop.permute.xlu0 %7069 }
 0x958   : > { %v7330_v19 = vsel %vm570_vm1, %v2158_v29, %v7070_v30  ;;  %v5416_v29 = vmul.f32 %v10722_v49, %v14665_v59  ;;  %v6322_v49 = vsel %vm276_vm0, %v13665_v3, 0.0 }
 0x95a   : > { %v7190_v43 = vpop.permute.xlu1 %7189 }
 0x95b   : > { %v13790_v22 = vsel %vm7351_vm3, %v7342_v34, %v7190_v43  ;;  %7103 = vrot.lane.b32.xlu1 %v3795_v6, %s10981_s6  ;;  %v7164_v26 = vpop.permute.xlu0 %7163  ;;  %v14664_v34 = vld [vmem:[#allocation56_spill] sm:$0xff] }
 0x95c   : > { %v13796_v56 = vsel %vm7351_vm3, %v7329_v27, %v7164_v26  ;;  %6329 = vadd.xlane.f32.xlu0 %v6328_v41  ;;  %v2159_v13 = vmul.f32 %v10720_v54, %v14664_v34  ;;  %v10724_v27 = vpop.eup %10723  ;;  %v6316_v41 = vsel %vm276_vm0, %v13649_v46, 0.0  ;;  %v6313_v54 = vsel %vm276_vm0, %v13647_v48, 0.0  ;;  %v14668_v46 = vld [vmem:[#allocation73_spill] sm:$0xff] }
 0x95d   : > { %v10726_v52 = vpop.eup %10725 }
 0x95e   : > { %v7096_v11 = vpop.permute.xlu1 %7095  ;;  %v10728_v17 = vpop.eup %10727 }
 0x95f   : > { %v7343_v57 = vsel %vm570_vm1, %v2171_v21, %v7096_v11  ;;  %7105 = vrot.lane.b32.xlu1 %v3796_v38, %s10981_s6  ;;  %v7166_v0 = vpop.permute.xlu0 %7165  ;;  %v2173_v21 = vmul.f32 %v10726_v52, %v14667_v42  ;;  %v10730_v38 = vpop.eup %10729 }
 0x960   : > { %v13806_v24 = vsel %vm7351_vm3, %v7330_v19, %v7166_v0  ;;  %6326 = vadd.xlane.f32.xlu0 %v6325_v45  ;;  %v14666_v19 = vld [vmem:[#allocation55_spill] sm:$0xff]  ;;  %v2174_v0 = vmul.f32 %v10728_v17, %v14668_v46 }
 0x961   : > { %v2160_v4 = vmul.f32 %v10724_v27, %v14666_v19 }
 0x962   : > { %v7098_v35 = vpop.permute.xlu1 %7097 }
 0x963   : > { %v7344_v55 = vsel %vm570_vm1, %v2172_v40, %v7098_v35  ;;  %7199 = vrot.lane.b32.xlu1 %v5415_v47, %s10982_s9  ;;  %v7072_v51 = vpop.permute.xlu0 %7071  ;;  %v2161_v40 = vmul.f32 %v10730_v38, %v14669_v1 }
 0x964   : > { %v7331_v20 = vsel %vm570_vm1, %v2159_v13, %v7072_v51  ;;  %6335 = vadd.xlane.f32.xlu0 %v6334_v53  ;;  %v6319_v13 = vsel %vm276_vm0, %v13661_v18, 0.0  ;;  %v14670_v51 = vld [vmem:[#allocation82_spill] sm:$0xff] }
 0x965   : > { %10731 = vrcp.f32 %v14670_v51 }
 0x966   : > { %v7192_v30 = vpop.permute.xlu1 %7191  ;;  %10733 = vrcp.f32 %v13703_v10 }
 0x967   : > { %v13821_v9 = vsel %vm7351_vm3, %v7343_v57, %v7192_v30  ;;  %7201 = vrot.lane.b32.xlu1 %v5416_v29, %s10982_s9  ;;  %v7074_v6 = vpop.permute.xlu0 %7073 }
 0x968   : > { %v7332_v8 = vsel %vm570_vm1, %v2160_v4, %v7074_v6  ;;  %6332 = vadd.xlane.f32.xlu0 %v6331_v58 }
 0x96a   : > { %v7194_v43 = vpop.permute.xlu1 %7193 }
 0x96b   : > { %v13828_v31 = vsel %vm7351_vm3, %v7344_v55, %v7194_v43  ;;  %v7168_v26 = vpop.permute.xlu0 %7167  ;;  %v14672_v43 = vld [vmem:[#allocation57_spill] sm:$0xff] }
 0x96c   : > { %v13833_v44 = vsel %vm7351_vm3, %v7331_v20, %v7168_v26  ;;  %6317 = vadd.xlane.f32.xlu0 %v6316_v41  ;;  %v14671_v20 = vld [vmem:[#allocation28_spill] sm:$0xff] }
 0x96e   : > { %v7100_v60 = vpop.permute.xlu1 %7099 }
 0x96f   : > { %v7345_v16 = vsel %vm570_vm1, %v2173_v21, %v7100_v60  ;;  %v7170_v11 = vpop.permute.xlu0 %7169  ;;  %v10732_v53 = vpop.eup %10731 }
 0x970   : > { %v13840_v57 = vsel %vm7351_vm3, %v7332_v8, %v7170_v11  ;;  %6314 = vadd.xlane.f32.xlu0 %v6313_v54  ;;  %v5402_v3 = vmul.f32 %v10732_v53, %v14671_v20  ;;  %v10734_v58 = vpop.eup %10733  ;;  %v7401_v11 = vld [vmem:[#allocation7] sm:$0xff]  ;;  %v7402_v54 = vld [vmem:[#allocation7 + $0x8] sm:$0xff] }
 0x971   : > { %v2162_v26 = vmul.f32 %v10734_v58, %v14672_v43 }
 0x972   : > { %v7102_v45 = vpop.permute.xlu1 %7101 }
 0x973   : > { %v7346_v2 = vsel %vm570_vm1, %v2174_v0, %v7102_v45  ;;  %v7076_v47 = vpop.permute.xlu0 %7075  ;;  %v9845_v0 = vpack.c.bf16 %v7402_v54, %v7401_v11 }
 0x974   : > { %v7333_v35 = vsel %vm570_vm1, %v2161_v40, %v7076_v47  ;;  %6323 = vadd.xlane.f32.xlu0 %v6322_v49  ;;  %v7404_v47 = vld [vmem:[#allocation7 + $0x18] sm:$0xff] }
 0x975   : > { %9846 = vmatprep.subr.bf16.mxu0 %v9845_v0  ;;  %9853 = vmatprep.subr.bf16.mxu1 %v9845_v0 }
 0x976   : > { %v7196_v34 = vpop.permute.xlu1 %7195  ;;  %9848 = vmatpush3.bf16.msra.mxu0 %v9845_v0  ;;  %9855 = vmatpush3.bf16.msra.mxu1 %v9845_v0 }
 0x977   : > { %v13849_v48 = vsel %vm7351_vm3, %v7345_v16, %v7196_v34 }
 0x978   : > { %6320 = vadd.xlane.f32.xlu0 %v6319_v13 }
 0x97a   : > { %v7198_v27 = vpop.permute.xlu1 %7197 }
 0x97b   : > { %v13854_v55 = vsel %vm7351_vm3, %v7346_v2, %v7198_v27  ;;  %v7403_v2 = vld [vmem:[#allocation7 + $0x10] sm:$0xff] }
 0x97c   : > { %v9849_v49 = vpack.c.bf16 %v7404_v47, %v7403_v2  ;;  %v14673_v2 = vld [vmem:[#allocation68_spill] sm:$0xff] }
 0x97e   : > { %9850 = vmatprep.subr.bf16.mxu0 %v9849_v49  ;;  %9854 = vmatprep.subr.bf16.mxu1 %v9849_v49 }
 0x97f   : > { %9852 = vmatpush3.bf16.msra.mxu0 %v9849_v49  ;;  %9856 = vmatpush3.bf16.msra.mxu1 %v9849_v49 }
 0x98e   : > { %7173 = vrot.lane.b32.xlu0 %v5402_v3, %s10982_s9 }
 0x995   : > { %v9253_v59 = vpop.f32.mrb[104].mxu0 }
 0x996   : > { %v6536_v29 = vpop.f32.mrb[105].mxu0 }
 0x9a4   : > { %v6306_v30 = vpop.xlane.xlu0 %6305 }
 0x9a8   : > { %v6312_v19 = vpop.xlane.xlu0 %6311 }
 0x9ab   : > { %v6282_v4 = vpop.xlane.xlu1 %6281 }
 0x9ac   : > { %10735 = vrcp.f32 %v6282_v4  ;;  %v13860_v18 = vpop.xlane.xlu0 %6308 }
 0x9af   : > { %v6279_v6 = vpop.xlane.xlu1 %6278 }
 0x9b0   : > { %10737 = vrcp.f32 %v6279_v6  ;;  %v13862_v8 = vpop.xlane.xlu0 %6299 }
 0x9b3   : > { %v13864_v52 = vpop.xlane.xlu1 %6287 }
 0x9b4   : > { %v7078_v41 = vpop.permute.xlu0 %7077 }
 0x9b5   : > { %v13868_v42 = vsel %vm570_vm1, %v2162_v26, %v7078_v41  ;;  %v13870_v21 = vpop.f32.mrb[106].mxu0 }
 0x9b6   : > { %v10736_v10 = vpop.eup %10735  ;;  %v6546_v17 = vpop.f32.mrb[107].mxu0 }
 0x9b7   : > { %v6285_v60 = vpop.xlane.xlu1 %6284  ;;  %v7020_v38 = vmul.f32 %v10736_v10, %v9253_v59 }
 0x9b8   : > { %10739 = vrcp.f32 %v6285_v60  ;;  %v7172_v16 = vpop.permute.xlu0 %7171 }
 0x9b9   : > { %v13873_v46 = vsel %vm7351_vm3, %v7333_v35, %v7172_v16  ;;  %7265 = vrot.lane.b32.xlu0 %v7020_v38, %s10983_s28 }
 0x9ba   : > { %v10738_v45 = vpop.eup %10737 }
 0x9bb   : > { %v6270_v1 = vpop.xlane.xlu1 %6269  ;;  %v7019_v40 = vmul.f32 %v10738_v45, %v6536_v29 }
 0x9bc   : > { %10741 = vrcp.f32 %v6270_v1 }
 0x9bd   : > { %7263 = vrot.lane.b32.xlu0 %v7019_v40, %s10983_s28 }
 0x9bf   : > { %v6267_v34 = vpop.xlane.xlu1 %6266 }
 0x9c0   : > { %10743 = vrcp.f32 %v6267_v34  ;;  %v14674_v34 = vld [vmem:[#allocation30_spill] sm:$0xff] }
 0x9c2   : > { %v10740_v35 = vpop.eup %10739 }
 0x9c3   : > { %v6276_v13 = vpop.xlane.xlu1 %6275  ;;  %v7021_v27 = vmul.f32 %v10740_v35, %v6546_v17 }
 0x9c4   : > { %10745 = vrcp.f32 %v6276_v13 }
 0x9c5   : > { %7267 = vrot.lane.b32.xlu0 %v7021_v27, %s10983_s28  ;;  %10747 = vrcp.f32 %v6306_v30 }
 0x9c6   : > { %v10742_v51 = vpop.eup %10741 }
 0x9c7   : > { %v6273_v53 = vpop.xlane.xlu1 %6272  ;;  %v9239_v20 = vpop.f32.mrb[88].mxu1 }
 0x9c8   : > { %10749 = vrcp.f32 %v6273_v53  ;;  %v7016_v3 = vmul.f32 %v10742_v51, %v9239_v20  ;;  %v6427_v59 = vpop.f32.mrb[89].mxu1  ;;  %v14675_v20 = vld [vmem:[#allocation67_spill] sm:$0xff] }
 0x9ca   : > { %v10744_v29 = vpop.eup %10743  ;;  %7257 = vrot.lane.b32.xlu0 %v7016_v3, %s10983_s28 }
 0x9cb   : > { %v6303_v4 = vpop.xlane.xlu1 %6302  ;;  %v7015_v6 = vmul.f32 %v10744_v29, %v6427_v59  ;;  %v14676_v59 = vld [vmem:[#allocation49_spill] sm:$0xff] }
 0x9cc   : > { %10751 = vrcp.f32 %v6303_v4  ;;  %v14677_v4 = vld [vmem:[#allocation80_spill] sm:$0xff] }
 0x9cd   : > { %10753 = vrcp.f32 %v13688_v12 }
 0x9ce   : > { %10755 = vrcp.f32 %v6312_v19  ;;  %7255 = vrot.lane.b32.xlu0 %v7015_v6, %s10983_s28  ;;  %v10746_v58 = vpop.eup %10745 }
 0x9cf   : > { %v13881_v43 = vpop.xlane.xlu1 %6293  ;;  %v9242_v30 = vpop.f32.mrb[90].mxu1  ;;  %10757 = vrcp.f32 %v13696_v15 }
 0x9d0   : > { %v7018_v26 = vmul.f32 %v10746_v58, %v9242_v30  ;;  %v6437_v41 = vpop.f32.mrb[91].mxu1  ;;  %v10748_v10 = vpop.eup %10747  ;;  %10759 = vrcp.f32 %v13860_v18 }
 0x9d1   : > { %10761 = vrcp.f32 %v13862_v8 }
 0x9d2   : > { %v10750_v17 = vpop.eup %10749  ;;  %v9281_v60 = vpop.f32.mrb[108].mxu0  ;;  %7261 = vrot.lane.b32.xlu0 %v7018_v26, %s10983_s28 }
 0x9d3   : > { %v7028_v38 = vmul.f32 %v10748_v10, %v9281_v60  ;;  %v13886_v12 = vpop.xlane.xlu1 %6290  ;;  %v6754_v19 = vpop.f32.mrb[109].mxu0  ;;  %v7017_v16 = vmul.f32 %v10750_v17, %v6437_v41  ;;  %v14678_v41 = vld [vmem:[#allocation20_spill] sm:$0xff] }
 0x9d5   : > { %7281 = vrot.lane.b32.xlu1 %v7028_v38, %s10983_s28 }
 0x9d6   : > { %v10752_v11 = vpop.eup %10751  ;;  %7259 = vrot.lane.b32.xlu0 %v7017_v16, %s10983_s28 }
 0x9d7   : > { %v10754_v54 = vpop.eup %10753  ;;  %v6297_v0 = vpop.xlane.xlu1 %6296  ;;  %v7027_v15 = vmul.f32 %v10752_v11, %v6754_v19 }
 0x9d8   : > { %v10756_v45 = vpop.eup %10755  ;;  %v9284_v1 = vpop.f32.mrb[110].mxu0  ;;  %10763 = vrcp.f32 %v6297_v0  ;;  %v2175_v47 = vmul.f32 %v10754_v54, %v14673_v2 }
 0x9d9   : > { %v7030_v18 = vmul.f32 %v10756_v45, %v9284_v1  ;;  %v6764_v40 = vpop.f32.mrb[111].mxu0  ;;  %v10758_v49 = vpop.eup %10757  ;;  %10765 = vrcp.f32 %v14674_v34 }
 0x9da   : > { %7279 = vrot.lane.b32.xlu0 %v7027_v15, %s10983_s28  ;;  %v10760_v27 = vpop.eup %10759  ;;  %10767 = vrcp.f32 %v13864_v52  ;;  %v2176_v3 = vmul.f32 %v10758_v49, %v14675_v20  ;;  %v14682_v20 = vld [vmem:[#allocation91_spill] sm:$0xff] }
 0x9db   : > { %v7104_v35 = vpop.permute.xlu1 %7103  ;;  %v13894_v13 = vpop.f32.mrb[92].mxu1  ;;  %7285 = vrot.lane.b32.xlu1 %v7030_v18, %s10983_s28  ;;  %v7029_v53 = vmul.f32 %v10760_v27, %v6764_v40  ;;  %10769 = vrcp.f32 %v14676_v59 }
 0x9dc   : > { %v7347_v8 = vsel %vm570_vm1, %v2175_v47, %v7104_v35  ;;  %v13899_v51 = vpop.f32.mrb[93].mxu1  ;;  %10771 = vrcp.f32 %v14677_v4  ;;  %v10762_v58 = vpop.eup %10761  ;;  %v14680_v47 = vld [vmem:[#allocation111_spill] sm:$0xff]  ;;  %v14681_v35 = vld [vmem:[#allocation106_spill] sm:$0xff] }
 0x9dd   : > { %10773 = vrcp.f32 %v13463_v32  ;;  %v14679_v32 = vld [vmem:[#allocation112_spill] sm:$0xff] }
 0x9de   : > { %10775 = vrcp.f32 %v14678_v41 }
 0x9df   : > { %v7106_v29 = vpop.permute.xlu1 %7105  ;;  %7283 = vrot.lane.b32.xlu1 %v7029_v53, %s10983_s28  ;;  %10777 = vrcp.f32 %v13417_v23 }
 0x9e0   : > { %v13906_v6 = vsel %vm570_vm1, %v2176_v3, %v7106_v29 }
 0x9e2   : > { %v10764_v26 = vpop.eup %10763 }
 0x9e3   : > { %v7200_v52 = vpop.permute.xlu1 %7199  ;;  %v9270_v30 = vpop.f32.mrb[94].mxu1 }
 0x9e4   : > { %v13911_v10 = vsel %vm7351_vm3, %v7347_v8, %v7200_v52  ;;  %v7026_v17 = vmul.f32 %v10762_v58, %v9270_v30  ;;  %v6655_v60 = vpop.f32.mrb[95].mxu1  ;;  %v10766_v38 = vpop.eup %10765 }
 0x9e5   : > { %v7025_v19 = vmul.f32 %v10764_v26, %v6655_v60  ;;  %v10768_v16 = vpop.eup %10767  ;;  %v3797_v0 = vmul.f32 %v10766_v38, %v14679_v32  ;;  %v14685_v32 = vld [vmem:[#allocation25_spill] sm:$0xff] }
 0x9e6   : > { %v9309_v11 = vpop.f32.mrb[112].mxu0  ;;  %7277 = vrot.lane.b32.xlu1 %v7026_v17, %s10983_s28  ;;  %v10770_v45 = vpop.eup %10769  ;;  %v7022_v15 = vmul.f32 %v10768_v16, %v13870_v21  ;;  %v14684_v17 = vld [vmem:[#allocation117_spill] sm:$0xff] }
 0x9e7   : > { %v6972_v54 = vpop.f32.mrb[113].mxu0  ;;  %7275 = vrot.lane.b32.xlu0 %v7025_v19, %s10983_s28  ;;  %v10772_v18 = vpop.eup %10771  ;;  %v3798_v23 = vmul.f32 %v10770_v45, %v14680_v47 }
 0x9e8   : > { %v10774_v49 = vpop.eup %10773  ;;  %v3783_v27 = vmul.f32 %v10772_v18, %v14681_v35 }
 0x9e9   : > { %v6330_v1 = vpop.xlane.xlu0 %6329  ;;  %v10776_v21 = vpop.eup %10775  ;;  %v5417_v3 = vmul.f32 %v10774_v49, %v14682_v20 }
 0x9ea   : > { %10779 = vrcp.f32 %v6330_v1  ;;  %v13918_v40 = vpop.f32.mrb[114].mxu0  ;;  %7107 = vrot.lane.b32.xlu1 %v3797_v0, %s10981_s6  ;;  %v10778_v4 = vpop.eup %10777 }
 0x9eb   : > { %v13921_v2 = vpop.f32.mrb[115].mxu0  ;;  %7269 = vrot.lane.b32.xlu0 %v7022_v15, %s10983_s28  ;;  %10781 = vrcp.f32 %v13409_v36  ;;  %v14683_v36 = vld [vmem:[#allocation105_spill] sm:$0xff]  ;;  %v5403_v60 = vmul.f32 %v10778_v4, %v14684_v17 }
 0x9ec   : > { %v3784_v29 = vmul.f32 %v10776_v21, %v14683_v36 }
 0x9ed   : > { %v6327_v34 = vpop.xlane.xlu0 %6326 }
 0x9ee   : > { %10783 = vrcp.f32 %v6327_v34  ;;  %v9295_v8 = vpop.f32.mrb[96].mxu1  ;;  %7109 = vrot.lane.b32.xlu1 %v3798_v23, %s10981_s6 }
 0x9ef   : > { %v6863_v53 = vpop.f32.mrb[97].mxu1  ;;  %7079 = vrot.lane.b32.xlu0 %v3783_v27, %s10981_s6  ;;  %10785 = vrcp.f32 %v13886_v12 }
 0x9f0   : > { %10787 = vrcp.f32 %v13881_v43 }
 0x9f1   : > { %v6336_v59 = vpop.xlane.xlu0 %6335 }
 0x9f2   : > { %v9298_v58 = vpop.f32.mrb[98].mxu1  ;;  %7203 = vrot.lane.b32.xlu1 %v5417_v3, %s10982_s9 }
 0x9f3   : > { %v6873_v52 = vpop.f32.mrb[99].mxu1  ;;  %7081 = vrot.lane.b32.xlu0 %v3784_v29, %s10981_s6 }
 0x9f4   : > { %v10780_v30 = vpop.eup %10779 }
 0x9f5   : > { %v6333_v26 = vpop.xlane.xlu0 %6332  ;;  %v7036_v41 = vmul.f32 %v10780_v30, %v9309_v11  ;;  %v10782_v38 = vpop.eup %10781 }
 0x9f6   : > { %v5404_v0 = vmul.f32 %v10782_v38, %v14685_v32 }
 0x9f7   : > { %7297 = vrot.lane.b32.xlu1 %v7036_v41, %s10983_s28  ;;  %7175 = vrot.lane.b32.xlu0 %v5403_v60, %s10982_s9  ;;  %v13962_v41 = vpop.permute.xlu1 %7201 }
 0x9f8   : > { %v10784_v12 = vpop.eup %10783 }
 0x9f9   : > { %v6318_v19 = vpop.xlane.xlu0 %6317  ;;  %v7035_v16 = vmul.f32 %v10784_v12, %v6972_v54  ;;  %v10786_v45 = vpop.eup %10785 }
 0x9fa   : > { %10789 = vrcp.f32 %v6318_v19  ;;  %v7023_v11 = vmul.f32 %v10786_v45, %v13899_v51  ;;  %v10788_v43 = vpop.eup %10787 }
 0x9fb   : > { %7295 = vrot.lane.b32.xlu1 %v7035_v16, %s10983_s28  ;;  %7177 = vrot.lane.b32.xlu0 %v5404_v0, %s10982_s9  ;;  %v7024_v1 = vmul.f32 %v10788_v43, %v13894_v13 }
 0x9fd   : > { %v6315_v15 = vpop.xlane.xlu0 %6314 }
 0x9fe   : > { %10791 = vrcp.f32 %v6315_v15 }
 0x9ff   : > { %7271 = vrot.lane.b32.xlu0 %v7023_v11, %s10983_s28 }
 0xa01   : > { %v6324_v18 = vpop.xlane.xlu0 %6323 }
 0xa02   : > { %10793 = vrcp.f32 %v6324_v18 }
 0xa03   : > { %7273 = vrot.lane.b32.xlu0 %v7024_v1, %s10983_s28 }
 0xa04   : > { %v10790_v54 = vpop.eup %10789 }
 0xa05   : > { %v6321_v47 = vpop.xlane.xlu0 %6320  ;;  %v7032_v23 = vmul.f32 %v10790_v54, %v9295_v8  ;;  %v14686_v8 = vld [vmem:[#allocation19_spill] sm:$0xff] }
 0xa06   : > { %10795 = vrcp.f32 %v6321_v47 }
 0xa07   : > { %7289 = vrot.lane.b32.xlu1 %v7032_v23, %s10983_s28  ;;  %10797 = vrcp.f32 %v13443_v50  ;;  %v14687_v23 = vld [vmem:[#allocation64_spill] sm:$0xff] }
 0xa08   : > { %v10792_v49 = vpop.eup %10791  ;;  %10799 = vrcp.f32 %v6333_v26 }
 0xa09   : > { %v7031_v51 = vmul.f32 %v10792_v49, %v6863_v53  ;;  %10801 = vrcp.f32 %v6336_v59  ;;  %v7174_v29 = vpop.permute.xlu0 %7173 }
 0xa0a   : > { %10803 = vrcp.f32 %v13707_v39 }
 0xa0b   : > { %7287 = vrot.lane.b32.xlu1 %v7031_v51, %s10983_s28  ;;  %10805 = vrcp.f32 %v13711_v63 }
 0xa0c   : > { %v10794_v34 = vpop.eup %10793 }
 0xa0d   : > { %v7034_v35 = vmul.f32 %v10794_v34, %v9298_v58 }
 0xa0f   : > { %7293 = vrot.lane.b32.xlu1 %v7034_v35, %s10983_s28 }
 0xa10   : > { %v10796_v13 = vpop.eup %10795 }
 0xa11   : > { %v7033_v27 = vmul.f32 %v10796_v13, %v6873_v52  ;;  %v10798_v21 = vpop.eup %10797 }
 0xa12   : > { %v5418_v20 = vmul.f32 %v10798_v21, %v14686_v8  ;;  %v10800_v3 = vpop.eup %10799 }
 0xa13   : > { %7291 = vrot.lane.b32.xlu1 %v7033_v27, %s10983_s28  ;;  %v7037_v50 = vmul.f32 %v10800_v3, %v13921_v2  ;;  %v10802_v53 = vpop.eup %10801 }
 0xa14   : > { %v7038_v36 = vmul.f32 %v10802_v53, %v13918_v40  ;;  %v10804_v47 = vpop.eup %10803 }
 0xa15   : > { %v2163_v49 = vmul.f32 %v10804_v47, %v14687_v23  ;;  %v10806_v51 = vpop.eup %10805 }
 0xa17   : > { %7205 = vrot.lane.b32.xlu1 %v5418_v20, %s10982_s9 }
 0xa1b   : > { %7299 = vrot.lane.b32.xlu1 %v7037_v50, %s10983_s28 }
 0xa1f   : > { %7301 = vrot.lane.b32.xlu1 %v7038_v36, %s10983_s28 }
 0xa2b   : > { %v7266_v59 = vpop.permute.xlu0 %7265 }
 0xa2f   : > { %v7264_v4 = vpop.permute.xlu0 %7263 }
 0xa37   : > { %v7268_v58 = vpop.permute.xlu0 %7267 }
 0xa3c   : > { %v7258_v52 = vpop.permute.xlu0 %7257 }
 0xa3d   : > { %v7378_v2 = vsel %vm7376_vm4, %v13772_v37, %v7258_v52  ;;  %v7382_v37 = vsel %vm7376_vm4, %v13840_v57, %v7266_v59 }
 0xa40   : > { %v7256_v30 = vpop.permute.xlu0 %7255 }
 0xa41   : > { %v7377_v26 = vsel %vm7376_vm4, %v13765_v62, %v7256_v30  ;;  %v7381_v62 = vsel %vm7376_vm4, %v13833_v44, %v7264_v4 }
 0xa42   : > { %9321 = vmatprep.mubr.msk.f32.mxu0 %vm276_vm0, %v7377_v26  ;;  %v7373_v26 = vsel %vm7351_vm3, %v13906_v6, %v13962_v41 }
 0xa43   : > { %9322 = vmatmul.mubr.msk.f32.vlgmr.msra.gmra.mrb[116].mxu0 %vm276_vm0, %v7378_v2 }
 0xa44   : > { %v7262_v40 = vpop.permute.xlu0 %7261 }
 0xa45   : > { %v7380_v38 = vsel %vm7376_vm4, %v13806_v24, %v7262_v40 }
 0xa47   : > { %v7282_v12 = vpop.permute.xlu1 %7281 }
 0xa48   : > { %v7260_v17 = vpop.permute.xlu0 %7259 }
 0xa49   : > { %v7379_v60 = vsel %vm7376_vm4, %v13796_v56, %v7260_v17  ;;  %v7383_v56 = vsel %vm7376_vm4, %v13873_v46, %v7268_v58  ;;  %v7359_v46 = vsel %vm7351_vm3, %v13868_v42, %v7174_v29 }
 0xa4a   : > { %9324 = vmatprep.mubr.msk.f32.mxu0 %vm276_vm0, %v7379_v60 }
 0xa4b   : > { %9325 = vmatmul.mubr.msk.f32.gmra.mrb[118].mxu0 %vm276_vm0, %v7380_v38 }
 0xa4c   : > { %9327 = vmatprep.mubr.msk.f32.mxu0 %vm276_vm0, %v7381_v62  ;;  %v7280_v16 = vpop.permute.xlu0 %7279 }
 0xa4d   : > { %v7286_v19 = vpop.permute.xlu1 %7285  ;;  %v7389_v57 = vsel %vm7376_vm4, %v13740_v33, %v7280_v16 }
 0xa4e   : > { %v7392_v42 = vsel %vm7376_vm4, %v13790_v22, %v7286_v19  ;;  %v14688_v22 = vld [vmem:[#allocation62_spill] sm:$0xff] }
 0xa4f   : > { %9328 = vmatmul.mubr.msk.f32.gmra.mrb[120].mxu0 %vm276_vm0, %v7382_v37  ;;  %v2164_v27 = vmul.f32 %v10806_v51, %v14688_v22 }
 0xa50   : > { %9330 = vmatprep.mubr.msk.f32.mxu0 %vm276_vm0, %v7383_v56 }
 0xa51   : > { %v7284_v24 = vpop.permute.xlu1 %7283 }
 0xa58   : > { %v7278_v32 = vpop.permute.xlu1 %7277 }
 0xa59   : > { %v7276_v0 = vpop.permute.xlu0 %7275  ;;  %v7388_v45 = vsel %vm7376_vm4, %v13746_v14, %v7278_v32  ;;  %v7391_v14 = vsel %vm7376_vm4, %v13783_v7, %v7284_v24 }
 0xa5a   : > { %v7387_v44 = vsel %vm7376_vm4, %v13733_v25, %v7276_v0  ;;  %v7390_v25 = vsel %vm7376_vm4, %v13761_v5, %v7282_v12 }
 0xa5b   : > { %9336 = vmatprep.mubr.msk.f32.mxu1 %vm276_vm0, %v7387_v44 }
 0xa5c   : > { %9337 = vmatmul.mubr.msk.f32.vlgmr.msra.gmra.mrb[100].mxu1 %vm276_vm0, %v7388_v45  ;;  %v7108_v11 = vpop.permute.xlu1 %7107 }
 0xa5d   : > { %v7270_v15 = vpop.permute.xlu0 %7269  ;;  %9339 = vmatprep.mubr.msk.f32.mxu1 %vm276_vm0, %v7389_v57 }
 0xa5e   : > { %v7384_v43 = vsel %vm7376_vm4, %v7359_v46, %v7270_v15 }
 0xa5f   : > { %9331 = vmatmul.mubr.msk.f32.gmra.mrb[122].mxu0 %vm276_vm0, %v7384_v43 }
 0xa60   : > { %9340 = vmatmul.mubr.msk.f32.gmra.mrb[102].mxu1 %vm276_vm0, %v7390_v25  ;;  %v7110_v1 = vpop.permute.xlu1 %7109 }
 0xa61   : > { %v7080_v33 = vpop.permute.xlu0 %7079  ;;  %9342 = vmatprep.mubr.msk.f32.mxu1 %vm276_vm0, %v7391_v14  ;;  %v7350_v17 = vsel %vm570_vm1, %v13736_v28, %v7110_v1 }
 0xa62   : > { %v7335_v34 = vsel %vm570_vm1, %v2163_v49, %v7080_v33 }
 0xa64   : > { %9343 = vmatmul.mubr.msk.f32.gmra.mrb[104].mxu1 %vm276_vm0, %v7392_v42  ;;  %v7204_v18 = vpop.permute.xlu1 %7203 }
 0xa65   : > { %v7082_v5 = vpop.permute.xlu0 %7081 }
 0xa66   : > { %v7336_v63 = vsel %vm570_vm1, %v2164_v27, %v7082_v5 }
 0xa69   : > { %v7176_v54 = vpop.permute.xlu0 %7175  ;;  %v7298_v39 = vpop.permute.xlu1 %7297 }
 0xa6a   : > { %v7360_v35 = vsel %vm7351_vm3, %v7335_v34, %v7176_v54  ;;  %v7398_v2 = vsel %vm7376_vm4, %v7373_v26, %v7298_v39 }
 0xa6d   : > { %v7178_v7 = vpop.permute.xlu0 %7177  ;;  %v7296_v20 = vpop.permute.xlu1 %7295 }
 0xa6e   : > { %v7361_v8 = vsel %vm7351_vm3, %v7336_v63, %v7178_v7 }
 0xa71   : > { %v7272_v13 = vpop.permute.xlu0 %7271 }
 0xa72   : > { %v7385_v21 = vsel %vm7376_vm4, %v7360_v35, %v7272_v13 }
 0xa73   : > { %9333 = vmatprep.mubr.msk.f32.mxu0 %vm276_vm0, %v7385_v21 }
 0xa75   : > { %v7274_v3 = vpop.permute.xlu0 %7273 }
 0xa76   : > { %v7386_v50 = vsel %vm7376_vm4, %v7361_v8, %v7274_v3 }
 0xa77   : > { %9334 = vmatmul.mubr.msk.f32.gmra.mrb[124].mxu0 %vm276_vm0, %v7386_v50 }
 0xa79   : > { %v7290_v53 = vpop.permute.xlu1 %7289 }
 0xa7a   : > { %v7394_v59 = vsel %vm7376_vm4, %v13828_v31, %v7290_v53 }
 0xa7d   : > { %v7288_v36 = vpop.permute.xlu1 %7287 }
 0xa7e   : > { %v7393_v29 = vsel %vm7376_vm4, %v13821_v9, %v7288_v36  ;;  %v7397_v9 = vsel %vm7376_vm4, %v13911_v10, %v7296_v20 }
 0xa7f   : > { %9345 = vmatprep.mubr.msk.f32.mxu1 %vm276_vm0, %v7393_v29 }
 0xa80   : > { %9346 = vmatmul.mubr.msk.f32.gmra.mrb[106].mxu1 %vm276_vm0, %v7394_v59 }
 0xa81   : > { %v7294_v4 = vpop.permute.xlu1 %7293 }
 0xa82   : > { %v7396_v30 = vsel %vm7376_vm4, %v13854_v55, %v7294_v4 }
 0xa85   : > { %v7292_v58 = vpop.permute.xlu1 %7291 }
 0xa86   : > { %v7395_v52 = vsel %vm7376_vm4, %v13849_v48, %v7292_v58  ;;  %v7349_v48 = vsel %vm570_vm1, %v13726_v61, %v7108_v11  ;;  %v14046_v61 = vld [vmem:[%s14179_s3] ss:$0 sm:$0xff] }
 0xa87   : > { %9348 = vmatprep.mubr.msk.f32.mxu1 %vm276_vm0, %v7395_v52  ;;  %v7374_v55 = vsel %vm7351_vm3, %v7349_v48, %v7204_v18 }
 0xa88   : > { %9349 = vmatmul.mubr.msk.f32.gmra.mrb[108].mxu1 %vm276_vm0, %v7396_v30 }
 0xa89   : > { %9351 = vmatprep.mubr.msk.f32.mxu1 %vm276_vm0, %v7397_v9  ;;  %v7206_v31 = vpop.permute.xlu1 %7205 }
 0xa8a   : > { %v7375_v6 = vsel %vm7351_vm3, %v7350_v17, %v7206_v31 }
 0xa8c   : > { %9352 = vmatmul.mubr.msk.f32.gmra.mrb[110].mxu1 %vm276_vm0, %v7398_v2 }
 0xa8d   : > { %v7300_v10 = vpop.permute.xlu1 %7299 }
 0xa8e   : > { %v7399_v40 = vsel %vm7376_vm4, %v7374_v55, %v7300_v10 }
 0xa8f   : > { %9354 = vmatprep.mubr.msk.f32.mxu1 %vm276_vm0, %v7399_v40 }
 0xa91   : > { %v7302_v41 = vpop.permute.xlu1 %7301 }
 0xa92   : > { %v7400_v60 = vsel %vm7376_vm4, %v7375_v6, %v7302_v41 }
 0xa93   : > { %9355 = vmatmul.mubr.msk.f32.gmra.mrb[112].mxu1 %vm276_vm0, %v7400_v60 }
 0xb16   : > { %v9323_v38 = vpop.f32.mrb[116].mxu0 }
 0xb17   : > { %v7556_v12 = vadd.f32 %v9323_v38, %v14046_v61  ;;  %v7550_v62 = vpop.f32.mrb[117].mxu0 }
 0xb18   : > { %v7551_v37 = vadd.f32 %v14046_v61, %v7550_v62 }
 0xb19   : > { %7670 = vst.msk [vmem:[%s14052_s23 + $0x8] sm:$0xff] %vm276_vm0, %v7556_v12 }
 0xb1a   : > { %7669 = vst.msk [vmem:[%s14052_s23] sm:$0xff] %vm276_vm0, %v7551_v37 }
 0xb1e   : > { %v9326_v28 = vpop.f32.mrb[118].mxu0 }
 0xb1f   : > { %v7566_v19 = vadd.f32 %v9326_v28, %v14046_v61  ;;  %v7560_v56 = vpop.f32.mrb[119].mxu0 }
 0xb20   : > { %v7561_v24 = vadd.f32 %v14046_v61, %v7560_v56 }
 0xb21   : > { %7672 = vst.msk [vmem:[%s14052_s23 + $0x18] sm:$0xff] %vm276_vm0, %v7566_v19 }
 0xb22   : > { %7671 = vst.msk [vmem:[%s14052_s23 + $0x10] sm:$0xff] %vm276_vm0, %v7561_v24  ;;  %v9329_v16 = vpop.f32.mrb[120].mxu0 }
 0xb23   : > { %v7576_v32 = vadd.f32 %v9329_v16, %v14046_v61  ;;  %v7570_v0 = vpop.f32.mrb[121].mxu0 }
 0xb24   : > { %v7571_v44 = vadd.f32 %v14046_v61, %v7570_v0 }
 0xb25   : > { %7674 = vst.msk [vmem:[%s14052_s23 + $0x28] sm:$0xff] %vm276_vm0, %v7576_v32 }
 0xb26   : > { %7673 = vst.msk [vmem:[%s14052_s23 + $0x20] sm:$0xff] %vm276_vm0, %v7571_v44 }
 0xb2f   : > { %v9338_v45 = vpop.f32.mrb[100].mxu1 }
 0xb30   : > { %v7606_v57 = vadd.f32 %v9338_v45, %v14046_v61  ;;  %v7600_v46 = vpop.f32.mrb[101].mxu1 }
 0xb31   : > { %v7601_v11 = vadd.f32 %v14046_v61, %v7600_v46 }
 0xb32   : > { %7680 = vst.msk [vmem:[%s14052_s23 + $0x58] sm:$0xff] %vm276_vm0, %v7606_v57  ;;  %v9332_v15 = vpop.f32.mrb[122].mxu0 }
 0xb33   : > { %7679 = vst.msk [vmem:[%s14052_s23 + $0x50] sm:$0xff] %vm276_vm0, %v7601_v11  ;;  %v7586_v43 = vadd.f32 %v9332_v15, %v14046_v61  ;;  %v7580_v25 = vpop.f32.mrb[123].mxu0  ;;  %v9341_v14 = vpop.f32.mrb[102].mxu1 }
 0xb34   : > { %v7581_v33 = vadd.f32 %v14046_v61, %v7580_v25  ;;  %v7616_v42 = vadd.f32 %v9341_v14, %v14046_v61  ;;  %v7610_v1 = vpop.f32.mrb[103].mxu1 }
 0xb35   : > { %7676 = vst.msk [vmem:[%s14052_s23 + $0x38] sm:$0xff] %vm276_vm0, %v7586_v43  ;;  %v7611_v5 = vadd.f32 %v14046_v61, %v7610_v1 }
 0xb36   : > { %7675 = vst.msk [vmem:[%s14052_s23 + $0x30] sm:$0xff] %vm276_vm0, %v7581_v33  ;;  %7682 = vst.msk [vmem:[%s14052_s23 + $0x68] sm:$0xff] %vm276_vm0, %v7616_v42 }
 0xb37   : > { %7681 = vst.msk [vmem:[%s14052_s23 + $0x60] sm:$0xff] %vm276_vm0, %v7611_v5  ;;  %v9344_v18 = vpop.f32.mrb[104].mxu1 }
 0xb38   : > { %v7626_v54 = vadd.f32 %v9344_v18, %v14046_v61  ;;  %v7620_v47 = vpop.f32.mrb[105].mxu1 }
 0xb39   : > { %v7621_v7 = vadd.f32 %v14046_v61, %v7620_v47 }
 0xb3a   : > { %7684 = vst.msk [vmem:[%s14052_s23 + $0x78] sm:$0xff] %vm276_vm0, %v7626_v54 }
 0xb3b   : > { %7683 = vst.msk [vmem:[%s14052_s23 + $0x70] sm:$0xff] %vm276_vm0, %v7621_v7 }
 0xb4a   : > { %v9335_v23 = vpop.f32.mrb[124].mxu0 }
 0xb4b   : > { %v7596_v49 = vadd.f32 %v9335_v23, %v14046_v61  ;;  %v7590_v51 = vpop.f32.mrb[125].mxu0 }
 0xb4c   : > { %v7591_v39 = vadd.f32 %v14046_v61, %v7590_v51 }
 0xb4d   : > { %7678 = vst.msk [vmem:[%s14052_s23 + $0x48] sm:$0xff] %vm276_vm0, %v7596_v49 }
 0xb4e   : > { %7677 = vst.msk [vmem:[%s14052_s23 + $0x40] sm:$0xff] %vm276_vm0, %v7591_v39 }
 0xb53   : > { %v9347_v34 = vpop.f32.mrb[106].mxu1 }
 0xb54   : > { %v7636_v35 = vadd.f32 %v9347_v34, %v14046_v61  ;;  %v7630_v13 = vpop.f32.mrb[107].mxu1 }
 0xb55   : > { %v7631_v22 = vadd.f32 %v14046_v61, %v7630_v13 }
 0xb56   : > { %7686 = vst.msk [vmem:[%s14052_s23 + $0x88] sm:$0xff] %vm276_vm0, %v7636_v35 }
 0xb57   : > { %7685 = vst.msk [vmem:[%s14052_s23 + $0x80] sm:$0xff] %vm276_vm0, %v7631_v22 }
 0xb5b   : > { %v9350_v27 = vpop.f32.mrb[108].mxu1 }
 0xb5c   : > { %v7646_v21 = vadd.f32 %v9350_v27, %v14046_v61  ;;  %v7640_v63 = vpop.f32.mrb[109].mxu1 }
 0xb5d   : > { %v7641_v8 = vadd.f32 %v14046_v61, %v7640_v63 }
 0xb5e   : > { %7688 = vst.msk [vmem:[%s14052_s23 + $0x98] sm:$0xff] %vm276_vm0, %v7646_v21 }
 0xb5f   : > { %7687 = vst.msk [vmem:[%s14052_s23 + $0x90] sm:$0xff] %vm276_vm0, %v7641_v8  ;;  %v9353_v20 = vpop.f32.mrb[110].mxu1 }
 0xb60   : > { %v7656_v3 = vadd.f32 %v9353_v20, %v14046_v61  ;;  %v7650_v50 = vpop.f32.mrb[111].mxu1 }
 0xb61   : > { %v7651_v53 = vadd.f32 %v14046_v61, %v7650_v50 }
 0xb62   : > { %7690 = vst.msk [vmem:[%s14052_s23 + $0xa8] sm:$0xff] %vm276_vm0, %v7656_v3 }
 0xb63   : > { %7689 = vst.msk [vmem:[%s14052_s23 + $0xa0] sm:$0xff] %vm276_vm0, %v7651_v53 }
 0xb66   : > { %v9356_v36 = vpop.f32.mrb[112].mxu1 }
 0xb67   : > { %v7666_v29 = vadd.f32 %v9356_v36, %v14046_v61  ;;  %v7660_v59 = vpop.f32.mrb[113].mxu1 }
 0xb68   : > { %v7661_v4 = vadd.f32 %v14046_v61, %v7660_v59 }
 0xb69   : > { %7692 = vst.msk [vmem:[%s14052_s23 + $0xb8] sm:$0xff] %vm276_vm0, %v7666_v29 }
 0xb6a   : > { %7691 = vst.msk [vmem:[%s14052_s23 + $0xb0] sm:$0xff] %vm276_vm0, %v7661_v4 }
 0xb6b   : > { %10906 = shalt.err (!%p10903_p1)
}
 0xb6c   : > { %s10907_s24 = scalar_lea.hbm %s14125_s25, 3072  ;;  %s10911_s27 = scalar_lea.hbm %s14180_s4, 6144 }
 0xb6d   : > { %p10908_p13 = scmp.ne.s32.totalorder %s14125_s25, %s10907_s24  ;;  %p10912_p4 = scmp.lt.u32.totalorder %s14125_s25, %s14180_s4 }
 0xb6e   : > { %p10913_p5 = scmp.lt.u32.totalorder %s10911_s27, %s10907_s24  ;;  %p10915_p11 = scmp.lt.u32.totalorder %s10907_s24, %s14125_s25 }
 0xb6f   : > { %p10909_p6 = pnand %p10908_p13, %p14689_p0 }
 0xb70   : > { %p10914_p8 = por %p10913_p5, %p10912_p4 }
 0xb71   : > { %p10910_p10 = pneg %p10909_p6 }
 0xb72   : > { %p10916_p2 = por %p10915_p11, %p10914_p8 }
 0xb74   : > { %p10917_p3 = pnand %p10916_p2, %p10910_p10 }
 0xb76   : > { %10920 = shalt.err (!%p10917_p3)
}
 0xb77   : > { %s10985_s10 = smov 128  }
 0xb78   : > { %9869 = dma.vmem_to_hbm [thread:$0]  (%p14689_p0), %s14127_s11, 3072, %s14125_s25, %s7694_s19, %s10985_s10, %s10985_s10, %s10981_s6  }
 0xb79 PF: > { %s7723_s12 = sand.u32 1, %s10951_s15   ;;  %p14690_p7 = scmp.ne.s32.totalorder %s14304_s22, 0 }
 0xb7a   : > { %p14691_p9 = scmp.ge.s32.totalorder %s10963_s18, 2  ;;  %s7724_s5 = scalar_lea.sflag [#allocation4], %s7723_s12 }
 0xb7c   : > { %p9883_p12 = pnand %p14691_p9, %p14690_p7 }
 0xb7e   : > { %10946 = dma.done.wait (!%p9883_p12), %s7724_s5, 3072  }
 0xb7f   : > { %10948 = vsyncadd (!%p9883_p12), %s7724_s5, 4294964224  ;;  %p18_p1 = scmp.ge.s32.totalorder %s11127_s26, 4   ;;  %s14692_s15 = smov %s10955_s16 }
 0xb80   : > { %s14693_s16 = smov %s10959_s17  ;;  %s14694_s17 = smov %s11143_s14 }
 0xb81   : > { %s14695_s18 = smov %s11127_s26  ;;  %20 = sbr.rel (!%p18_p1) target bundleno = 6 (0x6), region = 89 }
 0xb88   :  { %7729 = vsyncpa [#allocation3], 1 }
 0xb89   :  { %7731 = vsyncpa [#allocation3 + $0x1], 1 }
 0xb8a   :  { %7732 = vsyncpa [#allocation6], 1 }
 0xb8b   :  { %7733 = vsyncpa [#allocation4], 1 }
 0xb8c   :  { %7735 = vsyncpa [#allocation4 + $0x1], 1 }

</bundles_post_ra>
